<compile_context>
chip_gen: v7x
topology: tpu7x:2x2x1
jax: 0.10.0
libtpu: 0.0.40
codegen_flags: <defaults>
</compile_context>

<pallas_src>
import functools

import jax
import jax.numpy as jnp
from jax.experimental import pallas as pl
from jax.experimental.pallas import tpu as pltpu


def _leaky_relu(x, alpha):
    # For 0 < alpha < 1, max(x, alpha*x) == LeakyReLU(x): mul+max (2 VPU ops)
    # instead of cmp+select+mul.
    return jnp.maximum(x, alpha * x)


def _round_up(a, b):
    return (a + b - 1) // b * b


def smoothnet_mlp_kernel(x_ref, enc_w_ref, rb_w1_ref, rb_w2_ref, dec_w_ref,
                         bias_ref, out_ref, *,
                         num_blocks, window_size, tpb,
                         hidden_size, res_hidden_size, output_size):
    """Per-window MLP in transposed (feature, column) layout.

    x_ref:    (Trows, NCp) f32, VMEM-resident (constant index_map)
    enc_w:    (H, W)      bf16
    rb_w1:    (nb, R, H)  bf16
    rb_w2:    (nb, H, R)  bf16
    dec_w:    (O, H)      bf16
    bias_ref: (Dmax, 2*nb+2) f32  -- packed bias table (layers along lanes)
    out_ref:  (O, tm) f32, columns m = t0*NCp + j (lane-dense)
    """
    W = window_size
    H, R, O = hidden_size, res_hidden_size, output_size

    t_base = pl.program_id(0) * tpb
    if tpb % 8 == 0:
        t_base = pl.multiple_of(t_base, 8)

    # One (usually sublane-aligned) dynamic load covering all tpb windows of
    # this tile; cast the small block to bf16 once.
    big = x_ref[pl.ds(t_base, W + tpb - 1), :].astype(jnp.bfloat16)
    # Window matrix (W, tm): lane-block s holds rows [s, s+W) of `big`
    # (lane-axis concat of 2-D (W, NCp) blocks -- no sublane re-layouts).
    xw = jnp.concatenate([big[s:s + W, :] for s in range(tpb)], axis=1)

    # Encoder: (H, tm) = (H, W) @ (W, tm), f32 accumulation on the MXU.
    h = jnp.dot(enc_w_ref[...], xw, preferred_element_type=jnp.float32)
    h = _leaky_relu(h + bias_ref[0:H, 0:1], 0.1)

    # Residual blocks (dropout == identity at inference).
    for b in range(num_blocks):
        b1 = bias_ref[0:R, 1 + 2 * b:2 + 2 * b]
        b2 = bias_ref[0:H, 2 + 2 * b:3 + 2 * b]
        y = jnp.dot(rb_w1_ref[b], h.astype(jnp.bfloat16),
                    preferred_element_type=jnp.float32) + b1
        y = _leaky_relu(y, 0.2)
        y = jnp.dot(rb_w2_ref[b], y.astype(jnp.bfloat16),
                    preferred_element_type=jnp.float32) + b2
        y = _leaky_relu(y, 0.2)
        h = h + y                                     # f32 residual stream

    # Decoder: (O, tm).
    d = jnp.dot(dec_w_ref[...], h.astype(jnp.bfloat16),
                preferred_element_type=jnp.float32)
    d = d + bias_ref[0:O, 2 * num_blocks + 1:2 * num_blocks + 2]
    out_ref[...] = d.astype(out_ref.dtype)


def init_params(key, window_size, output_size, hidden_size, res_hidden_size,
                num_blocks, dtype=jnp.float32):
    """PyTorch-convention params: weight (out, in), bias (out, 1)."""
    ks = jax.random.split(key, 2 + 2 * num_blocks)

    def lin(k, fan_in, fan_out):
        kw, kb = jax.random.split(k)
        scale = 1.0 / (fan_in ** 0.5)
        w = jax.random.uniform(kw, (fan_out, fan_in), dtype, -scale, scale)
        b = jax.random.uniform(kb, (fan_out, 1), dtype, -scale, scale)
        return w, b

    enc_w, enc_b = lin(ks[0], window_size, hidden_size)
    dec_w, dec_b = lin(ks[1], hidden_size, output_size)
    rb_w1, rb_b1, rb_w2, rb_b2 = [], [], [], []
    for i in range(num_blocks):
        w1, b1 = lin(ks[2 + 2 * i], hidden_size, res_hidden_size)
        w2, b2 = lin(ks[3 + 2 * i], res_hidden_size, hidden_size)
        rb_w1.append(w1); rb_b1.append(b1); rb_w2.append(w2); rb_b2.append(b2)
    return dict(
        enc_w=enc_w, enc_b=enc_b,
        rb_w1=jnp.stack(rb_w1), rb_b1=jnp.stack(rb_b1),
        rb_w2=jnp.stack(rb_w2), rb_b2=jnp.stack(rb_b2),
        dec_w=dec_w, dec_b=dec_b,
    )


def _vmem_limit_bytes(*, Trows, NCp, W, H, R, O, nb, L, tm, single_buffer):
    """Rough resident-set estimate -> scoped-VMEM limit (clamped 32-64 MiB)."""
    r = _round_up
    const = (r(Trows, 8) * NCp * 4                              # x (f32)
             + (r(H, 16) * r(W, 128)
                + nb * (r(R, 16) * r(H, 128) + r(H, 16) * r(R, 128))
                + r(O, 16) * r(H, 128)) * 2                     # bf16 weights
             + r(max(H, R, O), 8) * r(L, 128) * 4)              # packed biases
    if not single_buffer:
        const *= 2
    out_bufs = 2 * r(O, 8) * tm * 4                             # dbl-buf out
    scratch = (r(W, 16) * 2 + (2 * r(H, 8) + r(R, 8) + r(O, 8)) * 4) * tm
    need = const + out_bufs + scratch
    return int(min(64 << 20, max(32 << 20, 2 * need)))


def smoothnet_forward(x, params, *, window_size, output_size, num_blocks,
                      tm_target=1024, single_buffer_constants=True):
    N, C, T = x.shape
    W, O = window_size, output_size
    assert T >= W, "sequence length must be >= window_size"
    assert O <= W, "output_size must be <= window_size"
    nw = T - W + 1
    NC = N * C
    NCp = _round_up(NC, 128)            # lane-align channel axis
    H = params["enc_w"].shape[0]
    R = params["rb_w1"].shape[1]
    nb = num_blocks

    # Tile geometry: tpb = timesteps per grid step, tm = tpb * NCp columns.
    tpb = max(1, min(tm_target // NCp if NCp <= tm_target else 1, nw))
    tm = tpb * NCp
    nw_pad = _round_up(nw, tpb)
    n_steps = nw_pad // tpb
    M = nw * NCp
    M_pad = nw_pad * NCp
    Trows = nw_pad + W - 1              # rows needed so all windows stay in-bounds

    # (N, C, T) -> (T, NC) -> zero-pad to (Trows, NCp) f32 (column m = t0*NCp + j).
    xT = jnp.transpose(x.reshape(NC, T)).astype(jnp.float32)
    x_pad = jnp.pad(xT, ((0, Trows - T), (0, NCp - NC)))

    # Weights to bf16 (halves weight DMA, 2x MXU throughput); biases stay f32.
    bf = jnp.bfloat16
    enc_w = params["enc_w"].astype(bf)
    dec_w = params["dec_w"].astype(bf)
    rb_w1 = params["rb_w1"].astype(bf)
    rb_w2 = params["rb_w2"].astype(bf)

    # Pack all biases into one small f32 table: rows = feature dim (sublanes),
    # columns = layer index (lanes). col 0: enc, 1+2b: rb1[b], 2+2b: rb2[b],
    # 2*nb+1: dec.
    L = 2 * nb + 2
    Dmax = max(H, R, O)
    bias_all = jnp.zeros((Dmax, L), jnp.float32)
    bias_all = bias_all.at[:H, 0].set(params["enc_b"][:, 0])
    for b in range(nb):
        bias_all = bias_all.at[:R, 1 + 2 * b].set(params["rb_b1"][b, :, 0])
        bias_all = bias_all.at[:H, 2 + 2 * b].set(params["rb_b2"][b, :, 0])
    bias_all = bias_all.at[:O, 1 + 2 * nb].set(params["dec_b"][:, 0])

    kernel = functools.partial(
        smoothnet_mlp_kernel, num_blocks=nb, window_size=W, tpb=tpb,
        hidden_size=H, res_hidden_size=R, output_size=O)

    def const_spec(shape):
        idx_map = (lambda i: (0, 0)) if len(shape) == 2 else (lambda i: (0, 0, 0))
        if single_buffer_constants:
            # Resident operands gain nothing from double-buffering.
            return pl.BlockSpec(shape, idx_map, pipeline_mode=pl.Buffered(1))
        return pl.BlockSpec(shape, idx_map)

    in_specs = [
        const_spec((Trows, NCp)),       # x  (resident)
        const_spec((H, W)),             # enc_w
        const_spec((nb, R, H)),         # rb_w1
        const_spec((nb, H, R)),         # rb_w2
        const_spec((O, H)),             # dec_w
        const_spec((Dmax, L)),          # packed biases
    ]

    vmem_limit = _vmem_limit_bytes(Trows=Trows, NCp=NCp, W=W, H=H, R=R, O=O,
                                   nb=nb, L=L, tm=tm,
                                   single_buffer=single_buffer_constants)

    d = pl.pallas_call(
        kernel,
        out_shape=jax.ShapeDtypeStruct((O, M_pad), jnp.float32),
        grid_spec=pltpu.PrefetchScalarGridSpec(
            num_scalar_prefetch=0,
            grid=(n_steps,),
            in_specs=in_specs,
            out_specs=pl.BlockSpec((O, tm), lambda i: (0, i)),
        ),
        compiler_params=pltpu.CompilerParams(
            dimension_semantics=("parallel",),
            vmem_limit_bytes=vmem_limit),
    )(x_pad, enc_w, rb_w1, rb_w2, dec_w, bias_all)

    # Overlap-add epilogue: O shifted static-slice adds (no (O,T,NC) gather),
    # then a single reciprocal-scale.
    d3 = d[:, :M].reshape(O, nw, NCp)[:, :, :NC]           # (O, nw, NC)
    out_T = jnp.zeros((T, NC), jnp.float32)
    for k in range(O):
        out_T = out_T.at[k:k + nw, :].add(d3[k])
    t_idx = jnp.arange(T)[None, :]
    k_idx = jnp.arange(O)[:, None]
    count = jnp.sum((t_idx >= k_idx) & (t_idx - k_idx < nw),
                    axis=0).astype(jnp.float32)            # (T,)
    # Matches PyTorch `out.div(count)` (inf/nan tail if output_size < window).
    out_T = out_T * (1.0 / count)[:, None]
    return jnp.transpose(out_T).reshape(N, C, T).astype(x.dtype)


def smoothnet_reference(x, params, *, window_size, output_size, num_blocks):
    """Pure-jnp reference mirroring the PyTorch forward (dropout = identity,
    bf16 matmul operands + f32 bias to match the kernel's precision)."""
    N, C, T = x.shape
    W, O = window_size, output_size
    nw = T - W + 1
    idx = jnp.arange(nw)[:, None] + jnp.arange(W)[None, :]
    h = x[:, :, idx]                                       # (N, C, nw, W)
    bf = jnp.bfloat16

    def lin(a, w, b):
        return jnp.dot(a.astype(bf), w.astype(bf).T,
                       preferred_element_type=jnp.float32) + b[:, 0]

    h = _leaky_relu(lin(h, params["enc_w"], params["enc_b"]), 0.1)
    for i in range(num_blocks):
        y = _leaky_relu(lin(h, params["rb_w1"][i], params["rb_b1"][i]), 0.2)
        y = _leaky_relu(lin(y, params["rb_w2"][i], params["rb_b2"][i]), 0.2)
        h = h + y
    d = lin(h, params["dec_w"], params["dec_b"])           # (N, C, nw, O)

    out = jnp.zeros((N, C, T), jnp.float32)
    count = jnp.zeros((T,), jnp.float32)
    for t in range(nw):
        out = out.at[:, :, t:t + O].add(d[:, :, t, :])
        count = count.at[t:t + O].add(1.0)
    return (out / count).astype(x.dtype)


if __name__ == "__main__":
    # Small shapes consistent with the module: x is (N, C, T).
    N, C, T = 2, 4, 16
    window_size = 8
    output_size = 8   # == window_size so count > 0 everywhere (no 0/0 tail)
    hidden_size = 32
    res_hidden_size = 32
    num_blocks = 3

    key = jax.random.PRNGKey(0)
    kx, kp = jax.random.split(key)
    x = jax.random.normal(kx, (N, C, T), jnp.float32)
    params = init_params(kp, window_size, output_size, hidden_size,
                         res_hidden_size, num_blocks)

    def make_fwd(single_buffer):
        return jax.jit(functools.partial(
            smoothnet_forward, window_size=window_size,
            output_size=output_size, num_blocks=num_blocks,
            tm_target=1024, single_buffer_constants=single_buffer))

    try:
        out = jax.block_until_ready(make_fwd(True)(x, params))
    except Exception:
        # pipeline_mode=pl.Buffered(1) not supported by this jax build:
        # fall back to default (double-buffered) BlockSpecs.
        out = jax.block_until_ready(make_fwd(False)(x, params))

    ref = smoothnet_reference(x, params, window_size=window_size,
                              output_size=output_size, num_blocks=num_blocks)
    assert out.shape == (N, C, T)
    assert jnp.allclose(out, ref, atol=1e-3, rtol=1e-3), "mismatch vs reference"
    print("KERNEL_OK")
</pallas_src>

<mosaic_0001>
module attributes {stable_mosaic.version = 11 : i64} {
  func.func @smoothnet_mlp_kernel(%arg0: i32, %arg1: memref<23x128xf32, #tpu.memory_space<vmem>>, %arg2: memref<32x8xbf16, #tpu.memory_space<vmem>>, %arg3: memref<3x32x32xbf16, #tpu.memory_space<vmem>>, %arg4: memref<3x32x32xbf16, #tpu.memory_space<vmem>>, %arg5: memref<8x32xbf16, #tpu.memory_space<vmem>>, %arg6: memref<32x8xf32, #tpu.memory_space<vmem>>, %arg7: memref<8x1024xf32, #tpu.memory_space<vmem>>) attributes {dimension_semantics = [#tpu.dimension_semantics<parallel>], iteration_bounds = array<i64: 2>, scalar_prefetch = 0 : i64, scratch_operands = 0 : i64, tpu.core_type = #tpu.core_type<tc>, window_params = [{pipeline_mode = #tpu.pipeline_mode<synchronous>, transform_indices = @transform_0, window_bounds = array<i64: 23, 128>}, {pipeline_mode = #tpu.pipeline_mode<synchronous>, transform_indices = @transform_1, window_bounds = array<i64: 32, 8>}, {pipeline_mode = #tpu.pipeline_mode<synchronous>, transform_indices = @transform_2, window_bounds = array<i64: 3, 32, 32>}, {pipeline_mode = #tpu.pipeline_mode<synchronous>, transform_indices = @transform_3, window_bounds = array<i64: 3, 32, 32>}, {pipeline_mode = #tpu.pipeline_mode<synchronous>, transform_indices = @transform_4, window_bounds = array<i64: 8, 32>}, {pipeline_mode = #tpu.pipeline_mode<synchronous>, transform_indices = @transform_5, window_bounds = array<i64: 32, 8>}, {transform_indices = @transform_6, window_bounds = array<i64: 8, 1024>}]} {
    %c8_i32 = arith.constant 8 : i32
    %0 = arith.muli %arg0, %c8_i32 : i32
    %1 = tpu.assume_multiple %0, 8 : i32
    %2 = arith.index_cast %1 : i32 to index
    %c0 = arith.constant 0 : index
    %3 = vector.load %arg1[%2, %c0] : memref<23x128xf32, #tpu.memory_space<vmem>>, vector<15x128xf32>
    %4 = arith.truncf %3 : vector<15x128xf32> to vector<15x128xbf16>
    %5 = vector.extract_strided_slice %4 {offsets = [0, 0], sizes = [8, 128], strides = [1, 1]} : vector<15x128xbf16> to vector<8x128xbf16>
    %6 = vector.extract_strided_slice %4 {offsets = [1, 0], sizes = [8, 128], strides = [1, 1]} : vector<15x128xbf16> to vector<8x128xbf16>
    %7 = vector.extract_strided_slice %4 {offsets = [2, 0], sizes = [8, 128], strides = [1, 1]} : vector<15x128xbf16> to vector<8x128xbf16>
    %8 = vector.extract_strided_slice %4 {offsets = [3, 0], sizes = [8, 128], strides = [1, 1]} : vector<15x128xbf16> to vector<8x128xbf16>
    %9 = vector.extract_strided_slice %4 {offsets = [4, 0], sizes = [8, 128], strides = [1, 1]} : vector<15x128xbf16> to vector<8x128xbf16>
    %10 = vector.extract_strided_slice %4 {offsets = [5, 0], sizes = [8, 128], strides = [1, 1]} : vector<15x128xbf16> to vector<8x128xbf16>
    %11 = vector.extract_strided_slice %4 {offsets = [6, 0], sizes = [8, 128], strides = [1, 1]} : vector<15x128xbf16> to vector<8x128xbf16>
    %12 = vector.extract_strided_slice %4 {offsets = [7, 0], sizes = [8, 128], strides = [1, 1]} : vector<15x128xbf16> to vector<8x128xbf16>
    %13 = tpu.concatenate %5, %6, %7, %8, %9, %10, %11, %12 in 1 : vector<8x128xbf16>, vector<8x128xbf16>, vector<8x128xbf16>, vector<8x128xbf16>, vector<8x128xbf16>, vector<8x128xbf16>, vector<8x128xbf16>, vector<8x128xbf16> -> vector<8x1024xbf16>
    %c0_0 = arith.constant 0 : index
    %c0_1 = arith.constant 0 : index
    %14 = vector.load %arg2[%c0_0, %c0_1] : memref<32x8xbf16, #tpu.memory_space<vmem>>, vector<32x8xbf16>
    %cst = arith.constant dense<0.000000e+00> : vector<32x1024xf32>
    %15 = tpu.matmul %14, %13, %cst {dimension_numbers = #tpu.dot_dimension_numbers<[1], [0], [0], [1], [0, 0, 1, 1], [], []>} : vector<32x8xbf16>, vector<8x1024xbf16>, vector<32x1024xf32> -> vector<32x1024xf32>
    %c0_2 = arith.constant 0 : index
    %c0_3 = arith.constant 0 : index
    %16 = vector.load %arg6[%c0_2, %c0_3] : memref<32x8xf32, #tpu.memory_space<vmem>>, vector<32x1xf32>
    %17 = vector.broadcast %16 : vector<32x1xf32> to vector<32x1024xf32>
    %18 = arith.addf %15, %17 : vector<32x1024xf32>
    %cst_4 = arith.constant 1.000000e-01 : f32
    %19 = vector.broadcast %cst_4 : f32 to vector<32x1024xf32>
    %20 = arith.mulf %19, %18 : vector<32x1024xf32>
    %21 = arith.maximumf %18, %20 : vector<32x1024xf32>
    %c0_5 = arith.constant 0 : index
    %c1 = arith.constant 1 : index
    %22 = vector.load %arg6[%c0_5, %c1] : memref<32x8xf32, #tpu.memory_space<vmem>>, vector<32x1xf32>
    %c0_6 = arith.constant 0 : index
    %c2 = arith.constant 2 : index
    %23 = vector.load %arg6[%c0_6, %c2] : memref<32x8xf32, #tpu.memory_space<vmem>>, vector<32x1xf32>
    %c0_7 = arith.constant 0 : index
    %c0_8 = arith.constant 0 : index
    %c0_9 = arith.constant 0 : index
    %24 = vector.load %arg3[%c0_7, %c0_8, %c0_9] : memref<3x32x32xbf16, #tpu.memory_space<vmem>>, vector<1x32x32xbf16>
    %25 = vector.shape_cast %24 : vector<1x32x32xbf16> to vector<32x32xbf16>
    %26 = arith.truncf %21 : vector<32x1024xf32> to vector<32x1024xbf16>
    %cst_10 = arith.constant dense<0.000000e+00> : vector<32x1024xf32>
    %27 = tpu.matmul %25, %26, %cst_10 {dimension_numbers = #tpu.dot_dimension_numbers<[1], [0], [0], [1], [0, 0, 1, 1], [], []>} : vector<32x32xbf16>, vector<32x1024xbf16>, vector<32x1024xf32> -> vector<32x1024xf32>
    %28 = vector.broadcast %22 : vector<32x1xf32> to vector<32x1024xf32>
    %29 = arith.addf %27, %28 : vector<32x1024xf32>
    %cst_11 = arith.constant 2.000000e-01 : f32
    %30 = vector.broadcast %cst_11 : f32 to vector<32x1024xf32>
    %31 = arith.mulf %30, %29 : vector<32x1024xf32>
    %32 = arith.maximumf %29, %31 : vector<32x1024xf32>
    %c0_12 = arith.constant 0 : index
    %c0_13 = arith.constant 0 : index
    %c0_14 = arith.constant 0 : index
    %33 = vector.load %arg4[%c0_12, %c0_13, %c0_14] : memref<3x32x32xbf16, #tpu.memory_space<vmem>>, vector<1x32x32xbf16>
    %34 = vector.shape_cast %33 : vector<1x32x32xbf16> to vector<32x32xbf16>
    %35 = arith.truncf %32 : vector<32x1024xf32> to vector<32x1024xbf16>
    %cst_15 = arith.constant dense<0.000000e+00> : vector<32x1024xf32>
    %36 = tpu.matmul %34, %35, %cst_15 {dimension_numbers = #tpu.dot_dimension_numbers<[1], [0], [0], [1], [0, 0, 1, 1], [], []>} : vector<32x32xbf16>, vector<32x1024xbf16>, vector<32x1024xf32> -> vector<32x1024xf32>
    %37 = vector.broadcast %23 : vector<32x1xf32> to vector<32x1024xf32>
    %38 = arith.addf %36, %37 : vector<32x1024xf32>
    %cst_16 = arith.constant 2.000000e-01 : f32
    %39 = vector.broadcast %cst_16 : f32 to vector<32x1024xf32>
    %40 = arith.mulf %39, %38 : vector<32x1024xf32>
    %41 = arith.maximumf %38, %40 : vector<32x1024xf32>
    %42 = arith.addf %21, %41 : vector<32x1024xf32>
    %c0_17 = arith.constant 0 : index
    %c3 = arith.constant 3 : index
    %43 = vector.load %arg6[%c0_17, %c3] : memref<32x8xf32, #tpu.memory_space<vmem>>, vector<32x1xf32>
    %c0_18 = arith.constant 0 : index
    %c4 = arith.constant 4 : index
    %44 = vector.load %arg6[%c0_18, %c4] : memref<32x8xf32, #tpu.memory_space<vmem>>, vector<32x1xf32>
    %c1_19 = arith.constant 1 : index
    %c0_20 = arith.constant 0 : index
    %c0_21 = arith.constant 0 : index
    %45 = vector.load %arg3[%c1_19, %c0_20, %c0_21] : memref<3x32x32xbf16, #tpu.memory_space<vmem>>, vector<1x32x32xbf16>
    %46 = vector.shape_cast %45 : vector<1x32x32xbf16> to vector<32x32xbf16>
    %47 = arith.truncf %42 : vector<32x1024xf32> to vector<32x1024xbf16>
    %cst_22 = arith.constant dense<0.000000e+00> : vector<32x1024xf32>
    %48 = tpu.matmul %46, %47, %cst_22 {dimension_numbers = #tpu.dot_dimension_numbers<[1], [0], [0], [1], [0, 0, 1, 1], [], []>} : vector<32x32xbf16>, vector<32x1024xbf16>, vector<32x1024xf32> -> vector<32x1024xf32>
    %49 = vector.broadcast %43 : vector<32x1xf32> to vector<32x1024xf32>
    %50 = arith.addf %48, %49 : vector<32x1024xf32>
    %cst_23 = arith.constant 2.000000e-01 : f32
    %51 = vector.broadcast %cst_23 : f32 to vector<32x1024xf32>
    %52 = arith.mulf %51, %50 : vector<32x1024xf32>
    %53 = arith.maximumf %50, %52 : vector<32x1024xf32>
    %c1_24 = arith.constant 1 : index
    %c0_25 = arith.constant 0 : index
    %c0_26 = arith.constant 0 : index
    %54 = vector.load %arg4[%c1_24, %c0_25, %c0_26] : memref<3x32x32xbf16, #tpu.memory_space<vmem>>, vector<1x32x32xbf16>
    %55 = vector.shape_cast %54 : vector<1x32x32xbf16> to vector<32x32xbf16>
    %56 = arith.truncf %53 : vector<32x1024xf32> to vector<32x1024xbf16>
    %cst_27 = arith.constant dense<0.000000e+00> : vector<32x1024xf32>
    %57 = tpu.matmul %55, %56, %cst_27 {dimension_numbers = #tpu.dot_dimension_numbers<[1], [0], [0], [1], [0, 0, 1, 1], [], []>} : vector<32x32xbf16>, vector<32x1024xbf16>, vector<32x1024xf32> -> vector<32x1024xf32>
    %58 = vector.broadcast %44 : vector<32x1xf32> to vector<32x1024xf32>
    %59 = arith.addf %57, %58 : vector<32x1024xf32>
    %cst_28 = arith.constant 2.000000e-01 : f32
    %60 = vector.broadcast %cst_28 : f32 to vector<32x1024xf32>
    %61 = arith.mulf %60, %59 : vector<32x1024xf32>
    %62 = arith.maximumf %59, %61 : vector<32x1024xf32>
    %63 = arith.addf %42, %62 : vector<32x1024xf32>
    %c0_29 = arith.constant 0 : index
    %c5 = arith.constant 5 : index
    %64 = vector.load %arg6[%c0_29, %c5] : memref<32x8xf32, #tpu.memory_space<vmem>>, vector<32x1xf32>
    %c0_30 = arith.constant 0 : index
    %c6 = arith.constant 6 : index
    %65 = vector.load %arg6[%c0_30, %c6] : memref<32x8xf32, #tpu.memory_space<vmem>>, vector<32x1xf32>
    %c2_31 = arith.constant 2 : index
    %c0_32 = arith.constant 0 : index
    %c0_33 = arith.constant 0 : index
    %66 = vector.load %arg3[%c2_31, %c0_32, %c0_33] : memref<3x32x32xbf16, #tpu.memory_space<vmem>>, vector<1x32x32xbf16>
    %67 = vector.shape_cast %66 : vector<1x32x32xbf16> to vector<32x32xbf16>
    %68 = arith.truncf %63 : vector<32x1024xf32> to vector<32x1024xbf16>
    %cst_34 = arith.constant dense<0.000000e+00> : vector<32x1024xf32>
    %69 = tpu.matmul %67, %68, %cst_34 {dimension_numbers = #tpu.dot_dimension_numbers<[1], [0], [0], [1], [0, 0, 1, 1], [], []>} : vector<32x32xbf16>, vector<32x1024xbf16>, vector<32x1024xf32> -> vector<32x1024xf32>
    %70 = vector.broadcast %64 : vector<32x1xf32> to vector<32x1024xf32>
    %71 = arith.addf %69, %70 : vector<32x1024xf32>
    %cst_35 = arith.constant 2.000000e-01 : f32
    %72 = vector.broadcast %cst_35 : f32 to vector<32x1024xf32>
    %73 = arith.mulf %72, %71 : vector<32x1024xf32>
    %74 = arith.maximumf %71, %73 : vector<32x1024xf32>
    %c2_36 = arith.constant 2 : index
    %c0_37 = arith.constant 0 : index
    %c0_38 = arith.constant 0 : index
    %75 = vector.load %arg4[%c2_36, %c0_37, %c0_38] : memref<3x32x32xbf16, #tpu.memory_space<vmem>>, vector<1x32x32xbf16>
    %76 = vector.shape_cast %75 : vector<1x32x32xbf16> to vector<32x32xbf16>
    %77 = arith.truncf %74 : vector<32x1024xf32> to vector<32x1024xbf16>
    %cst_39 = arith.constant dense<0.000000e+00> : vector<32x1024xf32>
    %78 = tpu.matmul %76, %77, %cst_39 {dimension_numbers = #tpu.dot_dimension_numbers<[1], [0], [0], [1], [0, 0, 1, 1], [], []>} : vector<32x32xbf16>, vector<32x1024xbf16>, vector<32x1024xf32> -> vector<32x1024xf32>
    %79 = vector.broadcast %65 : vector<32x1xf32> to vector<32x1024xf32>
    %80 = arith.addf %78, %79 : vector<32x1024xf32>
    %cst_40 = arith.constant 2.000000e-01 : f32
    %81 = vector.broadcast %cst_40 : f32 to vector<32x1024xf32>
    %82 = arith.mulf %81, %80 : vector<32x1024xf32>
    %83 = arith.maximumf %80, %82 : vector<32x1024xf32>
    %84 = arith.addf %63, %83 : vector<32x1024xf32>
    %c0_41 = arith.constant 0 : index
    %c0_42 = arith.constant 0 : index
    %85 = vector.load %arg5[%c0_41, %c0_42] : memref<8x32xbf16, #tpu.memory_space<vmem>>, vector<8x32xbf16>
    %86 = arith.truncf %84 : vector<32x1024xf32> to vector<32x1024xbf16>
    %cst_43 = arith.constant dense<0.000000e+00> : vector<8x1024xf32>
    %87 = tpu.matmul %85, %86, %cst_43 {dimension_numbers = #tpu.dot_dimension_numbers<[1], [0], [0], [1], [0, 0, 1, 1], [], []>} : vector<8x32xbf16>, vector<32x1024xbf16>, vector<8x1024xf32> -> vector<8x1024xf32>
    %c0_44 = arith.constant 0 : index
    %c7 = arith.constant 7 : index
    %88 = vector.load %arg6[%c0_44, %c7] : memref<32x8xf32, #tpu.memory_space<vmem>>, vector<8x1xf32>
    %89 = vector.broadcast %88 : vector<8x1xf32> to vector<8x1024xf32>
    %90 = arith.addf %87, %89 : vector<8x1024xf32>
    %c0_45 = arith.constant 0 : index
    %c0_46 = arith.constant 0 : index
    %91 = vector.load %arg7[%c0_45, %c0_46] : memref<8x1024xf32, #tpu.memory_space<vmem>>, vector<8x1024xf32>
    tpu.vector_store %arg7[%c0_45, %c0_46], %90 {strides = array<i32>} : memref<8x1024xf32, #tpu.memory_space<vmem>>, vector<8x1024xf32>,
    return
  }
  func.func @transform_0(%arg0: i32) -> (i32, i32) {
    %c0_i32 = arith.constant 0 : i32
    %c0_i32_0 = arith.constant 0 : i32
    %c0_i32_1 = arith.constant 0 : i32
    return %c0_i32, %c0_i32_0 : i32, i32
  }
  func.func @transform_1(%arg0: i32) -> (i32, i32) {
    %c0_i32 = arith.constant 0 : i32
    %c0_i32_0 = arith.constant 0 : i32
    %c0_i32_1 = arith.constant 0 : i32
    return %c0_i32, %c0_i32_0 : i32, i32
  }
  func.func @transform_2(%arg0: i32) -> (i32, i32, i32) {
    %c0_i32 = arith.constant 0 : i32
    %c0_i32_0 = arith.constant 0 : i32
    %c0_i32_1 = arith.constant 0 : i32
    %c0_i32_2 = arith.constant 0 : i32
    return %c0_i32, %c0_i32_0, %c0_i32_1 : i32, i32, i32
  }
  func.func @transform_3(%arg0: i32) -> (i32, i32, i32) {
    %c0_i32 = arith.constant 0 : i32
    %c0_i32_0 = arith.constant 0 : i32
    %c0_i32_1 = arith.constant 0 : i32
    %c0_i32_2 = arith.constant 0 : i32
    return %c0_i32, %c0_i32_0, %c0_i32_1 : i32, i32, i32
  }
  func.func @transform_4(%arg0: i32) -> (i32, i32) {
    %c0_i32 = arith.constant 0 : i32
    %c0_i32_0 = arith.constant 0 : i32
    %c0_i32_1 = arith.constant 0 : i32
    return %c0_i32, %c0_i32_0 : i32, i32
  }
  func.func @transform_5(%arg0: i32) -> (i32, i32) {
    %c0_i32 = arith.constant 0 : i32
    %c0_i32_0 = arith.constant 0 : i32
    %c0_i32_1 = arith.constant 0 : i32
    return %c0_i32, %c0_i32_0 : i32, i32
  }
  func.func @transform_6(%arg0: i32) -> (i32, i32) {
    %c0_i32 = arith.constant 0 : i32
    %c0_i32_0 = arith.constant 0 : i32
    return %c0_i32, %arg0 : i32, i32
  }
}

module attributes {stable_mosaic.version = 11 : i64} {
  func.func @smoothnet_mlp_kernel(%arg0: i32, %arg1: memref<23x128xf32, #tpu.memory_space<vmem>>, %arg2: memref<32x8xbf16, #tpu.memory_space<vmem>>, %arg3: memref<3x32x32xbf16, #tpu.memory_space<vmem>>, %arg4: memref<3x32x32xbf16, #tpu.memory_space<vmem>>, %arg5: memref<8x32xbf16, #tpu.memory_space<vmem>>, %arg6: memref<32x8xf32, #tpu.memory_space<vmem>>, %arg7: memref<8x1024xf32, #tpu.memory_space<vmem>>) attributes {dimension_semantics = [#tpu.dimension_semantics<parallel>], iteration_bounds = array<i64: 2>, scalar_prefetch = 0 : i64, scratch_operands = 0 : i64, tpu.core_type = #tpu.core_type<tc>, window_params = [{pipeline_mode = #tpu.pipeline_mode<synchronous>, transform_indices = @transform_0, window_bounds = array<i64: 23, 128>}, {pipeline_mode = #tpu.pipeline_mode<synchronous>, transform_indices = @transform_1, window_bounds = array<i64: 32, 8>}, {pipeline_mode = #tpu.pipeline_mode<synchronous>, transform_indices = @transform_2, window_bounds = array<i64: 3, 32, 32>}, {pipeline_mode = #tpu.pipeline_mode<synchronous>, transform_indices = @transform_3, window_bounds = array<i64: 3, 32, 32>}, {pipeline_mode = #tpu.pipeline_mode<synchronous>, transform_indices = @transform_4, window_bounds = array<i64: 8, 32>}, {pipeline_mode = #tpu.pipeline_mode<synchronous>, transform_indices = @transform_5, window_bounds = array<i64: 32, 8>}, {transform_indices = @transform_6, window_bounds = array<i64: 8, 1024>}]} {
    %c8_i32 = arith.constant 8 : i32
    %0 = arith.muli %arg0, %c8_i32 : i32
    %1 = tpu.assume_multiple %0, 8 : i32
    %2 = arith.index_cast %1 : i32 to index
    %c0 = arith.constant 0 : index
    %3 = vector.load %arg1[%2, %c0] : memref<23x128xf32, #tpu.memory_space<vmem>>, vector<15x128xf32>
    %4 = arith.truncf %3 : vector<15x128xf32> to vector<15x128xbf16>
    %5 = vector.extract_strided_slice %4 {offsets = [0, 0], sizes = [8, 128], strides = [1, 1]} : vector<15x128xbf16> to vector<8x128xbf16>
    %6 = vector.extract_strided_slice %4 {offsets = [1, 0], sizes = [8, 128], strides = [1, 1]} : vector<15x128xbf16> to vector<8x128xbf16>
    %7 = vector.extract_strided_slice %4 {offsets = [2, 0], sizes = [8, 128], strides = [1, 1]} : vector<15x128xbf16> to vector<8x128xbf16>
    %8 = vector.extract_strided_slice %4 {offsets = [3, 0], sizes = [8, 128], strides = [1, 1]} : vector<15x128xbf16> to vector<8x128xbf16>
    %9 = vector.extract_strided_slice %4 {offsets = [4, 0], sizes = [8, 128], strides = [1, 1]} : vector<15x128xbf16> to vector<8x128xbf16>
    %10 = vector.extract_strided_slice %4 {offsets = [5, 0], sizes = [8, 128], strides = [1, 1]} : vector<15x128xbf16> to vector<8x128xbf16>
    %11 = vector.extract_strided_slice %4 {offsets = [6, 0], sizes = [8, 128], strides = [1, 1]} : vector<15x128xbf16> to vector<8x128xbf16>
    %12 = vector.extract_strided_slice %4 {offsets = [7, 0], sizes = [8, 128], strides = [1, 1]} : vector<15x128xbf16> to vector<8x128xbf16>
    %13 = tpu.concatenate %5, %6, %7, %8, %9, %10, %11, %12 in 1 : vector<8x128xbf16>, vector<8x128xbf16>, vector<8x128xbf16>, vector<8x128xbf16>, vector<8x128xbf16>, vector<8x128xbf16>, vector<8x128xbf16>, vector<8x128xbf16> -> vector<8x1024xbf16>
    %c0_0 = arith.constant 0 : index
    %c0_1 = arith.constant 0 : index
    %14 = vector.load %arg2[%c0_0, %c0_1] : memref<32x8xbf16, #tpu.memory_space<vmem>>, vector<32x8xbf16>
    %cst = arith.constant dense<0.000000e+00> : vector<32x1024xf32>
    %15 = tpu.matmul %14, %13, %cst {dimension_numbers = #tpu.dot_dimension_numbers<[1], [0], [0], [1], [0, 0, 1, 1], [], []>} : vector<32x8xbf16>, vector<8x1024xbf16>, vector<32x1024xf32> -> vector<32x1024xf32>
    %c0_2 = arith.constant 0 : index
    %c0_3 = arith.constant 0 : index
    %16 = vector.load %arg6[%c0_2, %c0_3] : memref<32x8xf32, #tpu.memory_space<vmem>>, vector<32x1xf32>
    %17 = vector.broadcast %16 : vector<32x1xf32> to vector<32x1024xf32>
    %18 = arith.addf %15, %17 : vector<32x1024xf32>
    %cst_4 = arith.constant 1.000000e-01 : f32
    %19 = vector.broadcast %cst_4 : f32 to vector<32x1024xf32>
    %20 = arith.mulf %19, %18 : vector<32x1024xf32>
    %21 = arith.maximumf %18, %20 : vector<32x1024xf32>
    %c0_5 = arith.constant 0 : index
    %c1 = arith.constant 1 : index
    %22 = vector.load %arg6[%c0_5, %c1] : memref<32x8xf32, #tpu.memory_space<vmem>>, vector<32x1xf32>
    %c0_6 = arith.constant 0 : index
    %c2 = arith.constant 2 : index
    %23 = vector.load %arg6[%c0_6, %c2] : memref<32x8xf32, #tpu.memory_space<vmem>>, vector<32x1xf32>
    %c0_7 = arith.constant 0 : index
    %c0_8 = arith.constant 0 : index
    %c0_9 = arith.constant 0 : index
    %24 = vector.load %arg3[%c0_7, %c0_8, %c0_9] : memref<3x32x32xbf16, #tpu.memory_space<vmem>>, vector<1x32x32xbf16>
    %25 = vector.shape_cast %24 : vector<1x32x32xbf16> to vector<32x32xbf16>
    %26 = arith.truncf %21 : vector<32x1024xf32> to vector<32x1024xbf16>
    %cst_10 = arith.constant dense<0.000000e+00> : vector<32x1024xf32>
    %27 = tpu.matmul %25, %26, %cst_10 {dimension_numbers = #tpu.dot_dimension_numbers<[1], [0], [0], [1], [0, 0, 1, 1], [], []>} : vector<32x32xbf16>, vector<32x1024xbf16>, vector<32x1024xf32> -> vector<32x1024xf32>
    %28 = vector.broadcast %22 : vector<32x1xf32> to vector<32x1024xf32>
    %29 = arith.addf %27, %28 : vector<32x1024xf32>
    %cst_11 = arith.constant 2.000000e-01 : f32
    %30 = vector.broadcast %cst_11 : f32 to vector<32x1024xf32>
    %31 = arith.mulf %30, %29 : vector<32x1024xf32>
    %32 = arith.maximumf %29, %31 : vector<32x1024xf32>
    %c0_12 = arith.constant 0 : index
    %c0_13 = arith.constant 0 : index
    %c0_14 = arith.constant 0 : index
    %33 = vector.load %arg4[%c0_12, %c0_13, %c0_14] : memref<3x32x32xbf16, #tpu.memory_space<vmem>>, vector<1x32x32xbf16>
    %34 = vector.shape_cast %33 : vector<1x32x32xbf16> to vector<32x32xbf16>
    %35 = arith.truncf %32 : vector<32x1024xf32> to vector<32x1024xbf16>
    %cst_15 = arith.constant dense<0.000000e+00> : vector<32x1024xf32>
    %36 = tpu.matmul %34, %35, %cst_15 {dimension_numbers = #tpu.dot_dimension_numbers<[1], [0], [0], [1], [0, 0, 1, 1], [], []>} : vector<32x32xbf16>, vector<32x1024xbf16>, vector<32x1024xf32> -> vector<32x1024xf32>
    %37 = vector.broadcast %23 : vector<32x1xf32> to vector<32x1024xf32>
    %38 = arith.addf %36, %37 : vector<32x1024xf32>
    %cst_16 = arith.constant 2.000000e-01 : f32
    %39 = vector.broadcast %cst_16 : f32 to vector<32x1024xf32>
    %40 = arith.mulf %39, %38 : vector<32x1024xf32>
    %41 = arith.maximumf %38, %40 : vector<32x1024xf32>
    %42 = arith.addf %21, %41 : vector<32x1024xf32>
    %c0_17 = arith.constant 0 : index
    %c3 = arith.constant 3 : index
    %43 = vector.load %arg6[%c0_17, %c3] : memref<32x8xf32, #tpu.memory_space<vmem>>, vector<32x1xf32>
    %c0_18 = arith.constant 0 : index
    %c4 = arith.constant 4 : index
    %44 = vector.load %arg6[%c0_18, %c4] : memref<32x8xf32, #tpu.memory_space<vmem>>, vector<32x1xf32>
    %c1_19 = arith.constant 1 : index
    %c0_20 = arith.constant 0 : index
    %c0_21 = arith.constant 0 : index
    %45 = vector.load %arg3[%c1_19, %c0_20, %c0_21] : memref<3x32x32xbf16, #tpu.memory_space<vmem>>, vector<1x32x32xbf16>
    %46 = vector.shape_cast %45 : vector<1x32x32xbf16> to vector<32x32xbf16>
    %47 = arith.truncf %42 : vector<32x1024xf32> to vector<32x1024xbf16>
    %cst_22 = arith.constant dense<0.000000e+00> : vector<32x1024xf32>
    %48 = tpu.matmul %46, %47, %cst_22 {dimension_numbers = #tpu.dot_dimension_numbers<[1], [0], [0], [1], [0, 0, 1, 1], [], []>} : vector<32x32xbf16>, vector<32x1024xbf16>, vector<32x1024xf32> -> vector<32x1024xf32>
    %49 = vector.broadcast %43 : vector<32x1xf32> to vector<32x1024xf32>
    %50 = arith.addf %48, %49 : vector<32x1024xf32>
    %cst_23 = arith.constant 2.000000e-01 : f32
    %51 = vector.broadcast %cst_23 : f32 to vector<32x1024xf32>
    %52 = arith.mulf %51, %50 : vector<32x1024xf32>
    %53 = arith.maximumf %50, %52 : vector<32x1024xf32>
    %c1_24 = arith.constant 1 : index
    %c0_25 = arith.constant 0 : index
    %c0_26 = arith.constant 0 : index
    %54 = vector.load %arg4[%c1_24, %c0_25, %c0_26] : memref<3x32x32xbf16, #tpu.memory_space<vmem>>, vector<1x32x32xbf16>
    %55 = vector.shape_cast %54 : vector<1x32x32xbf16> to vector<32x32xbf16>
    %56 = arith.truncf %53 : vector<32x1024xf32> to vector<32x1024xbf16>
    %cst_27 = arith.constant dense<0.000000e+00> : vector<32x1024xf32>
    %57 = tpu.matmul %55, %56, %cst_27 {dimension_numbers = #tpu.dot_dimension_numbers<[1], [0], [0], [1], [0, 0, 1, 1], [], []>} : vector<32x32xbf16>, vector<32x1024xbf16>, vector<32x1024xf32> -> vector<32x1024xf32>
    %58 = vector.broadcast %44 : vector<32x1xf32> to vector<32x1024xf32>
    %59 = arith.addf %57, %58 : vector<32x1024xf32>
    %cst_28 = arith.constant 2.000000e-01 : f32
    %60 = vector.broadcast %cst_28 : f32 to vector<32x1024xf32>
    %61 = arith.mulf %60, %59 : vector<32x1024xf32>
    %62 = arith.maximumf %59, %61 : vector<32x1024xf32>
    %63 = arith.addf %42, %62 : vector<32x1024xf32>
    %c0_29 = arith.constant 0 : index
    %c5 = arith.constant 5 : index
    %64 = vector.load %arg6[%c0_29, %c5] : memref<32x8xf32, #tpu.memory_space<vmem>>, vector<32x1xf32>
    %c0_30 = arith.constant 0 : index
    %c6 = arith.constant 6 : index
    %65 = vector.load %arg6[%c0_30, %c6] : memref<32x8xf32, #tpu.memory_space<vmem>>, vector<32x1xf32>
    %c2_31 = arith.constant 2 : index
    %c0_32 = arith.constant 0 : index
    %c0_33 = arith.constant 0 : index
    %66 = vector.load %arg3[%c2_31, %c0_32, %c0_33] : memref<3x32x32xbf16, #tpu.memory_space<vmem>>, vector<1x32x32xbf16>
    %67 = vector.shape_cast %66 : vector<1x32x32xbf16> to vector<32x32xbf16>
    %68 = arith.truncf %63 : vector<32x1024xf32> to vector<32x1024xbf16>
    %cst_34 = arith.constant dense<0.000000e+00> : vector<32x1024xf32>
    %69 = tpu.matmul %67, %68, %cst_34 {dimension_numbers = #tpu.dot_dimension_numbers<[1], [0], [0], [1], [0, 0, 1, 1], [], []>} : vector<32x32xbf16>, vector<32x1024xbf16>, vector<32x1024xf32> -> vector<32x1024xf32>
    %70 = vector.broadcast %64 : vector<32x1xf32> to vector<32x1024xf32>
    %71 = arith.addf %69, %70 : vector<32x1024xf32>
    %cst_35 = arith.constant 2.000000e-01 : f32
    %72 = vector.broadcast %cst_35 : f32 to vector<32x1024xf32>
    %73 = arith.mulf %72, %71 : vector<32x1024xf32>
    %74 = arith.maximumf %71, %73 : vector<32x1024xf32>
    %c2_36 = arith.constant 2 : index
    %c0_37 = arith.constant 0 : index
    %c0_38 = arith.constant 0 : index
    %75 = vector.load %arg4[%c2_36, %c0_37, %c0_38] : memref<3x32x32xbf16, #tpu.memory_space<vmem>>, vector<1x32x32xbf16>
    %76 = vector.shape_cast %75 : vector<1x32x32xbf16> to vector<32x32xbf16>
    %77 = arith.truncf %74 : vector<32x1024xf32> to vector<32x1024xbf16>
    %cst_39 = arith.constant dense<0.000000e+00> : vector<32x1024xf32>
    %78 = tpu.matmul %76, %77, %cst_39 {dimension_numbers = #tpu.dot_dimension_numbers<[1], [0], [0], [1], [0, 0, 1, 1], [], []>} : vector<32x32xbf16>, vector<32x1024xbf16>, vector<32x1024xf32> -> vector<32x1024xf32>
    %79 = vector.broadcast %65 : vector<32x1xf32> to vector<32x1024xf32>
    %80 = arith.addf %78, %79 : vector<32x1024xf32>
    %cst_40 = arith.constant 2.000000e-01 : f32
    %81 = vector.broadcast %cst_40 : f32 to vector<32x1024xf32>
    %82 = arith.mulf %81, %80 : vector<32x1024xf32>
    %83 = arith.maximumf %80, %82 : vector<32x1024xf32>
    %84 = arith.addf %63, %83 : vector<32x1024xf32>
    %c0_41 = arith.constant 0 : index
    %c0_42 = arith.constant 0 : index
    %85 = vector.load %arg5[%c0_41, %c0_42] : memref<8x32xbf16, #tpu.memory_space<vmem>>, vector<8x32xbf16>
    %86 = arith.truncf %84 : vector<32x1024xf32> to vector<32x1024xbf16>
    %cst_43 = arith.constant dense<0.000000e+00> : vector<8x1024xf32>
    %87 = tpu.matmul %85, %86, %cst_43 {dimension_numbers = #tpu.dot_dimension_numbers<[1], [0], [0], [1], [0, 0, 1, 1], [], []>} : vector<8x32xbf16>, vector<32x1024xbf16>, vector<8x1024xf32> -> vector<8x1024xf32>
    %c0_44 = arith.constant 0 : index
    %c7 = arith.constant 7 : index
    %88 = vector.load %arg6[%c0_44, %c7] : memref<32x8xf32, #tpu.memory_space<vmem>>, vector<8x1xf32>
    %89 = vector.broadcast %88 : vector<8x1xf32> to vector<8x1024xf32>
    %90 = arith.addf %87, %89 : vector<8x1024xf32>
    %c0_45 = arith.constant 0 : index
    %c0_46 = arith.constant 0 : index
    %91 = vector.load %arg7[%c0_45, %c0_46] : memref<8x1024xf32, #tpu.memory_space<vmem>>, vector<8x1024xf32>
    tpu.vector_store %arg7[%c0_45, %c0_46], %90 {strides = array<i32>} : memref<8x1024xf32, #tpu.memory_space<vmem>>, vector<8x1024xf32>,
    return
  }
  func.func @transform_0(%arg0: i32) -> (i32, i32) {
    %c0_i32 = arith.constant 0 : i32
    %c0_i32_0 = arith.constant 0 : i32
    %c0_i32_1 = arith.constant 0 : i32
    return %c0_i32, %c0_i32_0 : i32, i32
  }
  func.func @transform_1(%arg0: i32) -> (i32, i32) {
    %c0_i32 = arith.constant 0 : i32
    %c0_i32_0 = arith.constant 0 : i32
    %c0_i32_1 = arith.constant 0 : i32
    return %c0_i32, %c0_i32_0 : i32, i32
  }
  func.func @transform_2(%arg0: i32) -> (i32, i32, i32) {
    %c0_i32 = arith.constant 0 : i32
    %c0_i32_0 = arith.constant 0 : i32
    %c0_i32_1 = arith.constant 0 : i32
    %c0_i32_2 = arith.constant 0 : i32
    return %c0_i32, %c0_i32_0, %c0_i32_1 : i32, i32, i32
  }
  func.func @transform_3(%arg0: i32) -> (i32, i32, i32) {
    %c0_i32 = arith.constant 0 : i32
    %c0_i32_0 = arith.constant 0 : i32
    %c0_i32_1 = arith.constant 0 : i32
    %c0_i32_2 = arith.constant 0 : i32
    return %c0_i32, %c0_i32_0, %c0_i32_1 : i32, i32, i32
  }
  func.func @transform_4(%arg0: i32) -> (i32, i32) {
    %c0_i32 = arith.constant 0 : i32
    %c0_i32_0 = arith.constant 0 : i32
    %c0_i32_1 = arith.constant 0 : i32
    return %c0_i32, %c0_i32_0 : i32, i32
  }
  func.func @transform_5(%arg0: i32) -> (i32, i32) {
    %c0_i32 = arith.constant 0 : i32
    %c0_i32_0 = arith.constant 0 : i32
    %c0_i32_1 = arith.constant 0 : i32
    return %c0_i32, %c0_i32_0 : i32, i32
  }
  func.func @transform_6(%arg0: i32) -> (i32, i32) {
    %c0_i32 = arith.constant 0 : i32
    %c0_i32_0 = arith.constant 0 : i32
    return %c0_i32, %arg0 : i32, i32
  }
}

</mosaic_0001>

<bundles_post_ra>
// kernel: smoothnet_forward.1
= control target key start
LH: loop header
LB: loop body
LE: loop exit
PB: predicated region body
PF: predicated region fallthrough
CT: control target
= control target key end

     0   :  { %s3120_s21 = smov 0   ;;  %s4121_s0 = inlined_call_operand.vmem [shape: f32[23,128], index: 0, kind: input, shape index: {}]   ;;  %s4122_s1 = inlined_call_operand.vmem [shape: bf16[32,8], index: 1, kind: input, shape index: {}]   ;;  %s4123_s2 = inlined_call_operand.vmem [shape: bf16[3,32,32], index: 2, kind: input, shape index: {}]   ;;  %s4124_s3 = inlined_call_operand.vmem [shape: bf16[3,32,32], index: 3, kind: input, shape index: {}]   ;;  %s4125_s4 = inlined_call_operand.vmem [shape: bf16[8,32], index: 4, kind: input, shape index: {}]   ;;  %s4126_s5 = inlined_call_operand.vmem [shape: f32[32,8], index: 5, kind: input, shape index: {}]   ;;  %s4127_s6 = inlined_call_operand.vmem [shape: f32[8,2048], index: 6, kind: output, shape index: {}]  }
   0x1 LB: > { %s2917_s22 = sadd.s32 4294967295, %s3075_s21   ;;  %p2920_p0 = scmp.ge.s32.totalorder %s3075_s21, 1  ;;  %s3075_s21 = sphi %s3120_s21, %s16_s21  }
   0x2   : > { %p202_p1 = scmp.lt.s32.totalorder %s3075_s21, 3 }
   0x4   : > { %p203_p2 = pnand %p2920_p0, %p202_p1 }
   0x6   : > { %206 = sbr.rel (%p203_p2) target bundleno = 1925 (0x785), region = 44 }
   0xd   : > { %s3128_s23 = sshll.u32 %s2917_s22, 3  ;;  %v4128_v0 = vmov 0   ;;  %vm304_vm0 = vcmask 1043456   ;;  %v3141_v4 = vld [vmem:[%s4126_s5] sm:$0xff]  ;;  %v3146_v5 = vld [vmem:[%s4126_s5 + $0x8] sm:$0xff]  ;;  %v3151_v6 = vld [vmem:[%s4126_s5 + $0x10] sm:$0xff] }
   0xe   : > { %s235_s26 = scalar_lea.vmem %s4121_s0, %s3128_s23  ;;  %360 = vmatprep.mubr.bf16.mxu0 %v4128_v0  ;;  %413 = vmatprep.mubr.bf16.mxu1 %v4128_v0  ;;  %vm297_vm1 = vcmask 64512   ;;  %v3158_v7 = vld [vmem:[%s4126_s5 + $0x18] sm:$0xff]  ;;  %v3051_v24 = vld [vmem:[%s4122_s1] sm:$0xff]   ;;  %v3052_v29 = vld [vmem:[%s4122_s1 + $0x8] sm:$0xff]   ;;  %v3078_v30 = vmov 1   ;;  %vm650_vm2 = vcmask 261120  }
   0xf   : > { %v236_v1 = vld [vmem:[%s235_s26] sm:$0xff]  ;;  %v237_v2 = vld [vmem:[%s235_s26 + $0x8] sm:$0x7f]  ;;  %3036 = vset.pattern.permute.xlu0 %v4128_v0  ;;  %3037 = vset.pattern.permute.xlu1 %v4128_v0  ;;  %p228_p3 = scmp.lt.s32.totalorder %s3128_s23, 15 }
  0x10   : > { %v238_v3 = vpack.c.bf16 %v237_v2, %v236_v1  ;;  %269 = vperm.xlu0 %3036, %v3141_v4   ;;  %279 = vperm.xlu1 %3037, %v3151_v6  }
  0x11   : > { %s4207_s23 = smov (!%p228_p3, %s3128_s23), 15 }
  0x12   : > { %v240_v8 = vshrl.u32 %v238_v3, 16  ;;  %v242_v9 = vshll.u32 %v238_v3, 16  ;;  %v305_v10 = vsel %vm304_vm0, %v238_v3, 0  ;;  %v247_v11 = vrot.slane %v238_v3, 1  ;;  %s2922_s7 = sshll.u32 %s4207_s23, 3 }
  0x13   : > { %v251_v12 = vrot.slane %v238_v3, 2  ;;  %v255_v13 = vrot.slane %v238_v3, 3  ;;  %s231_s10 = scalar_lea.vmem %s4127_s6, %s2922_s7 }
  0x14   : > { %v244_v14 = vrot.slane %v242_v9, 1  ;;  %v248_v15 = vrot.slane %v240_v8, 1  ;;  %v249_v16 = vrot.slane %v242_v9, 2  ;;  %v311_v17 = vsel %vm304_vm0, %v247_v11, 0  ;;  %274 = vperm.xlu0 %3036, %v3146_v5   ;;  %284 = vperm.xlu1 %3037, %v3158_v7  }
  0x15   : > { %v252_v18 = vrot.slane %v240_v8, 2  ;;  %v253_v19 = vrot.slane %v242_v9, 3  ;;  %v256_v20 = vrot.slane %v240_v8, 3  ;;  %v257_v21 = vrot.slane %v242_v9, 4 }
  0x16   : > { %v245_v22 = vor.u32 %v244_v14, %v240_v8  ;;  %v250_v23 = vor.u32 %v249_v16, %v248_v15  ;;  %v317_v25 = vsel %vm304_vm0, %v251_v12, 0  ;;  %v323_v26 = vsel %vm304_vm0, %v255_v13, 0 }
  0x17   : > { %v254_v27 = vor.u32 %v253_v19, %v252_v18  ;;  %v258_v28 = vor.u32 %v257_v21, %v256_v20 }
  0x18   : > { %2926 = vmatprep.subr.msk.bf16.mxu0 %vm304_vm0, %v245_v22  ;;  %2929 = vmatprep.subr.msk.bf16.mxu1 %vm304_vm0, %v250_v23 }
  0x19   : > { %329 = vmatpush1.bf16.msra.mxu0 %v305_v10  ;;  %382 = vmatpush1.bf16.msra.mxu1 %v311_v17 }
  0x1a   : > { %2932 = vmatprep.subr.msk.bf16.mxu0 %vm304_vm0, %v254_v27  ;;  %2935 = vmatprep.subr.msk.bf16.mxu1 %vm304_vm0, %v258_v28 }
  0x1b   : > { %3039 = vset.pattern.permute.xlu1 %v3078_v30  ;;  %3038 = vset.pattern.permute.xlu0 %v3078_v30 }
  0x1c   : > { %2927 = vmatmul.mubr.msk.bf16.vlgmr.msra.gmra.mrb[0].mxu0 %vm297_vm1, %v3051_v24  ;;  %2930 = vmatmul.mubr.msk.bf16.vlgmr.msra.gmra.mrb[0].mxu1 %vm297_vm1, %v3051_v24 }
  0x1d   : > { %435 = vmatpush1.bf16.msra.mxu0 %v317_v25  ;;  %488 = vmatpush1.bf16.msra.mxu1 %v323_v26 }
  0x1e   : > { %370 = vmatprep.mubr.bf16.mxu0 %v4128_v0  ;;  %423 = vmatprep.mubr.bf16.mxu1 %v4128_v0 }
  0x1f   : > { %629 = vperm.xlu1 %3039, %v3146_v5   ;;  %625 = vperm.xlu0 %3038, %v3141_v4  }
  0x23   : > { %633 = vperm.xlu1 %3039, %v3151_v6   ;;  %637 = vperm.xlu0 %3038, %v3158_v7  }
  0x24   : > { %2928 = vmatmul.mubr.msk.bf16.gmra.mrb[4].mxu0 %vm297_vm1, %v3052_v29  ;;  %2931 = vmatmul.mubr.msk.bf16.gmra.mrb[4].mxu1 %vm297_vm1, %v3052_v29 }
  0x25   : > { %466 = vmatprep.mubr.bf16.mxu0 %v4128_v0  ;;  %519 = vmatprep.mubr.bf16.mxu1 %v4128_v0 }
  0x2c   : > { %2933 = vmatmul.mubr.msk.bf16.vlgmr.msra.gmra.mrb[8].mxu0 %vm297_vm1, %v3051_v24  ;;  %2936 = vmatmul.mubr.msk.bf16.vlgmr.msra.gmra.mrb[8].mxu1 %vm297_vm1, %v3051_v24 }
  0x2d   : > { %476 = vmatprep.mubr.bf16.mxu0 %v4128_v0  ;;  %529 = vmatprep.mubr.bf16.mxu1 %v4128_v0 }
  0x34   : > { %2934 = vmatmul.mubr.msk.bf16.gmra.mrb[12].mxu0 %vm297_vm1, %v3052_v29  ;;  %2937 = vmatmul.mubr.msk.bf16.gmra.mrb[12].mxu1 %vm297_vm1, %v3052_v29 }
  0x35   : > { %689 = vmatprep.mubr.bf16.mxu0 %v4128_v0  ;;  %742 = vmatprep.mubr.bf16.mxu1 %v4128_v0 }
  0x8f   : > { %v3196_v31 = vpop.permute.xlu0 %269  ;;  %v3200_v33 = vpop.permute.xlu1 %279 }
  0x93   : > { %v3198_v32 = vpop.permute.xlu0 %274  ;;  %v3216_v61 = vpop.permute.xlu1 %284 }
  0xef   : > { %v362_v34 = vpop.f32.mrb[0].mxu0  ;;  %v415_v35 = vpop.f32.mrb[0].mxu1 }
  0xf0   : > { %v363_v36 = vadd.f32 %v362_v34, %v3196_v31  ;;  %v416_v37 = vadd.f32 %v415_v35, %v3196_v31  ;;  %v364_v38 = vpop.f32.mrb[1].mxu0  ;;  %v417_v39 = vpop.f32.mrb[1].mxu1 }
  0xf1   : > { %v365_v40 = vadd.f32 %v364_v38, %v3196_v31  ;;  %v418_v41 = vadd.f32 %v417_v39, %v3196_v31  ;;  %v366_v42 = vpop.f32.mrb[2].mxu0  ;;  %v419_v43 = vpop.f32.mrb[2].mxu1 }
  0xf2   : > { %v540_v44 = vmul.f32 0.1, %v363_v36  ;;  %v367_v45 = vadd.f32 %v366_v42, %v3198_v32  ;;  %v420_v46 = vadd.f32 %v419_v43, %v3198_v32  ;;  %v368_v47 = vpop.f32.mrb[3].mxu0  ;;  %v421_v48 = vpop.f32.mrb[3].mxu1  ;;  %v542_v53 = vmul.f32 0.1, %v416_v37 }
  0xf3   : > { %v541_v49 = vmul.f32 0.1, %v365_v40  ;;  %v543_v50 = vmul.f32 0.1, %v418_v41  ;;  %v369_v51 = vadd.f32 %v368_v47, %v3198_v32  ;;  %v422_v52 = vadd.f32 %v421_v48, %v3198_v32 }
  0xf4   : > { %v548_v54 = vmul.f32 0.1, %v367_v45  ;;  %v550_v55 = vmul.f32 0.1, %v420_v46  ;;  %v3210_v58 = vmax.f32 %v363_v36, %v540_v44  ;;  %v3226_v9 = vmax.f32 %v416_v37, %v542_v53 }
  0xf5   : > { %v549_v56 = vmul.f32 0.1, %v369_v51  ;;  %v551_v57 = vmul.f32 0.1, %v422_v52  ;;  %v3218_v62 = vmax.f32 %v365_v40, %v541_v49  ;;  %v3220_v63 = vmax.f32 %v418_v41, %v543_v50 }
  0xf6   : > { %v3212_v59 = vmax.f32 %v367_v45, %v548_v54  ;;  %v3214_v60 = vmax.f32 %v420_v46, %v550_v55 }
  0xf7   : > { %v3222_v1 = vmax.f32 %v369_v51, %v549_v56  ;;  %v3224_v2 = vmax.f32 %v422_v52, %v551_v57  ;;  %v372_v3 = vpop.f32.mrb[4].mxu0  ;;  %v425_v8 = vpop.f32.mrb[4].mxu1 }
  0xf8   : > { %v608_v10 = vpack.c.bf16 %v3212_v59, %v3210_v58  ;;  %v373_v11 = vadd.f32 %v372_v3, %v3200_v33  ;;  %v426_v12 = vadd.f32 %v425_v8, %v3200_v33  ;;  %v374_v13 = vpop.f32.mrb[5].mxu0  ;;  %v427_v14 = vpop.f32.mrb[5].mxu1  ;;  %v610_v21 = vpack.c.bf16 %v3214_v60, %v3226_v9 }
  0xf9   : > { %v375_v15 = vadd.f32 %v374_v13, %v3200_v33  ;;  %v428_v16 = vadd.f32 %v427_v14, %v3200_v33  ;;  %v376_v17 = vpop.f32.mrb[6].mxu0  ;;  %v429_v18 = vpop.f32.mrb[6].mxu1  ;;  %v609_v19 = vpack.c.bf16 %v3222_v1, %v3218_v62  ;;  %v611_v20 = vpack.c.bf16 %v3224_v2, %v3220_v63 }
  0xfa   : > { %v556_v22 = vmul.f32 0.1, %v373_v11  ;;  %v377_v23 = vadd.f32 %v376_v17, %v3216_v61  ;;  %v430_v24 = vadd.f32 %v429_v18, %v3216_v61  ;;  %v378_v25 = vpop.f32.mrb[7].mxu0  ;;  %v431_v26 = vpop.f32.mrb[7].mxu1  ;;  %v558_v34 = vmul.f32 0.1, %v426_v12 }
  0xfb   : > { %v557_v27 = vmul.f32 0.1, %v375_v15  ;;  %v559_v28 = vmul.f32 0.1, %v428_v16  ;;  %v379_v29 = vadd.f32 %v378_v25, %v3216_v61  ;;  %v432_v30 = vadd.f32 %v431_v26, %v3216_v61  ;;  %657 = vmatprep.subr.bf16.mxu0 %v609_v19  ;;  %710 = vmatprep.subr.bf16.mxu1 %v611_v20  ;;  %v3279_v19 = vld [vmem:[%s4123_s2] sm:$0xff]  }
  0xfc   : > { %v564_v35 = vmul.f32 0.1, %v377_v23  ;;  %v566_v36 = vmul.f32 0.1, %v430_v24  ;;  %658 = vmatpush1.bf16.msra.mxu0 %v608_v10  ;;  %711 = vmatpush1.bf16.msra.mxu1 %v610_v21  ;;  %v3244_v39 = vmax.f32 %v373_v11, %v556_v22  ;;  %v3258_v48 = vmax.f32 %v426_v12, %v558_v34 }
  0xfd   : > { %v565_v37 = vmul.f32 0.1, %v379_v29  ;;  %v567_v38 = vmul.f32 0.1, %v432_v30  ;;  %v3250_v42 = vmax.f32 %v375_v15, %v557_v27  ;;  %v3252_v43 = vmax.f32 %v428_v16, %v559_v28 }
  0xfe   : > { %v3246_v40 = vmax.f32 %v377_v23, %v564_v35  ;;  %v3248_v41 = vmax.f32 %v430_v24, %v566_v36 }
  0xff   : > { %v3254_v44 = vmax.f32 %v379_v29, %v565_v37  ;;  %v3256_v45 = vmax.f32 %v432_v30, %v567_v38  ;;  %v468_v46 = vpop.f32.mrb[8].mxu0  ;;  %v521_v47 = vpop.f32.mrb[8].mxu1 }
 0x100   : > { %v616_v49 = vpack.c.bf16 %v3246_v40, %v3244_v39  ;;  %v469_v50 = vadd.f32 %v468_v46, %v3196_v31  ;;  %v522_v51 = vadd.f32 %v521_v47, %v3196_v31  ;;  %v470_v52 = vpop.f32.mrb[9].mxu0  ;;  %v523_v53 = vpop.f32.mrb[9].mxu1  ;;  %v618_v10 = vpack.c.bf16 %v3248_v41, %v3258_v48 }
 0x101   : > { %v471_v54 = vadd.f32 %v470_v52, %v3196_v31  ;;  %v524_v55 = vadd.f32 %v523_v53, %v3196_v31  ;;  %v472_v56 = vpop.f32.mrb[10].mxu0  ;;  %v525_v57 = vpop.f32.mrb[10].mxu1  ;;  %v617_v3 = vpack.c.bf16 %v3254_v44, %v3250_v42  ;;  %v619_v8 = vpack.c.bf16 %v3256_v45, %v3252_v43 }
 0x102   : > { %v544_v11 = vmul.f32 0.1, %v469_v50  ;;  %v473_v12 = vadd.f32 %v472_v56, %v3198_v32  ;;  %v526_v13 = vadd.f32 %v525_v57, %v3198_v32  ;;  %v474_v14 = vpop.f32.mrb[11].mxu0  ;;  %v527_v15 = vpop.f32.mrb[11].mxu1  ;;  %v546_v20 = vmul.f32 0.1, %v522_v51 }
 0x103   : > { %v545_v16 = vmul.f32 0.1, %v471_v54  ;;  %v547_v31 = vmul.f32 0.1, %v524_v55  ;;  %v475_v17 = vadd.f32 %v474_v14, %v3198_v32  ;;  %v528_v18 = vadd.f32 %v527_v15, %v3198_v32  ;;  %659 = vmatprep.subr.bf16.mxu0 %v617_v3  ;;  %712 = vmatprep.subr.bf16.mxu1 %v619_v8  ;;  %v3054_v15 = vld [vmem:[%s4123_s2 + $0x8] sm:$0xff]  }
 0x104   : > { %v552_v21 = vmul.f32 0.1, %v473_v12  ;;  %v554_v22 = vmul.f32 0.1, %v526_v13  ;;  %660 = vmatpush1.bf16.msra.mxu0 %v616_v49  ;;  %713 = vmatpush1.bf16.msra.mxu1 %v618_v10  ;;  %v3281_v25 = vmax.f32 %v469_v50, %v544_v11  ;;  %v3299_v36 = vmax.f32 %v522_v51, %v546_v20 }
 0x105   : > { %v553_v23 = vmul.f32 0.1, %v475_v17  ;;  %v555_v24 = vmul.f32 0.1, %v528_v18  ;;  %v3283_v26 = vmax.f32 %v471_v54, %v545_v16  ;;  %v3289_v28 = vmax.f32 %v524_v55, %v547_v31 }
 0x106   : > { %v3285_v27 = vmax.f32 %v473_v12, %v552_v21  ;;  %v3287_v32 = vmax.f32 %v526_v13, %v554_v22 }
 0x107   : > { %v3291_v29 = vmax.f32 %v475_v17, %v553_v23  ;;  %v3293_v30 = vmax.f32 %v528_v18, %v555_v24  ;;  %v478_v34 = vpop.f32.mrb[12].mxu0  ;;  %v531_v35 = vpop.f32.mrb[12].mxu1  ;;  %2940 = vmatmul.mubr.msk.bf16.vlgmr.msra.gmra.mrb[16].mxu0 %vm650_vm2, %v3279_v19  ;;  %2942 = vmatmul.mubr.msk.bf16.vlgmr.msra.gmra.mrb[16].mxu1 %vm650_vm2, %v3279_v19 }
 0x108   : > { %v612_v37 = vpack.c.bf16 %v3285_v27, %v3281_v25  ;;  %v479_v38 = vadd.f32 %v478_v34, %v3200_v33  ;;  %v532_v46 = vadd.f32 %v531_v35, %v3200_v33  ;;  %v480_v47 = vpop.f32.mrb[13].mxu0  ;;  %v533_v49 = vpop.f32.mrb[13].mxu1  ;;  %699 = vmatprep.mubr.bf16.mxu0 %v4128_v0  ;;  %752 = vmatprep.mubr.bf16.mxu1 %v4128_v0 }
 0x109   : > { %4155 = vst [vmem:[#allocation2_spill] sm:$0xff] %v3293_v30  ;;  %v481_v50 = vadd.f32 %v480_v47, %v3200_v33  ;;  %v534_v52 = vadd.f32 %v533_v49, %v3200_v33  ;;  %v482_v53 = vpop.f32.mrb[14].mxu0  ;;  %v535_v54 = vpop.f32.mrb[14].mxu1  ;;  %v613_v51 = vpack.c.bf16 %v3291_v29, %v3283_v26  ;;  %v615_v55 = vpack.c.bf16 %v3293_v30, %v3289_v28 }
 0x10a   : > { %v614_v56 = vpack.c.bf16 %v3287_v32, %v3299_v36  ;;  %v560_v57 = vmul.f32 0.1, %v479_v38  ;;  %v483_v3 = vadd.f32 %v482_v53, %v3216_v61  ;;  %v536_v8 = vadd.f32 %v535_v54, %v3216_v61  ;;  %v484_v10 = vpop.f32.mrb[15].mxu0  ;;  %v537_v33 = vpop.f32.mrb[15].mxu1 }
 0x10b   : > { %v561_v11 = vmul.f32 0.1, %v481_v50  ;;  %v563_v12 = vmul.f32 0.1, %v534_v52  ;;  %v485_v13 = vadd.f32 %v484_v10, %v3216_v61  ;;  %v538_v14 = vadd.f32 %v537_v33, %v3216_v61  ;;  %763 = vmatprep.subr.bf16.mxu0 %v613_v51  ;;  %816 = vmatprep.subr.bf16.mxu1 %v615_v55 }
 0x10c   : > { %v562_v16 = vmul.f32 0.1, %v532_v46  ;;  %v568_v31 = vmul.f32 0.1, %v483_v3  ;;  %v570_v17 = vmul.f32 0.1, %v536_v8  ;;  %764 = vmatpush1.bf16.msra.mxu0 %v612_v37  ;;  %817 = vmatpush1.bf16.msra.mxu1 %v614_v56  ;;  %v3336_v35 = vmax.f32 %v479_v38, %v560_v57 }
 0x10d   : > { %v569_v18 = vmul.f32 0.1, %v485_v13  ;;  %v571_v20 = vmul.f32 0.1, %v538_v14  ;;  %v3322_v21 = vmax.f32 %v481_v50, %v561_v11  ;;  %v3328_v61 = vmax.f32 %v534_v52, %v563_v12 }
 0x10e   : > { %v3324_v22 = vmax.f32 %v483_v3, %v568_v31  ;;  %v3326_v23 = vmax.f32 %v536_v8, %v570_v17  ;;  %4162 = vst [vmem:[#allocation9_spill] sm:$0xff] %v3336_v35  ;;  %v3338_v37 = vmax.f32 %v532_v46, %v562_v16  ;;  %v3079_v38 = vmov 2   ;;  %v3366_v46 = vpop.permute.xlu1 %629 }
 0x10f   : > { %4156 = vst [vmem:[#allocation3_spill] sm:$0xff] %v3322_v21  ;;  %4159 = vst [vmem:[#allocation6_spill] sm:$0xff] %v3328_v61  ;;  %v3330_v24 = vmax.f32 %v485_v13, %v569_v18  ;;  %v3332_v34 = vmax.f32 %v538_v14, %v571_v20  ;;  %2941 = vmatmul.mubr.msk.bf16.gmra.mrb[20].mxu0 %vm650_vm2, %v3054_v15  ;;  %2943 = vmatmul.mubr.msk.bf16.gmra.mrb[20].mxu1 %vm650_vm2, %v3054_v15 }
 0x110   : > { %4157 = vst [vmem:[#allocation4_spill] sm:$0xff] %v3324_v22  ;;  %4158 = vst [vmem:[#allocation5_spill] sm:$0xff] %v3326_v23  ;;  %795 = vmatprep.mubr.bf16.mxu0 %v4128_v0  ;;  %848 = vmatprep.mubr.bf16.mxu1 %v4128_v0  ;;  %v620_v50 = vpack.c.bf16 %v3324_v22, %v3336_v35  ;;  %v622_v52 = vpack.c.bf16 %v3326_v23, %v3338_v37 }
 0x111   : > { %4160 = vst [vmem:[#allocation7_spill] sm:$0xff] %v3330_v24  ;;  %4161 = vst [vmem:[#allocation8_spill] sm:$0xff] %v3332_v34  ;;  %v621_v47 = vpack.c.bf16 %v3330_v24, %v3322_v21  ;;  %v623_v49 = vpack.c.bf16 %v3332_v34, %v3328_v61  ;;  %3040 = vset.pattern.permute.xlu1 %v3079_v38  ;;  %3041 = vset.pattern.permute.xlu0 %v3079_v38 }
 0x112   : > { %4163 = vst [vmem:[#allocation10_spill] sm:$0xff] %v3338_v37  ;;  %954 = vperm.xlu1 %3040, %v3141_v4   ;;  %958 = vperm.xlu0 %3041, %v3146_v5  }
 0x113   : > { %765 = vmatprep.subr.bf16.mxu0 %v621_v47  ;;  %818 = vmatprep.subr.bf16.mxu1 %v623_v49 }
 0x114   : > { %766 = vmatpush1.bf16.msra.mxu0 %v620_v50  ;;  %819 = vmatpush1.bf16.msra.mxu1 %v622_v52  ;;  %v3376_v50 = vpop.permute.xlu1 %633 }
 0x116   : > { %962 = vperm.xlu1 %3040, %v3151_v6  }
 0x117   : > { %2944 = vmatmul.mubr.msk.bf16.vlgmr.msra.gmra.mrb[24].mxu0 %vm650_vm2, %v3279_v19  ;;  %2946 = vmatmul.mubr.msk.bf16.vlgmr.msra.gmra.mrb[24].mxu1 %vm650_vm2, %v3279_v19  ;;  %v3364_v19 = vpop.permute.xlu0 %625 }
 0x118   : > { %805 = vmatprep.mubr.bf16.mxu0 %v4128_v0  ;;  %858 = vmatprep.mubr.bf16.mxu1 %v4128_v0 }
 0x11a   : > { %966 = vperm.xlu1 %3040, %v3158_v7  }
 0x11f   : > { %2945 = vmatmul.mubr.msk.bf16.gmra.mrb[28].mxu0 %vm650_vm2, %v3054_v15  ;;  %2947 = vmatmul.mubr.msk.bf16.gmra.mrb[28].mxu1 %vm650_vm2, %v3054_v15 }
 0x120   : > { %1017 = vmatprep.mubr.bf16.mxu0 %v4128_v0  ;;  %1070 = vmatprep.mubr.bf16.mxu1 %v4128_v0 }
 0x1da   : > { %v691_v53 = vpop.f32.mrb[16].mxu0  ;;  %v744_v54 = vpop.f32.mrb[16].mxu1 }
 0x1db   : > { %v692_v51 = vadd.f32 %v691_v53, %v3364_v19  ;;  %v745_v55 = vadd.f32 %v744_v54, %v3364_v19  ;;  %v693_v56 = vpop.f32.mrb[17].mxu0  ;;  %v746_v57 = vpop.f32.mrb[17].mxu1 }
 0x1dc   : > { %v694_v3 = vadd.f32 %v693_v56, %v3364_v19  ;;  %v747_v8 = vadd.f32 %v746_v57, %v3364_v19  ;;  %v695_v10 = vpop.f32.mrb[18].mxu0  ;;  %v748_v33 = vpop.f32.mrb[18].mxu1 }
 0x1dd   : > { %v869_v11 = vmul.f32 0.2, %v692_v51  ;;  %v871_v12 = vmul.f32 0.2, %v745_v55  ;;  %v696_v13 = vadd.f32 %v695_v10, %v3366_v46  ;;  %v749_v14 = vadd.f32 %v748_v33, %v3366_v46  ;;  %v697_v15 = vpop.f32.mrb[19].mxu0  ;;  %v750_v16 = vpop.f32.mrb[19].mxu1 }
 0x1de   : > { %v870_v31 = vmul.f32 0.2, %v694_v3  ;;  %v872_v17 = vmul.f32 0.2, %v747_v8  ;;  %v698_v18 = vadd.f32 %v697_v15, %v3366_v46  ;;  %v751_v20 = vadd.f32 %v750_v16, %v3366_v46  ;;  %v3378_v10 = vpop.permute.xlu0 %637 }
 0x1df   : > { %v877_v47 = vmul.f32 0.2, %v696_v13  ;;  %v879_v49 = vmul.f32 0.2, %v749_v14  ;;  %v901_v53 = vmax.f32 %v692_v51, %v869_v11  ;;  %v903_v54 = vmax.f32 %v745_v55, %v871_v12 }
 0x1e0   : > { %v878_v52 = vmul.f32 0.2, %v698_v18  ;;  %v880_v38 = vmul.f32 0.2, %v751_v20  ;;  %v902_v33 = vmax.f32 %v694_v3, %v870_v31  ;;  %v904_v0 = vmax.f32 %v747_v8, %v872_v17 }
 0x1e1   : > { %v909_v56 = vmax.f32 %v696_v13, %v877_v47  ;;  %v911_v57 = vmax.f32 %v749_v14, %v879_v49 }
 0x1e2   : > { %v910_v37 = vmax.f32 %v698_v18, %v878_v52  ;;  %v912_v35 = vmax.f32 %v751_v20, %v880_v38  ;;  %v701_v34 = vpop.f32.mrb[20].mxu0  ;;  %v754_v15 = vpop.f32.mrb[20].mxu1 }
 0x1e3   : > { %v937_v24 = vpack.c.bf16 %v909_v56, %v901_v53  ;;  %v939_v16 = vpack.c.bf16 %v911_v57, %v903_v54  ;;  %v702_v23 = vadd.f32 %v701_v34, %v3376_v50  ;;  %v755_v61 = vadd.f32 %v754_v15, %v3376_v50  ;;  %v703_v22 = vpop.f32.mrb[21].mxu0  ;;  %v756_v21 = vpop.f32.mrb[21].mxu1 }
 0x1e4   : > { %v704_v51 = vadd.f32 %v703_v22, %v3376_v50  ;;  %v757_v55 = vadd.f32 %v756_v21, %v3376_v50  ;;  %v705_v11 = vpop.f32.mrb[22].mxu0  ;;  %v758_v12 = vpop.f32.mrb[22].mxu1  ;;  %v938_v3 = vpack.c.bf16 %v910_v37, %v902_v33  ;;  %v940_v8 = vpack.c.bf16 %v912_v35, %v904_v0 }
 0x1e5   : > { %v885_v13 = vmul.f32 0.2, %v702_v23  ;;  %v887_v14 = vmul.f32 0.2, %v755_v61  ;;  %v706_v31 = vadd.f32 %v705_v11, %v3378_v10  ;;  %v759_v17 = vadd.f32 %v758_v12, %v3378_v10  ;;  %v707_v18 = vpop.f32.mrb[23].mxu0  ;;  %v760_v34 = vpop.f32.mrb[23].mxu1 }
 0x1e6   : > { %v886_v20 = vmul.f32 0.2, %v704_v51  ;;  %v888_v47 = vmul.f32 0.2, %v757_v55  ;;  %v708_v49 = vadd.f32 %v707_v18, %v3378_v10  ;;  %v761_v22 = vadd.f32 %v760_v34, %v3378_v10  ;;  %985 = vmatprep.subr.bf16.mxu0 %v938_v3  ;;  %1038 = vmatprep.subr.bf16.mxu1 %v940_v8 }
 0x1e7   : > { %v893_v21 = vmul.f32 0.2, %v706_v31  ;;  %v895_v52 = vmul.f32 0.2, %v759_v17  ;;  %986 = vmatpush1.bf16.msra.mxu0 %v937_v24  ;;  %1039 = vmatpush1.bf16.msra.mxu1 %v939_v16  ;;  %v917_v37 = vmax.f32 %v702_v23, %v885_v13  ;;  %v919_v38 = vmax.f32 %v755_v61, %v887_v14 }
 0x1e8   : > { %v894_v0 = vmul.f32 0.2, %v708_v49  ;;  %v896_v35 = vmul.f32 0.2, %v761_v22  ;;  %v918_v56 = vmax.f32 %v704_v51, %v886_v20  ;;  %v920_v57 = vmax.f32 %v757_v55, %v888_v47 }
 0x1e9   : > { %v925_v53 = vmax.f32 %v706_v31, %v893_v21  ;;  %v927_v54 = vmax.f32 %v759_v17, %v895_v52 }
 0x1ea   : > { %v926_v33 = vmax.f32 %v708_v49, %v894_v0  ;;  %v928_v15 = vmax.f32 %v761_v22, %v896_v35  ;;  %v797_v11 = vpop.f32.mrb[24].mxu0  ;;  %v850_v12 = vpop.f32.mrb[24].mxu1 }
 0x1eb   : > { %v945_v18 = vpack.c.bf16 %v925_v53, %v917_v37  ;;  %v947_v34 = vpack.c.bf16 %v927_v54, %v919_v38  ;;  %v798_v3 = vadd.f32 %v797_v11, %v3364_v19  ;;  %v851_v8 = vadd.f32 %v850_v12, %v3364_v19  ;;  %v799_v24 = vpop.f32.mrb[25].mxu0  ;;  %v852_v16 = vpop.f32.mrb[25].mxu1 }
 0x1ec   : > { %v800_v30 = vadd.f32 %v799_v24, %v3364_v19  ;;  %v853_v23 = vadd.f32 %v852_v16, %v3364_v19  ;;  %v801_v61 = vpop.f32.mrb[26].mxu0  ;;  %v854_v13 = vpop.f32.mrb[26].mxu1  ;;  %v946_v51 = vpack.c.bf16 %v926_v33, %v918_v56  ;;  %v948_v55 = vpack.c.bf16 %v928_v15, %v920_v57  ;;  %v3399_v19 = vld [vmem:[%s4124_s3] sm:$0xff]  }
 0x1ed   : > { %v873_v14 = vmul.f32 0.2, %v798_v3  ;;  %v875_v31 = vmul.f32 0.2, %v851_v8  ;;  %v802_v17 = vadd.f32 %v801_v61, %v3366_v46  ;;  %v855_v20 = vadd.f32 %v854_v13, %v3366_v46  ;;  %v803_v47 = vpop.f32.mrb[27].mxu0  ;;  %v856_v49 = vpop.f32.mrb[27].mxu1 }
 0x1ee   : > { %v874_v22 = vmul.f32 0.2, %v800_v30  ;;  %v876_v21 = vmul.f32 0.2, %v853_v23  ;;  %v804_v52 = vadd.f32 %v803_v47, %v3366_v46  ;;  %v857_v0 = vadd.f32 %v856_v49, %v3366_v46  ;;  %987 = vmatprep.subr.bf16.mxu0 %v946_v51  ;;  %1040 = vmatprep.subr.bf16.mxu1 %v948_v55 }
 0x1ef   : > { %v881_v35 = vmul.f32 0.2, %v802_v17  ;;  %v883_v37 = vmul.f32 0.2, %v855_v20  ;;  %988 = vmatpush1.bf16.msra.mxu0 %v945_v18  ;;  %1041 = vmatpush1.bf16.msra.mxu1 %v947_v34  ;;  %v905_v38 = vmax.f32 %v798_v3, %v873_v14  ;;  %v907_v56 = vmax.f32 %v851_v8, %v875_v31 }
 0x1f0   : > { %v882_v53 = vmul.f32 0.2, %v804_v52  ;;  %v884_v54 = vmul.f32 0.2, %v857_v0  ;;  %v906_v57 = vmax.f32 %v800_v30, %v874_v22  ;;  %v908_v11 = vmax.f32 %v853_v23, %v876_v21 }
 0x1f1   : > { %v913_v33 = vmax.f32 %v802_v17, %v881_v35  ;;  %v915_v15 = vmax.f32 %v855_v20, %v883_v37  ;;  %v4164_v13 = vmov 0  }
 0x1f2   : > { %v914_v46 = vmax.f32 %v804_v52, %v882_v53  ;;  %v916_v12 = vmax.f32 %v857_v0, %v884_v54  ;;  %v807_v24 = vpop.f32.mrb[28].mxu0  ;;  %v860_v16 = vpop.f32.mrb[28].mxu1  ;;  %2950 = vmatmul.mubr.msk.bf16.vlgmr.msra.gmra.mrb[32].mxu0 %vm650_vm2, %v3399_v19  ;;  %2952 = vmatmul.mubr.msk.bf16.vlgmr.msra.gmra.mrb[32].mxu1 %vm650_vm2, %v3399_v19 }
 0x1f3   : > { %v941_v18 = vpack.c.bf16 %v913_v33, %v905_v38  ;;  %v943_v34 = vpack.c.bf16 %v915_v15, %v907_v56  ;;  %v808_v3 = vadd.f32 %v807_v24, %v3376_v50  ;;  %v861_v8 = vadd.f32 %v860_v16, %v3376_v50  ;;  %v809_v30 = vpop.f32.mrb[29].mxu0  ;;  %v862_v61 = vpop.f32.mrb[29].mxu1  ;;  %1027 = vmatprep.mubr.bf16.mxu0 %v4164_v13  ;;  %v3056_v38 = vld [vmem:[%s4124_s3 + $0x8] sm:$0xff]  }
 0x1f4   : > { %v810_v23 = vadd.f32 %v809_v30, %v3376_v50  ;;  %v863_v51 = vadd.f32 %v862_v61, %v3376_v50  ;;  %v811_v55 = vpop.f32.mrb[30].mxu0  ;;  %v864_v14 = vpop.f32.mrb[30].mxu1  ;;  %v942_v31 = vpack.c.bf16 %v914_v46, %v906_v57  ;;  %v944_v17 = vpack.c.bf16 %v916_v12, %v908_v11  ;;  %1080 = vmatprep.mubr.bf16.mxu1 %v4164_v13 }
 0x1f5   : > { %v889_v20 = vmul.f32 0.2, %v808_v3  ;;  %v891_v47 = vmul.f32 0.2, %v861_v8  ;;  %v812_v49 = vadd.f32 %v811_v55, %v3378_v10  ;;  %v865_v22 = vadd.f32 %v864_v14, %v3378_v10  ;;  %v813_v21 = vpop.f32.mrb[31].mxu0  ;;  %v866_v52 = vpop.f32.mrb[31].mxu1 }
 0x1f6   : > { %v890_v0 = vmul.f32 0.2, %v810_v23  ;;  %v892_v35 = vmul.f32 0.2, %v863_v51  ;;  %v814_v37 = vadd.f32 %v813_v21, %v3378_v10  ;;  %v867_v50 = vadd.f32 %v866_v52, %v3378_v10  ;;  %1091 = vmatprep.subr.bf16.mxu0 %v942_v31  ;;  %1144 = vmatprep.subr.bf16.mxu1 %v944_v17 }
 0x1f7   : > { %v897_v53 = vmul.f32 0.2, %v812_v49  ;;  %v899_v54 = vmul.f32 0.2, %v865_v22  ;;  %1092 = vmatpush1.bf16.msra.mxu0 %v941_v18  ;;  %1145 = vmatpush1.bf16.msra.mxu1 %v943_v34  ;;  %v921_v56 = vmax.f32 %v808_v3, %v889_v20  ;;  %v923_v15 = vmax.f32 %v861_v8, %v891_v47 }
 0x1f8   : > { %v898_v57 = vmul.f32 0.2, %v814_v37  ;;  %v900_v33 = vmul.f32 0.2, %v867_v50  ;;  %v922_v11 = vmax.f32 %v810_v23, %v890_v0  ;;  %v924_v24 = vmax.f32 %v863_v51, %v892_v35  ;;  %v3440_v23 = vpop.permute.xlu0 %958 }
 0x1f9   : > { %v929_v46 = vmax.f32 %v812_v49, %v897_v53  ;;  %v931_v12 = vmax.f32 %v865_v22, %v899_v54  ;;  %v3080_v3 = vmov 3  }
 0x1fa   : > { %v930_v16 = vmax.f32 %v814_v37, %v898_v57  ;;  %v932_v10 = vmax.f32 %v867_v50, %v900_v33  ;;  %2951 = vmatmul.mubr.msk.bf16.gmra.mrb[36].mxu0 %vm650_vm2, %v3056_v38  ;;  %2953 = vmatmul.mubr.msk.bf16.gmra.mrb[36].mxu1 %vm650_vm2, %v3056_v38 }
 0x1fb   : > { %v949_v30 = vpack.c.bf16 %v929_v46, %v921_v56  ;;  %v951_v61 = vpack.c.bf16 %v931_v12, %v923_v15  ;;  %1123 = vmatprep.mubr.bf16.mxu0 %v4164_v13  ;;  %1176 = vmatprep.mubr.bf16.mxu1 %v4164_v13 }
 0x1fc   : > { %v950_v18 = vpack.c.bf16 %v930_v16, %v922_v11  ;;  %v952_v34 = vpack.c.bf16 %v932_v10, %v924_v24  ;;  %3043 = vset.pattern.permute.xlu1 %v3080_v3  ;;  %3042 = vset.pattern.permute.xlu0 %v3080_v3 }
 0x1fd   : > { %1319 = vperm.xlu1 %3043, %v3146_v5   ;;  %1315 = vperm.xlu0 %3042, %v3141_v4  }
 0x1fe   : > { %1093 = vmatprep.subr.bf16.mxu0 %v950_v18  ;;  %1146 = vmatprep.subr.bf16.mxu1 %v952_v34 }
 0x1ff   : > { %1094 = vmatpush1.bf16.msra.mxu0 %v949_v30  ;;  %1147 = vmatpush1.bf16.msra.mxu1 %v951_v61 }
 0x201   : > { %1323 = vperm.xlu1 %3043, %v3151_v6   ;;  %1327 = vperm.xlu0 %3042, %v3158_v7  }
 0x202   : > { %2954 = vmatmul.mubr.msk.bf16.vlgmr.msra.gmra.mrb[40].mxu0 %vm650_vm2, %v3399_v19  ;;  %2956 = vmatmul.mubr.msk.bf16.vlgmr.msra.gmra.mrb[40].mxu1 %vm650_vm2, %v3399_v19  ;;  %v3436_v19 = vpop.permute.xlu1 %954 }
 0x203   : > { %1133 = vmatprep.mubr.bf16.mxu0 %v4164_v13  ;;  %1186 = vmatprep.mubr.bf16.mxu1 %v4164_v13 }
 0x206   : > { %v3438_v8 = vpop.permute.xlu1 %962 }
 0x20a   : > { %2955 = vmatmul.mubr.msk.bf16.gmra.mrb[44].mxu0 %vm650_vm2, %v3056_v38  ;;  %2957 = vmatmul.mubr.msk.bf16.gmra.mrb[44].mxu1 %vm650_vm2, %v3056_v38  ;;  %v3450_v16 = vpop.permute.xlu1 %966 }
 0x20b   : > { %1378 = vmatprep.mubr.bf16.mxu0 %v4164_v13  ;;  %1431 = vmatprep.mubr.bf16.mxu1 %v4164_v13 }
 0x2c5   : > { %v1019_v51 = vpop.f32.mrb[32].mxu0  ;;  %v1072_v55 = vpop.f32.mrb[32].mxu1 }
 0x2c6   : > { %v1020_v14 = vadd.f32 %v1019_v51, %v3436_v19  ;;  %v1073_v31 = vadd.f32 %v1072_v55, %v3436_v19  ;;  %v1021_v17 = vpop.f32.mrb[33].mxu0  ;;  %v1074_v5 = vpop.f32.mrb[33].mxu1 }
 0x2c7   : > { %v1022_v4 = vadd.f32 %v1021_v17, %v3436_v19  ;;  %v1075_v6 = vadd.f32 %v1074_v5, %v3436_v19  ;;  %v1023_v20 = vpop.f32.mrb[34].mxu0  ;;  %v1076_v7 = vpop.f32.mrb[34].mxu1 }
 0x2c8   : > { %v1197_v47 = vmul.f32 0.2, %v1020_v14  ;;  %v1199_v49 = vmul.f32 0.2, %v1073_v31  ;;  %v1024_v22 = vadd.f32 %v1023_v20, %v3440_v23  ;;  %v1077_v21 = vadd.f32 %v1076_v7, %v3440_v23  ;;  %v1025_v52 = vpop.f32.mrb[35].mxu0  ;;  %v1078_v0 = vpop.f32.mrb[35].mxu1 }
 0x2c9   : > { %v1198_v35 = vmul.f32 0.2, %v1022_v4  ;;  %v1200_v37 = vmul.f32 0.2, %v1075_v6  ;;  %v1026_v50 = vadd.f32 %v1025_v52, %v3440_v23  ;;  %v1079_v38 = vadd.f32 %v1078_v0, %v3440_v23 }
 0x2ca   : > { %v1229_v53 = vmax.f32 %v1020_v14, %v1197_v47  ;;  %v1231_v54 = vmax.f32 %v1073_v31, %v1199_v49  ;;  %v1205_v56 = vmul.f32 0.2, %v1024_v22  ;;  %v1207_v57 = vmul.f32 0.2, %v1077_v21 }
 0x2cb   : > { %v1230_v33 = vmax.f32 %v1022_v4, %v1198_v35  ;;  %v1232_v15 = vmax.f32 %v1075_v6, %v1200_v37  ;;  %v1206_v11 = vmul.f32 0.2, %v1026_v50  ;;  %v1208_v46 = vmul.f32 0.2, %v1079_v38 }
 0x2cc   : > { %v1237_v12 = vmax.f32 %v1024_v22, %v1205_v56  ;;  %v1239_v24 = vmax.f32 %v1077_v21, %v1207_v57  ;;  %v3453_v10 = vadd.f32 %v1229_v53, %v3210_v58  ;;  %v3456_v30 = vadd.f32 %v1231_v54, %v3226_v9 }
 0x2cd   : > { %v1238_v61 = vmax.f32 %v1026_v50, %v1206_v11  ;;  %v1029_v18 = vpop.f32.mrb[36].mxu0  ;;  %v1082_v34 = vpop.f32.mrb[36].mxu1  ;;  %v3459_v3 = vadd.f32 %v1230_v33, %v3218_v62  ;;  %v1240_v51 = vmax.f32 %v1079_v38, %v1208_v46  ;;  %v3464_v5 = vadd.f32 %v1232_v15, %v3220_v63 }
 0x2ce   : > { %v1030_v55 = vadd.f32 %v1029_v18, %v3438_v8  ;;  %v1083_v14 = vadd.f32 %v1082_v34, %v3438_v8  ;;  %v1031_v31 = vpop.f32.mrb[37].mxu0  ;;  %v1084_v17 = vpop.f32.mrb[37].mxu1  ;;  %v3467_v58 = vadd.f32 %v1237_v12, %v3212_v59  ;;  %v3474_v20 = vadd.f32 %v1239_v24, %v3214_v60 }
 0x2cf   : > { %v1032_v9 = vadd.f32 %v1031_v31, %v3438_v8  ;;  %v3471_v4 = vadd.f32 %v1084_v17, %v3438_v8  ;;  %v1033_v62 = vpop.f32.mrb[38].mxu0  ;;  %v1086_v6 = vpop.f32.mrb[38].mxu1  ;;  %v3477_v7 = vadd.f32 %v1238_v61, %v3222_v1  ;;  %v3483_v35 = vadd.f32 %v1240_v51, %v3224_v2 }
 0x2d0   : > { %v1213_v47 = vmul.f32 0.2, %v1030_v55  ;;  %v1215_v49 = vmul.f32 0.2, %v1083_v14  ;;  %v1035_v63 = vpop.f32.mrb[39].mxu0  ;;  %v1088_v22 = vpop.f32.mrb[39].mxu1  ;;  %v1034_v52 = vadd.f32 %v1033_v62, %v3450_v16  ;;  %v1087_v0 = vadd.f32 %v1086_v6, %v3450_v16 }
 0x2d1   : > { %v1214_v21 = vmul.f32 0.2, %v1032_v9  ;;  %v1216_v59 = vmul.f32 0.2, %v3471_v4  ;;  %v1036_v60 = vadd.f32 %v1035_v63, %v3450_v16  ;;  %v1089_v1 = vadd.f32 %v1088_v22, %v3450_v16 }
 0x2d2   : > { %v1245_v37 = vmax.f32 %v1030_v55, %v1213_v47  ;;  %v1247_v50 = vmax.f32 %v1083_v14, %v1215_v49  ;;  %v1221_v53 = vmul.f32 0.2, %v1034_v52  ;;  %v1223_v54 = vmul.f32 0.2, %v1087_v0 }
 0x2d3   : > { %v1246_v38 = vmax.f32 %v1032_v9, %v1214_v21  ;;  %v1298_v56 = vpack.c.bf16 %v3467_v58, %v3453_v10  ;;  %v1300_v57 = vpack.c.bf16 %v3474_v20, %v3456_v30  ;;  %v1222_v33 = vmul.f32 0.2, %v1036_v60 }
 0x2d4   : > { %v1224_v15 = vmul.f32 0.2, %v1089_v1  ;;  %v3492_v2 = vadd.f32 %v1245_v37, %v3244_v39  ;;  %v1248_v11 = vmax.f32 %v3471_v4, %v1216_v59  ;;  %v1253_v46 = vmax.f32 %v1034_v52, %v1221_v53 }
 0x2d5   : > { %v1255_v12 = vmax.f32 %v1087_v0, %v1223_v54  ;;  %v1125_v24 = vpop.f32.mrb[40].mxu0  ;;  %v1178_v61 = vpop.f32.mrb[40].mxu1  ;;  %v1254_v18 = vmax.f32 %v1036_v60, %v1222_v33  ;;  %v1299_v51 = vpack.c.bf16 %v3477_v7, %v3459_v3  ;;  %v1301_v55 = vpack.c.bf16 %v3483_v35, %v3464_v5 }
 0x2d6   : > { %v1256_v34 = vmax.f32 %v1089_v1, %v1224_v15  ;;  %v1127_v14 = vpop.f32.mrb[41].mxu0  ;;  %v1180_v31 = vpop.f32.mrb[41].mxu1  ;;  %v3500_v17 = vadd.f32 %v1247_v50, %v3258_v48  ;;  %v3503_v39 = vadd.f32 %v1246_v38, %v3250_v42  ;;  %v1126_v9 = vadd.f32 %v1125_v24, %v3436_v19 }
 0x2d7   : > { %v1179_v4 = vadd.f32 %v1178_v61, %v3436_v19  ;;  %v1129_v62 = vpop.f32.mrb[42].mxu0  ;;  %v1182_v6 = vpop.f32.mrb[42].mxu1  ;;  %v3508_v47 = vadd.f32 %v1253_v46, %v3246_v40  ;;  %v3511_v49 = vadd.f32 %v1255_v12, %v3248_v41  ;;  %1346 = vmatprep.subr.bf16.mxu0 %v1299_v51  ;;  %1399 = vmatprep.subr.bf16.mxu1 %v1301_v55 }
 0x2d8   : > { %v1128_v48 = vadd.f32 %v1127_v14, %v3436_v19  ;;  %v1131_v63 = vpop.f32.mrb[43].mxu0  ;;  %v1184_v22 = vpop.f32.mrb[43].mxu1  ;;  %v3515_v42 = vadd.f32 %v1254_v18, %v3254_v44  ;;  %v3518_v21 = vadd.f32 %v1256_v34, %v3256_v45  ;;  %1347 = vmatpush1.bf16.msra.mxu0 %v1298_v56  ;;  %1400 = vmatpush1.bf16.msra.mxu1 %v1300_v57  ;;  %v1201_v59 = vmul.f32 0.2, %v1126_v9 }
 0x2d9   : > { %v1203_v40 = vmul.f32 0.2, %v1179_v4  ;;  %v1181_v41 = vadd.f32 %v1180_v31, %v3436_v19  ;;  %v1130_v0 = vadd.f32 %v1129_v62, %v3440_v23  ;;  %v1183_v37 = vadd.f32 %v1182_v6, %v3440_v23 }
 0x2da   : > { %v1202_v52 = vmul.f32 0.2, %v1128_v48  ;;  %v1233_v60 = vmax.f32 %v1126_v9, %v1201_v59  ;;  %v1132_v50 = vadd.f32 %v1131_v63, %v3440_v23  ;;  %v1185_v44 = vadd.f32 %v1184_v22, %v3440_v23 }
 0x2db   : > { %v1235_v1 = vmax.f32 %v1179_v4, %v1203_v40  ;;  %v1204_v45 = vmul.f32 0.2, %v1181_v41  ;;  %v1209_v53 = vmul.f32 0.2, %v1130_v0  ;;  %v1211_v54 = vmul.f32 0.2, %v1183_v37 }
 0x2dc   : > { %v1234_v38 = vmax.f32 %v1128_v48, %v1202_v52  ;;  %v3526_v56 = vadd.f32 %v1248_v11, %v3252_v43  ;;  %v1306_v19 = vpack.c.bf16 %v3508_v47, %v3492_v2  ;;  %v1210_v57 = vmul.f32 0.2, %v1132_v50 }
 0x2dd   : > { %v1212_v33 = vmul.f32 0.2, %v1185_v44  ;;  %v1135_v15 = vpop.f32.mrb[44].mxu0  ;;  %v1188_v46 = vpop.f32.mrb[44].mxu1  ;;  %v1308_v12 = vpack.c.bf16 %v3511_v49, %v3500_v17  ;;  %v1236_v24 = vmax.f32 %v1181_v41, %v1204_v45  ;;  %v1241_v61 = vmax.f32 %v1130_v0, %v1209_v53 }
 0x2de   : > { %v1243_v23 = vmax.f32 %v1183_v37, %v1211_v54  ;;  %v1137_v18 = vpop.f32.mrb[45].mxu0  ;;  %v1190_v34 = vpop.f32.mrb[45].mxu1  ;;  %v3533_v51 = vadd.f32 %v1233_v60, %v3281_v25  ;;  %v1242_v43 = vmax.f32 %v1132_v50, %v1210_v57  ;;  %v1307_v11 = vpack.c.bf16 %v3515_v42, %v3503_v39  ;;  %v4166_v50 = vld [vmem:[#allocation2_spill] sm:$0xff] }
 0x2df   : > { %v1309_v55 = vpack.c.bf16 %v3518_v21, %v3526_v56  ;;  %v1139_v14 = vpop.f32.mrb[46].mxu0  ;;  %v1192_v31 = vpop.f32.mrb[46].mxu1  ;;  %v3540_v9 = vadd.f32 %v1235_v1, %v3299_v36  ;;  %v3543_v4 = vadd.f32 %v1234_v38, %v3283_v26  ;;  %v1244_v62 = vmax.f32 %v1185_v44, %v1212_v33  ;;  %v3057_v26 = vld [vmem:[%s4123_s2 + $0x10] sm:$0xff]  }
 0x2e0   : > { %v1136_v6 = vadd.f32 %v1135_v15, %v3438_v8  ;;  %v1141_v25 = vpop.f32.mrb[47].mxu0  ;;  %v1194_v48 = vpop.f32.mrb[47].mxu1  ;;  %v3547_v63 = vadd.f32 %v1236_v24, %v3289_v28  ;;  %v3550_v22 = vadd.f32 %v1241_v61, %v3285_v27  ;;  %1348 = vmatprep.subr.bf16.mxu0 %v1307_v11  ;;  %v1189_v59 = vadd.f32 %v1188_v46, %v3438_v8 }
 0x2e1   : > { %1401 = vmatprep.subr.bf16.mxu1 %v1309_v55  ;;  %v3557_v36 = vadd.f32 %v1243_v23, %v3287_v32  ;;  %v3560_v40 = vadd.f32 %v1242_v43, %v3291_v29  ;;  %1349 = vmatpush1.bf16.msra.mxu0 %v1306_v19  ;;  %v1138_v28 = vadd.f32 %v1137_v18, %v3438_v8  ;;  %v4168_v18 = vld [vmem:[#allocation3_spill] sm:$0xff]  ;;  %v4170_v43 = vld [vmem:[#allocation4_spill] sm:$0xff] }
 0x2e2   : > { %1402 = vmatpush1.bf16.msra.mxu1 %v1308_v12  ;;  %v1217_v27 = vmul.f32 0.2, %v1136_v6  ;;  %v1191_v52 = vadd.f32 %v1190_v34, %v3438_v8  ;;  %v1140_v41 = vadd.f32 %v1139_v14, %v3450_v16  ;;  %v1193_v0 = vadd.f32 %v1192_v31, %v3450_v16  ;;  %v3058_v14 = vld [vmem:[%s4123_s2 + $0x18] sm:$0xff]   ;;  %v4172_v31 = vld [vmem:[#allocation6_spill] sm:$0xff] }
 0x2e3   : > { %4165 = vst [vmem:[#allocation11_spill] sm:$0xff] %v3560_v40  ;;  %v1219_v37 = vmul.f32 0.2, %v1189_v59  ;;  %v1218_v60 = vmul.f32 0.2, %v1138_v28  ;;  %v1142_v1 = vadd.f32 %v1141_v25, %v3450_v16  ;;  %v1195_v32 = vadd.f32 %v1194_v48, %v3450_v16  ;;  %v4176_v48 = vld [vmem:[#allocation7_spill] sm:$0xff] }
 0x2e4   : > { %v3569_v29 = vadd.f32 %v1244_v62, %v4166_v50  ;;  %v1220_v44 = vmul.f32 0.2, %v1191_v52  ;;  %v1225_v38 = vmul.f32 0.2, %v1140_v41  ;;  %v1227_v45 = vmul.f32 0.2, %v1193_v0  ;;  %2964 = vmatmul.mubr.msk.bf16.vlgmr.msra.gmra.mrb[48].mxu0 %vm650_vm2, %v3057_v26 }
 0x2e5   : > { %2966 = vmatmul.mubr.msk.bf16.vlgmr.msra.gmra.mrb[48].mxu1 %vm650_vm2, %v3057_v26  ;;  %v1302_v8 = vpack.c.bf16 %v3550_v22, %v3533_v51  ;;  %v1250_v53 = vmax.f32 %v1138_v28, %v1218_v60  ;;  %v1226_v54 = vmul.f32 0.2, %v1142_v1  ;;  %v1228_v19 = vmul.f32 0.2, %v1195_v32  ;;  %1388 = vmatprep.mubr.bf16.mxu0 %v4164_v13  ;;  %v4178_v28 = vld [vmem:[#allocation8_spill] sm:$0xff] }
 0x2e6   : > { %4167 = vst [vmem:[#allocation2_spill] sm:$0xff] %v3569_v29  ;;  %1441 = vmatprep.mubr.bf16.mxu1 %v4164_v13  ;;  %v1249_v16 = vmax.f32 %v1136_v6, %v1217_v27  ;;  %v1252_v57 = vmax.f32 %v1191_v52, %v1220_v44  ;;  %v1257_v33 = vmax.f32 %v1140_v41, %v1225_v38  ;;  %v4174_v6 = vld [vmem:[#allocation5_spill] sm:$0xff]  ;;  %v3081_v44 = vmov 4   ;;  %v3633_v38 = vld [vmem:[%s4126_s5] sm:$0xff] }
 0x2e7   : > { %v1259_v15 = vmax.f32 %v1193_v0, %v1227_v45  ;;  %v1251_v46 = vmax.f32 %v1189_v59, %v1219_v37  ;;  %v1258_v12 = vmax.f32 %v1142_v1, %v1226_v54  ;;  %v1260_v24 = vmax.f32 %v1195_v32, %v1228_v19  ;;  %v4180_v52 = vld [vmem:[#allocation9_spill] sm:$0xff]  ;;  %v4182_v0 = vld [vmem:[#allocation10_spill] sm:$0xff]  ;;  %3044 = vset.pattern.permute.xlu1 %v3081_v44  ;;  %v3645_v45 = vld [vmem:[%s4126_s5 + $0x10] sm:$0xff]  ;;  %v3656_v54 = vpop.permute.xlu1 %1319 }
 0x2e8   : > { %v1303_v61 = vpack.c.bf16 %v3560_v40, %v3543_v4  ;;  %v1304_v23 = vpack.c.bf16 %v3557_v36, %v3540_v9  ;;  %v3582_v34 = vadd.f32 %v1250_v53, %v4168_v18  ;;  %v3585_v11 = vadd.f32 %v1257_v33, %v4170_v43  ;;  %3045 = vset.pattern.permute.xlu0 %v3081_v44  ;;  %v3654_v53 = vpop.permute.xlu0 %1315 }
 0x2e9   : > { %v1305_v55 = vpack.c.bf16 %v3569_v29, %v3547_v63  ;;  %v3593_v62 = vadd.f32 %v1252_v57, %v4172_v31  ;;  %v3596_v25 = vadd.f32 %v1259_v15, %v4174_v6  ;;  %v3599_v59 = vadd.f32 %v1258_v12, %v4176_v48  ;;  %1644 = vperm.xlu1 %3044, %v3633_v38  }
 0x2ea   : > { %4169 = vst [vmem:[#allocation3_spill] sm:$0xff] %v3582_v34  ;;  %4171 = vst [vmem:[#allocation4_spill] sm:$0xff] %v3585_v11  ;;  %v3602_v27 = vadd.f32 %v1260_v24, %v4178_v28  ;;  %1452 = vmatprep.subr.bf16.mxu0 %v1303_v61  ;;  %v3605_v41 = vadd.f32 %v1249_v16, %v4180_v52  ;;  %v3608_v37 = vadd.f32 %v1251_v46, %v4182_v0 }
 0x2eb   : > { %4173 = vst [vmem:[#allocation6_spill] sm:$0xff] %v3593_v62  ;;  %4175 = vst [vmem:[#allocation5_spill] sm:$0xff] %v3596_v25  ;;  %1505 = vmatprep.subr.bf16.mxu1 %v1305_v55  ;;  %1453 = vmatpush1.bf16.msra.mxu0 %v1302_v8  ;;  %v1311_v60 = vpack.c.bf16 %v3599_v59, %v3582_v34  ;;  %v3651_v8 = vld [vmem:[%s4126_s5 + $0x18] sm:$0xff] }
 0x2ec   : > { %4177 = vst [vmem:[#allocation7_spill] sm:$0xff] %v3599_v59  ;;  %4179 = vst [vmem:[#allocation8_spill] sm:$0xff] %v3602_v27  ;;  %1506 = vmatpush1.bf16.msra.mxu1 %v1304_v23  ;;  %v1313_v1 = vpack.c.bf16 %v3602_v27, %v3593_v62  ;;  %v1310_v32 = vpack.c.bf16 %v3585_v11, %v3605_v41  ;;  %2965 = vmatmul.mubr.msk.bf16.gmra.mrb[52].mxu0 %vm650_vm2, %v3058_v14 }
 0x2ed   : > { %4181 = vst [vmem:[#allocation9_spill] sm:$0xff] %v3605_v41  ;;  %4183 = vst [vmem:[#allocation10_spill] sm:$0xff] %v3608_v37  ;;  %2967 = vmatmul.mubr.msk.bf16.gmra.mrb[52].mxu1 %vm650_vm2, %v3058_v14  ;;  %v1312_v50 = vpack.c.bf16 %v3596_v25, %v3608_v37  ;;  %1454 = vmatprep.subr.bf16.mxu0 %v1311_v60 }
 0x2ee   : > { %1507 = vmatprep.subr.bf16.mxu1 %v1313_v1  ;;  %1484 = vmatprep.mubr.bf16.mxu0 %v4164_v13 }
 0x2ef   : > { %1455 = vmatpush1.bf16.msra.mxu0 %v1310_v32  ;;  %1537 = vmatprep.mubr.bf16.mxu1 %v4164_v13  ;;  %v3666_v32 = vpop.permute.xlu1 %1323 }
 0x2f0   : > { %1508 = vmatpush1.bf16.msra.mxu1 %v1312_v50  ;;  %1652 = vperm.xlu1 %3044, %v3645_v45  }
 0x2f4   : > { %2968 = vmatmul.mubr.msk.bf16.vlgmr.msra.gmra.mrb[56].mxu0 %vm650_vm2, %v3057_v26  ;;  %1656 = vperm.xlu1 %3044, %v3651_v8  }
 0x2f5   : > { %2970 = vmatmul.mubr.msk.bf16.vlgmr.msra.gmra.mrb[56].mxu1 %vm650_vm2, %v3057_v26  ;;  %1494 = vmatprep.mubr.bf16.mxu0 %v4164_v13  ;;  %v3639_v26 = vld [vmem:[%s4126_s5 + $0x8] sm:$0xff] }
 0x2f6   : > { %1547 = vmatprep.mubr.bf16.mxu1 %v4164_v13  ;;  %1648 = vperm.xlu0 %3045, %v3639_v26  }
 0x2fc   : > { %2969 = vmatmul.mubr.msk.bf16.gmra.mrb[60].mxu0 %vm650_vm2, %v3058_v14 }
 0x2fd   : > { %2971 = vmatmul.mubr.msk.bf16.gmra.mrb[60].mxu1 %vm650_vm2, %v3058_v14  ;;  %1707 = vmatprep.mubr.bf16.mxu0 %v4164_v13 }
 0x2fe   : > { %1760 = vmatprep.mubr.bf16.mxu1 %v4164_v13 }
 0x3b7   : > { %v1380_v19 = vpop.f32.mrb[48].mxu0 }
 0x3b8   : > { %v1433_v16 = vpop.f32.mrb[48].mxu1  ;;  %v1381_v57 = vadd.f32 %v1380_v19, %v3654_v53  ;;  %v1382_v15 = vpop.f32.mrb[49].mxu0 }
 0x3b9   : > { %v1434_v33 = vadd.f32 %v1433_v16, %v3654_v53  ;;  %v1435_v46 = vpop.f32.mrb[49].mxu1  ;;  %v1383_v12 = vadd.f32 %v1382_v15, %v3654_v53  ;;  %v1384_v61 = vpop.f32.mrb[50].mxu0 }
 0x3ba   : > { %v1436_v24 = vadd.f32 %v1435_v46, %v3654_v53  ;;  %v1437_v23 = vpop.f32.mrb[50].mxu1  ;;  %v1558_v18 = vmul.f32 0.2, %v1381_v57  ;;  %v1385_v55 = vadd.f32 %v1384_v61, %v3656_v54  ;;  %v1386_v31 = vpop.f32.mrb[51].mxu0 }
 0x3bb   : > { %v1560_v43 = vmul.f32 0.2, %v1434_v33  ;;  %v1438_v14 = vadd.f32 %v1437_v23, %v3656_v54  ;;  %v1439_v6 = vpop.f32.mrb[51].mxu1  ;;  %v1559_v48 = vmul.f32 0.2, %v1383_v12  ;;  %v1387_v52 = vadd.f32 %v1386_v31, %v3656_v54  ;;  %v3668_v61 = vpop.permute.xlu0 %1327 }
 0x3bc   : > { %v1561_v28 = vmul.f32 0.2, %v1436_v24  ;;  %v1440_v0 = vadd.f32 %v1439_v6, %v3656_v54  ;;  %v1566_v60 = vmul.f32 0.2, %v1385_v55  ;;  %v1590_v19 = vmax.f32 %v1381_v57, %v1558_v18 }
 0x3bd   : > { %v1568_v1 = vmul.f32 0.2, %v1438_v14  ;;  %v1567_v50 = vmul.f32 0.2, %v1387_v52  ;;  %v1592_v16 = vmax.f32 %v1434_v33, %v1560_v43  ;;  %v1591_v23 = vmax.f32 %v1383_v12, %v1559_v48 }
 0x3be   : > { %v1569_v44 = vmul.f32 0.2, %v1440_v0  ;;  %v1598_v15 = vmax.f32 %v1385_v55, %v1566_v60  ;;  %v1593_v37 = vmax.f32 %v1436_v24, %v1561_v28 }
 0x3bf   : > { %v1600_v46 = vmax.f32 %v1438_v14, %v1568_v1  ;;  %v1599_v41 = vmax.f32 %v1387_v52, %v1567_v50  ;;  %v1390_v59 = vpop.f32.mrb[52].mxu0 }
 0x3c0   : > { %v1601_v27 = vmax.f32 %v1440_v0, %v1569_v44  ;;  %v1443_v31 = vpop.f32.mrb[52].mxu1  ;;  %v1627_v25 = vpack.c.bf16 %v1598_v15, %v1590_v19  ;;  %v1391_v62 = vadd.f32 %v1390_v59, %v3666_v32  ;;  %v1392_v34 = vpop.f32.mrb[53].mxu0 }
 0x3c1   : > { %v1629_v6 = vpack.c.bf16 %v1600_v46, %v1592_v16  ;;  %v1444_v11 = vadd.f32 %v1443_v31, %v3666_v32  ;;  %v1445_v29 = vpop.f32.mrb[53].mxu1  ;;  %v1393_v57 = vadd.f32 %v1392_v34, %v3666_v32  ;;  %v1394_v18 = vpop.f32.mrb[54].mxu0  ;;  %v1628_v12 = vpack.c.bf16 %v1599_v41, %v1591_v23 }
 0x3c2   : > { %v1446_v33 = vadd.f32 %v1445_v29, %v3666_v32  ;;  %v1447_v43 = vpop.f32.mrb[54].mxu1  ;;  %v1630_v24 = vpack.c.bf16 %v1601_v27, %v1593_v37  ;;  %v1574_v55 = vmul.f32 0.2, %v1391_v62  ;;  %v1395_v48 = vadd.f32 %v1394_v18, %v3668_v61  ;;  %v1396_v52 = vpop.f32.mrb[55].mxu0 }
 0x3c3   : > { %v1576_v14 = vmul.f32 0.2, %v1444_v11  ;;  %v1448_v28 = vadd.f32 %v1447_v43, %v3668_v61  ;;  %v1449_v59 = vpop.f32.mrb[55].mxu1  ;;  %v1575_v0 = vmul.f32 0.2, %v1393_v57  ;;  %v1397_v1 = vadd.f32 %v1396_v52, %v3668_v61  ;;  %1675 = vmatprep.subr.bf16.mxu0 %v1628_v12 }
 0x3c4   : > { %v1577_v60 = vmul.f32 0.2, %v1446_v33  ;;  %v1450_v34 = vadd.f32 %v1449_v59, %v3668_v61  ;;  %1728 = vmatprep.subr.bf16.mxu1 %v1630_v24  ;;  %v1582_v29 = vmul.f32 0.2, %v1395_v48  ;;  %1676 = vmatpush1.bf16.msra.mxu0 %v1627_v25  ;;  %v1606_v37 = vmax.f32 %v1391_v62, %v1574_v55 }
 0x3c5   : > { %v1584_v50 = vmul.f32 0.2, %v1448_v28  ;;  %1729 = vmatpush1.bf16.msra.mxu1 %v1629_v6  ;;  %v1583_v27 = vmul.f32 0.2, %v1397_v1  ;;  %v1608_v44 = vmax.f32 %v1444_v11, %v1576_v14  ;;  %v1607_v15 = vmax.f32 %v1393_v57, %v1575_v0 }
 0x3c6   : > { %v1585_v41 = vmul.f32 0.2, %v1450_v34  ;;  %v1614_v19 = vmax.f32 %v1395_v48, %v1582_v29  ;;  %v1609_v46 = vmax.f32 %v1446_v33, %v1577_v60 }
 0x3c7   : > { %v1616_v16 = vmax.f32 %v1448_v28, %v1584_v50  ;;  %v1615_v23 = vmax.f32 %v1397_v1, %v1583_v27  ;;  %v1486_v18 = vpop.f32.mrb[56].mxu0 }
 0x3c8   : > { %v1617_v31 = vmax.f32 %v1450_v34, %v1585_v41  ;;  %v1539_v43 = vpop.f32.mrb[56].mxu1  ;;  %v1635_v52 = vpack.c.bf16 %v1614_v19, %v1606_v37  ;;  %v1487_v12 = vadd.f32 %v1486_v18, %v3654_v53  ;;  %v1488_v25 = vpop.f32.mrb[57].mxu0 }
 0x3c9   : > { %v1637_v59 = vpack.c.bf16 %v1616_v16, %v1608_v44  ;;  %v1540_v24 = vadd.f32 %v1539_v43, %v3654_v53  ;;  %v1541_v6 = vpop.f32.mrb[57].mxu1  ;;  %v1489_v40 = vadd.f32 %v1488_v25, %v3654_v53  ;;  %v1490_v62 = vpop.f32.mrb[58].mxu0  ;;  %v1636_v57 = vpack.c.bf16 %v1615_v23, %v1607_v15 }
 0x3ca   : > { %v1542_v11 = vadd.f32 %v1541_v6, %v3654_v53  ;;  %v1543_v55 = vpop.f32.mrb[58].mxu1  ;;  %v1638_v33 = vpack.c.bf16 %v1617_v31, %v1609_v46  ;;  %v1562_v14 = vmul.f32 0.2, %v1487_v12  ;;  %v1491_v28 = vadd.f32 %v1490_v62, %v3656_v54  ;;  %v1492_v60 = vpop.f32.mrb[59].mxu0  ;;  %v3689_v53 = vld [vmem:[%s4124_s3 + $0x10] sm:$0xff]  }
 0x3cb   : > { %v1564_v48 = vmul.f32 0.2, %v1540_v24  ;;  %v1544_v0 = vadd.f32 %v1543_v55, %v3656_v54  ;;  %v1545_v1 = vpop.f32.mrb[59].mxu1  ;;  %v1563_v34 = vmul.f32 0.2, %v1489_v40  ;;  %v1493_v50 = vadd.f32 %v1492_v60, %v3656_v54  ;;  %1677 = vmatprep.subr.bf16.mxu0 %v1636_v57 }
 0x3cc   : > { %v1565_v29 = vmul.f32 0.2, %v1542_v11  ;;  %v1546_v27 = vadd.f32 %v1545_v1, %v3656_v54  ;;  %1730 = vmatprep.subr.bf16.mxu1 %v1638_v33  ;;  %v1570_v41 = vmul.f32 0.2, %v1491_v28  ;;  %1678 = vmatpush1.bf16.msra.mxu0 %v1635_v52  ;;  %v1594_v44 = vmax.f32 %v1487_v12, %v1562_v14 }
 0x3cd   : > { %v1572_v37 = vmul.f32 0.2, %v1544_v0  ;;  %1731 = vmatpush1.bf16.msra.mxu1 %v1637_v59  ;;  %v1571_v19 = vmul.f32 0.2, %v1493_v50  ;;  %v1596_v15 = vmax.f32 %v1540_v24, %v1564_v48  ;;  %v1595_v46 = vmax.f32 %v1489_v40, %v1563_v34 }
 0x3ce   : > { %v1573_v16 = vmul.f32 0.2, %v1546_v27  ;;  %v1602_v23 = vmax.f32 %v1491_v28, %v1570_v41  ;;  %v1597_v18 = vmax.f32 %v1542_v11, %v1565_v29 }
 0x3cf   : > { %v1604_v31 = vmax.f32 %v1544_v0, %v1572_v37  ;;  %v1603_v54 = vmax.f32 %v1493_v50, %v1571_v19  ;;  %v1496_v25 = vpop.f32.mrb[60].mxu0  ;;  %2978 = vmatmul.mubr.msk.bf16.vlgmr.msra.gmra.mrb[64].mxu0 %vm650_vm2, %v3689_v53  ;;  %v3060_v37 = vld [vmem:[%s4124_s3 + $0x18] sm:$0xff]  }
 0x3d0   : > { %v1605_v43 = vmax.f32 %v1546_v27, %v1573_v16  ;;  %v1549_v6 = vpop.f32.mrb[60].mxu1  ;;  %2980 = vmatmul.mubr.msk.bf16.vlgmr.msra.gmra.mrb[64].mxu1 %vm650_vm2, %v3689_v53  ;;  %v1631_v52 = vpack.c.bf16 %v1602_v23, %v1594_v44  ;;  %v1497_v12 = vadd.f32 %v1496_v25, %v3666_v32  ;;  %v1498_v40 = vpop.f32.mrb[61].mxu0  ;;  %1717 = vmatprep.mubr.bf16.mxu0 %v4164_v13 }
 0x3d1   : > { %v1633_v59 = vpack.c.bf16 %v1604_v31, %v1596_v15  ;;  %v1550_v24 = vadd.f32 %v1549_v6, %v3666_v32  ;;  %v1551_v62 = vpop.f32.mrb[61].mxu1  ;;  %v1499_v11 = vadd.f32 %v1498_v40, %v3666_v32  ;;  %v1500_v57 = vpop.f32.mrb[62].mxu0  ;;  %v1632_v14 = vpack.c.bf16 %v1603_v54, %v1595_v46  ;;  %1770 = vmatprep.mubr.bf16.mxu1 %v4164_v13 }
 0x3d2   : > { %v1552_v55 = vadd.f32 %v1551_v62, %v3666_v32  ;;  %v1553_v33 = vpop.f32.mrb[62].mxu1  ;;  %v1634_v48 = vpack.c.bf16 %v1605_v43, %v1597_v18  ;;  %v1578_v28 = vmul.f32 0.2, %v1497_v12  ;;  %v1501_v60 = vadd.f32 %v1500_v57, %v3668_v61  ;;  %v1502_v34 = vpop.f32.mrb[63].mxu0 }
 0x3d3   : > { %v1580_v0 = vmul.f32 0.2, %v1550_v24  ;;  %v1554_v1 = vadd.f32 %v1553_v33, %v3668_v61  ;;  %v1555_v29 = vpop.f32.mrb[63].mxu1  ;;  %v1579_v50 = vmul.f32 0.2, %v1499_v11  ;;  %v1503_v41 = vadd.f32 %v1502_v34, %v3668_v61  ;;  %1781 = vmatprep.subr.bf16.mxu0 %v1632_v14  ;;  %v3730_v62 = vpop.permute.xlu0 %1648 }
 0x3d4   : > { %v1581_v27 = vmul.f32 0.2, %v1552_v55  ;;  %v1556_v32 = vadd.f32 %v1555_v29, %v3668_v61  ;;  %1834 = vmatprep.subr.bf16.mxu1 %v1634_v48  ;;  %v1586_v44 = vmul.f32 0.2, %v1501_v60  ;;  %1782 = vmatpush1.bf16.msra.mxu0 %v1631_v52  ;;  %v1610_v16 = vmax.f32 %v1497_v12, %v1578_v28 }
 0x3d5   : > { %v1588_v19 = vmul.f32 0.2, %v1554_v1  ;;  %1835 = vmatpush1.bf16.msra.mxu1 %v1633_v59  ;;  %v1587_v15 = vmul.f32 0.2, %v1503_v41  ;;  %v1612_v23 = vmax.f32 %v1550_v24, %v1580_v0  ;;  %v1611_v31 = vmax.f32 %v1499_v11, %v1579_v50 }
 0x3d6   : > { %v1589_v46 = vmul.f32 0.2, %v1556_v32  ;;  %v1618_v18 = vmax.f32 %v1501_v60, %v1586_v44  ;;  %v1613_v43 = vmax.f32 %v1552_v55, %v1581_v27  ;;  %v3082_v12 = vmov 5  }
 0x3d7   : > { %v1620_v54 = vmax.f32 %v1554_v1, %v1588_v19  ;;  %v1619_v25 = vmax.f32 %v1503_v41, %v1587_v15  ;;  %2979 = vmatmul.mubr.msk.bf16.gmra.mrb[68].mxu0 %vm650_vm2, %v3060_v37  ;;  %3047 = vset.pattern.permute.xlu1 %v3082_v12 }
 0x3d8   : > { %v1621_v61 = vmax.f32 %v1556_v32, %v1589_v46  ;;  %2981 = vmatmul.mubr.msk.bf16.gmra.mrb[68].mxu1 %vm650_vm2, %v3060_v37  ;;  %v1639_v6 = vpack.c.bf16 %v1618_v18, %v1610_v16  ;;  %1813 = vmatprep.mubr.bf16.mxu0 %v4164_v13 }
 0x3d9   : > { %v1641_v40 = vpack.c.bf16 %v1620_v54, %v1612_v23  ;;  %1866 = vmatprep.mubr.bf16.mxu1 %v4164_v13  ;;  %v1640_v52 = vpack.c.bf16 %v1619_v25, %v1611_v31  ;;  %3046 = vset.pattern.permute.xlu0 %v3082_v12 }
 0x3da   : > { %v1642_v59 = vpack.c.bf16 %v1621_v61, %v1613_v43  ;;  %2009 = vperm.xlu1 %3047, %v3639_v26   ;;  %2005 = vperm.xlu0 %3046, %v3633_v38  }
 0x3db   : > { %1783 = vmatprep.subr.bf16.mxu0 %v1640_v52 }
 0x3dc   : > { %1836 = vmatprep.subr.bf16.mxu1 %v1642_v59  ;;  %1784 = vmatpush1.bf16.msra.mxu0 %v1639_v6 }
 0x3dd   : > { %1837 = vmatpush1.bf16.msra.mxu1 %v1641_v40 }
 0x3de   : > { %2013 = vperm.xlu1 %3047, %v3645_v45   ;;  %2017 = vperm.xlu0 %3046, %v3651_v8  }
 0x3df   : > { %2982 = vmatmul.mubr.msk.bf16.vlgmr.msra.gmra.mrb[72].mxu0 %vm650_vm2, %v3689_v53 }
 0x3e0   : > { %2984 = vmatmul.mubr.msk.bf16.vlgmr.msra.gmra.mrb[72].mxu1 %vm650_vm2, %v3689_v53  ;;  %1823 = vmatprep.mubr.bf16.mxu0 %v4164_v13  ;;  %v3726_v53 = vpop.permute.xlu1 %1644 }
 0x3e1   : > { %1876 = vmatprep.mubr.bf16.mxu1 %v4164_v13 }
 0x3e4   : > { %v3728_v24 = vpop.permute.xlu1 %1652 }
 0x3e7   : > { %2983 = vmatmul.mubr.msk.bf16.gmra.mrb[76].mxu0 %vm650_vm2, %v3060_v37 }
 0x3e8   : > { %2985 = vmatmul.mubr.msk.bf16.gmra.mrb[76].mxu1 %vm650_vm2, %v3060_v37  ;;  %2068 = vmatprep.mubr.bf16.mxu0 %v4164_v13  ;;  %v3740_v40 = vpop.permute.xlu1 %1656 }
 0x3e9   : > { %2121 = vmatprep.mubr.bf16.mxu1 %v4164_v13 }
 0x4a2   : > { %v1709_v11 = vpop.f32.mrb[64].mxu0 }
 0x4a3   : > { %v1762_v55 = vpop.f32.mrb[64].mxu1  ;;  %v1710_v57 = vadd.f32 %v1709_v11, %v3726_v53  ;;  %v1711_v14 = vpop.f32.mrb[65].mxu0 }
 0x4a4   : > { %v1763_v33 = vadd.f32 %v1762_v55, %v3726_v53  ;;  %v1764_v48 = vpop.f32.mrb[65].mxu1  ;;  %v1712_v28 = vadd.f32 %v1711_v14, %v3726_v53  ;;  %v1713_v60 = vpop.f32.mrb[66].mxu0 }
 0x4a5   : > { %v1765_v0 = vadd.f32 %v1764_v48, %v3726_v53  ;;  %v1766_v1 = vpop.f32.mrb[66].mxu1  ;;  %v1887_v34 = vmul.f32 0.2, %v1710_v57  ;;  %v1714_v50 = vadd.f32 %v1713_v60, %v3730_v62  ;;  %v1715_v41 = vpop.f32.mrb[67].mxu0 }
 0x4a6   : > { %v1889_v29 = vmul.f32 0.2, %v1763_v33  ;;  %v1767_v27 = vadd.f32 %v1766_v1, %v3730_v62  ;;  %v1768_v32 = vpop.f32.mrb[67].mxu1  ;;  %v1888_v37 = vmul.f32 0.2, %v1712_v28  ;;  %v1716_v19 = vadd.f32 %v1715_v41, %v3730_v62 }
 0x4a7   : > { %v1890_v44 = vmul.f32 0.2, %v1765_v0  ;;  %v1769_v16 = vadd.f32 %v1768_v32, %v3730_v62  ;;  %v1919_v15 = vmax.f32 %v1710_v57, %v1887_v34  ;;  %v1895_v23 = vmul.f32 0.2, %v1714_v50 }
 0x4a8   : > { %v1921_v46 = vmax.f32 %v1763_v33, %v1889_v29  ;;  %v1897_v31 = vmul.f32 0.2, %v1767_v27  ;;  %v1920_v18 = vmax.f32 %v1712_v28, %v1888_v37  ;;  %v1896_v43 = vmul.f32 0.2, %v1716_v19 }
 0x4a9   : > { %v1922_v54 = vmax.f32 %v1765_v0, %v1890_v44  ;;  %v1898_v25 = vmul.f32 0.2, %v1769_v16  ;;  %v1927_v61 = vmax.f32 %v1714_v50, %v1895_v23  ;;  %v3743_v52 = vadd.f32 %v1919_v15, %v3453_v10 }
 0x4aa   : > { %v1929_v6 = vmax.f32 %v1767_v27, %v1897_v31  ;;  %v3746_v59 = vadd.f32 %v1921_v46, %v3456_v30  ;;  %v1928_v12 = vmax.f32 %v1716_v19, %v1896_v43  ;;  %v1719_v11 = vpop.f32.mrb[68].mxu0  ;;  %v3749_v57 = vadd.f32 %v1920_v18, %v3459_v3 }
 0x4ab   : > { %v1772_v55 = vpop.f32.mrb[68].mxu1  ;;  %v1930_v33 = vmax.f32 %v1769_v16, %v1898_v25  ;;  %v1720_v14 = vadd.f32 %v1719_v11, %v3728_v24  ;;  %v1721_v28 = vpop.f32.mrb[69].mxu0  ;;  %v3754_v60 = vadd.f32 %v1922_v54, %v3464_v5  ;;  %v3757_v10 = vadd.f32 %v1927_v61, %v3467_v58 }
 0x4ac   : > { %v1773_v48 = vadd.f32 %v1772_v55, %v3728_v24  ;;  %v1774_v0 = vpop.f32.mrb[69].mxu1  ;;  %v1722_v30 = vadd.f32 %v1721_v28, %v3728_v24  ;;  %v1723_v3 = vpop.f32.mrb[70].mxu0  ;;  %v3764_v29 = vadd.f32 %v1929_v6, %v3474_v20  ;;  %v3767_v50 = vadd.f32 %v1928_v12, %v3477_v7 }
 0x4ad   : > { %v3761_v1 = vadd.f32 %v1774_v0, %v3728_v24  ;;  %v1776_v34 = vpop.f32.mrb[70].mxu1  ;;  %v1903_v27 = vmul.f32 0.2, %v1720_v14  ;;  %v1725_v5 = vpop.f32.mrb[71].mxu0  ;;  %v1724_v44 = vadd.f32 %v1723_v3, %v3740_v40  ;;  %v3773_v16 = vadd.f32 %v1930_v33, %v3483_v35 }
 0x4ae   : > { %v1905_v41 = vmul.f32 0.2, %v1773_v48  ;;  %v1778_v32 = vpop.f32.mrb[71].mxu1  ;;  %v1904_v37 = vmul.f32 0.2, %v1722_v30  ;;  %v1777_v19 = vadd.f32 %v1776_v34, %v3740_v40  ;;  %v1726_v20 = vadd.f32 %v1725_v5, %v3740_v40 }
 0x4af   : > { %v1906_v58 = vmul.f32 0.2, %v3761_v1  ;;  %v1935_v15 = vmax.f32 %v1720_v14, %v1903_v27  ;;  %v1779_v7 = vadd.f32 %v1778_v32, %v3740_v40  ;;  %v1911_v31 = vmul.f32 0.2, %v1724_v44 }
 0x4b0   : > { %v1937_v46 = vmax.f32 %v1773_v48, %v1905_v41  ;;  %v1936_v23 = vmax.f32 %v1722_v30, %v1904_v37  ;;  %v1913_v18 = vmul.f32 0.2, %v1777_v19  ;;  %v1988_v54 = vpack.c.bf16 %v3757_v10, %v3743_v52 }
 0x4b1   : > { %v1990_v43 = vpack.c.bf16 %v3764_v29, %v3746_v59  ;;  %v1912_v25 = vmul.f32 0.2, %v1726_v20  ;;  %v1914_v61 = vmul.f32 0.2, %v1779_v7  ;;  %v3782_v35 = vadd.f32 %v1935_v15, %v3492_v2 }
 0x4b2   : > { %v1938_v6 = vmax.f32 %v3761_v1, %v1906_v58  ;;  %v1943_v12 = vmax.f32 %v1724_v44, %v1911_v31  ;;  %v1945_v11 = vmax.f32 %v1777_v19, %v1913_v18  ;;  %v1815_v55 = vpop.f32.mrb[72].mxu0  ;;  %v1989_v28 = vpack.c.bf16 %v3767_v50, %v3749_v57 }
 0x4b3   : > { %v1868_v33 = vpop.f32.mrb[72].mxu1  ;;  %v1944_v14 = vmax.f32 %v1726_v20, %v1912_v25  ;;  %v1946_v48 = vmax.f32 %v1779_v7, %v1914_v61  ;;  %v1991_v0 = vpack.c.bf16 %v3773_v16, %v3754_v60  ;;  %v1817_v30 = vpop.f32.mrb[73].mxu0  ;;  %v3790_v34 = vadd.f32 %v1937_v46, %v3500_v17 }
 0x4b4   : > { %v1870_v3 = vpop.f32.mrb[73].mxu1  ;;  %v3793_v2 = vadd.f32 %v1936_v23, %v3503_v39  ;;  %v1816_v1 = vadd.f32 %v1815_v55, %v3726_v53  ;;  %v1869_v27 = vadd.f32 %v1868_v33, %v3726_v53  ;;  %v1819_v41 = vpop.f32.mrb[74].mxu0  ;;  %v3798_v32 = vadd.f32 %v1943_v12, %v3508_v47  ;;  %2036 = vmatprep.subr.bf16.mxu0 %v1989_v28 }
 0x4b5   : > { %v1872_v5 = vpop.f32.mrb[74].mxu1  ;;  %v3801_v37 = vadd.f32 %v1945_v11, %v3511_v49  ;;  %2089 = vmatprep.subr.bf16.mxu1 %v1991_v0  ;;  %v1818_v17 = vadd.f32 %v1817_v30, %v3726_v53  ;;  %v1821_v58 = vpop.f32.mrb[75].mxu0  ;;  %v3805_v39 = vadd.f32 %v1944_v14, %v3515_v42  ;;  %v3808_v19 = vadd.f32 %v1946_v48, %v3518_v21 }
 0x4b6   : > { %v1874_v44 = vpop.f32.mrb[75].mxu1  ;;  %2037 = vmatpush1.bf16.msra.mxu0 %v1988_v54  ;;  %2090 = vmatpush1.bf16.msra.mxu1 %v1990_v43  ;;  %v1891_v15 = vmul.f32 0.2, %v1816_v1  ;;  %v1893_v47 = vmul.f32 0.2, %v1869_v27  ;;  %v1871_v49 = vadd.f32 %v1870_v3, %v3726_v53  ;;  %v1820_v7 = vadd.f32 %v1819_v41, %v3730_v62 }
 0x4b7   : > { %v1892_v20 = vmul.f32 0.2, %v1818_v17  ;;  %v1873_v46 = vadd.f32 %v1872_v5, %v3730_v62  ;;  %v1822_v18 = vadd.f32 %v1821_v58, %v3730_v62  ;;  %v1875_v42 = vadd.f32 %v1874_v44, %v3730_v62 }
 0x4b8   : > { %v1923_v23 = vmax.f32 %v1816_v1, %v1891_v15  ;;  %v1925_v31 = vmax.f32 %v1869_v27, %v1893_v47  ;;  %v1894_v21 = vmul.f32 0.2, %v1871_v49  ;;  %v1899_v61 = vmul.f32 0.2, %v1820_v7 }
 0x4b9   : > { %v1924_v25 = vmax.f32 %v1818_v17, %v1892_v20  ;;  %v1901_v54 = vmul.f32 0.2, %v1873_v46  ;;  %v3816_v43 = vadd.f32 %v1938_v6, %v3526_v56  ;;  %v1996_v53 = vpack.c.bf16 %v3798_v32, %v3782_v35 }
 0x4ba   : > { %v1900_v12 = vmul.f32 0.2, %v1822_v18  ;;  %v1902_v11 = vmul.f32 0.2, %v1875_v42  ;;  %v1825_v55 = vpop.f32.mrb[76].mxu0  ;;  %v1998_v14 = vpack.c.bf16 %v3801_v37, %v3790_v34  ;;  %v1926_v48 = vmax.f32 %v1871_v49, %v1894_v21 }
 0x4bb   : > { %v1878_v33 = vpop.f32.mrb[76].mxu1  ;;  %v1931_v28 = vmax.f32 %v1820_v7, %v1899_v61  ;;  %v1933_v62 = vmax.f32 %v1873_v46, %v1901_v54  ;;  %v1827_v0 = vpop.f32.mrb[77].mxu0  ;;  %v3823_v3 = vadd.f32 %v1923_v23, %v3533_v51  ;;  %v1997_v6 = vpack.c.bf16 %v3805_v39, %v3793_v2  ;;  %v4184_v7 = vld [vmem:[#allocation11_spill] sm:$0xff]  ;;  %v4185_v61 = vld [vmem:[#allocation2_spill] sm:$0xff] }
 0x4bc   : > { %v1880_v30 = vpop.f32.mrb[77].mxu1  ;;  %v1932_v56 = vmax.f32 %v1822_v18, %v1900_v12  ;;  %v1999_v1 = vpack.c.bf16 %v3808_v19, %v3816_v43  ;;  %v1829_v27 = vpop.f32.mrb[78].mxu0  ;;  %v3830_v5 = vadd.f32 %v1925_v31, %v3540_v9  ;;  %v3833_v17 = vadd.f32 %v1924_v25, %v3543_v4  ;;  %v3061_v9 = vld [vmem:[%s4123_s2 + $0x20] sm:$0xff]  }
 0x4bd   : > { %v1882_v41 = vpop.f32.mrb[78].mxu1  ;;  %v1934_v58 = vmax.f32 %v1875_v42, %v1902_v11  ;;  %v1826_v44 = vadd.f32 %v1825_v55, %v3728_v24  ;;  %v1831_v51 = vpop.f32.mrb[79].mxu0  ;;  %v3837_v47 = vadd.f32 %v1926_v48, %v3547_v63  ;;  %v3840_v20 = vadd.f32 %v1931_v28, %v3550_v22  ;;  %2038 = vmatprep.subr.bf16.mxu0 %v1997_v6 }
 0x4be   : > { %v1884_v15 = vpop.f32.mrb[79].mxu1  ;;  %2091 = vmatprep.subr.bf16.mxu1 %v1999_v1  ;;  %v1879_v49 = vadd.f32 %v1878_v33, %v3728_v24  ;;  %v3847_v4 = vadd.f32 %v1933_v62, %v3557_v36  ;;  %v3850_v46 = vadd.f32 %v1932_v56, %v4184_v7  ;;  %2039 = vmatpush1.bf16.msra.mxu0 %v1996_v53 }
 0x4bf   : > { %2092 = vmatpush1.bf16.msra.mxu1 %v1998_v14  ;;  %v1828_v63 = vadd.f32 %v1827_v0, %v3728_v24  ;;  %v1907_v22 = vmul.f32 0.2, %v1826_v44  ;;  %v1881_v23 = vadd.f32 %v1880_v30, %v3728_v24  ;;  %v1830_v31 = vadd.f32 %v1829_v27, %v3740_v40  ;;  %v4186_v27 = vld [vmem:[#allocation3_spill] sm:$0xff] }
 0x4c0   : > { %v1883_v18 = vadd.f32 %v1882_v41, %v3740_v40  ;;  %v1909_v42 = vmul.f32 0.2, %v1879_v49  ;;  %v1832_v21 = vadd.f32 %v1831_v51, %v3740_v40  ;;  %v1885_v36 = vadd.f32 %v1884_v15, %v3740_v40  ;;  %v3062_v15 = vld [vmem:[%s4123_s2 + $0x28] sm:$0xff]  }
 0x4c1   : > { %v1908_v25 = vmul.f32 0.2, %v1828_v63  ;;  %v3859_v54 = vadd.f32 %v1934_v58, %v4185_v61  ;;  %v1910_v53 = vmul.f32 0.2, %v1881_v23  ;;  %v1915_v12 = vmul.f32 0.2, %v1830_v31  ;;  %2992 = vmatmul.mubr.msk.bf16.vlgmr.msra.gmra.mrb[80].mxu0 %vm650_vm2, %v3061_v9 }
 0x4c2   : > { %v1917_v11 = vmul.f32 0.2, %v1883_v18  ;;  %2994 = vmatmul.mubr.msk.bf16.vlgmr.msra.gmra.mrb[80].mxu1 %vm650_vm2, %v3061_v9  ;;  %v1992_v24 = vpack.c.bf16 %v3840_v20, %v3823_v3  ;;  %v1916_v33 = vmul.f32 0.2, %v1832_v21  ;;  %v1918_v14 = vmul.f32 0.2, %v1885_v36  ;;  %2078 = vmatprep.mubr.bf16.mxu0 %v4164_v13 }
 0x4c3   : > { %v1940_v55 = vmax.f32 %v1828_v63, %v1908_v25  ;;  %2131 = vmatprep.mubr.bf16.mxu1 %v4164_v13  ;;  %v1939_v40 = vmax.f32 %v1826_v44, %v1907_v22  ;;  %v1942_v48 = vmax.f32 %v1881_v23, %v1910_v53  ;;  %v1947_v28 = vmax.f32 %v1830_v31, %v1915_v12  ;;  %v4188_v58 = vld [vmem:[#allocation4_spill] sm:$0xff]  ;;  %v4192_v63 = vld [vmem:[#allocation5_spill] sm:$0xff]  ;;  %v4194_v23 = vld [vmem:[#allocation7_spill] sm:$0xff] }
 0x4c4   : > { %v1949_v62 = vmax.f32 %v1883_v18, %v1917_v11  ;;  %v1941_v0 = vmax.f32 %v1879_v49, %v1909_v42  ;;  %v1948_v30 = vmax.f32 %v1832_v21, %v1916_v33  ;;  %v1950_v56 = vmax.f32 %v1885_v36, %v1918_v14  ;;  %v4190_v49 = vld [vmem:[#allocation6_spill] sm:$0xff]  ;;  %v4196_v18 = vld [vmem:[#allocation8_spill] sm:$0xff]  ;;  %v4198_v25 = vld [vmem:[#allocation9_spill] sm:$0xff]  ;;  %v3926_v33 = vpop.permute.xlu1 %2009 }
 0x4c5   : > { %v1993_v6 = vpack.c.bf16 %v3850_v46, %v3833_v17  ;;  %v1994_v1 = vpack.c.bf16 %v3847_v4, %v3830_v5  ;;  %v3872_v41 = vadd.f32 %v1940_v55, %v4186_v27  ;;  %v3875_v51 = vadd.f32 %v1947_v28, %v4188_v58  ;;  %v4199_v36 = vld [vmem:[#allocation10_spill] sm:$0xff] }
 0x4c6   : > { %v1995_v44 = vpack.c.bf16 %v3859_v54, %v3837_v47  ;;  %v3883_v7 = vadd.f32 %v1942_v48, %v4190_v49  ;;  %v3886_v22 = vadd.f32 %v1949_v62, %v4192_v63  ;;  %v3889_v31 = vadd.f32 %v1948_v30, %v4194_v23 }
 0x4c7   : > { %4187 = vst [vmem:[#allocation11_spill] sm:$0xff] %v3872_v41  ;;  %4189 = vst [vmem:[#allocation2_spill] sm:$0xff] %v3875_v51  ;;  %v3892_v42 = vadd.f32 %v1950_v56, %v4196_v18  ;;  %2142 = vmatprep.subr.bf16.mxu0 %v1993_v6  ;;  %v3895_v21 = vadd.f32 %v1939_v40, %v4198_v25  ;;  %v3898_v61 = vadd.f32 %v1941_v0, %v4199_v36  ;;  %v3083_v55 = vmov 6  }
 0x4c8   : > { %4191 = vst [vmem:[#allocation3_spill] sm:$0xff] %v3883_v7  ;;  %4193 = vst [vmem:[#allocation4_spill] sm:$0xff] %v3886_v22  ;;  %2195 = vmatprep.subr.bf16.mxu1 %v1995_v44  ;;  %2143 = vmatpush1.bf16.msra.mxu0 %v1992_v24  ;;  %v2001_v53 = vpack.c.bf16 %v3889_v31, %v3872_v41  ;;  %v3936_v25 = vpop.permute.xlu1 %2013 }
 0x4c9   : > { %4195 = vst [vmem:[#allocation6_spill] sm:$0xff] %v3889_v31  ;;  %4197 = vst [vmem:[#allocation5_spill] sm:$0xff] %v3892_v42  ;;  %2196 = vmatpush1.bf16.msra.mxu1 %v1994_v1  ;;  %v2003_v12 = vpack.c.bf16 %v3892_v42, %v3883_v7  ;;  %v2000_v11 = vpack.c.bf16 %v3875_v51, %v3895_v21  ;;  %2993 = vmatmul.mubr.msk.bf16.gmra.mrb[84].mxu0 %vm650_vm2, %v3062_v15 }
 0x4ca   : > { %2995 = vmatmul.mubr.msk.bf16.gmra.mrb[84].mxu1 %vm650_vm2, %v3062_v15  ;;  %v2002_v24 = vpack.c.bf16 %v3886_v22, %v3898_v61  ;;  %2144 = vmatprep.subr.bf16.mxu0 %v2001_v53 }
 0x4cb   : > { %2197 = vmatprep.subr.bf16.mxu1 %v2003_v12  ;;  %2174 = vmatprep.mubr.bf16.mxu0 %v4164_v13 }
 0x4cc   : > { %2145 = vmatpush1.bf16.msra.mxu0 %v2000_v11  ;;  %2227 = vmatprep.mubr.bf16.mxu1 %v4164_v13 }
 0x4cd   : > { %2198 = vmatpush1.bf16.msra.mxu1 %v2002_v24  ;;  %3048 = vset.pattern.permute.xlu1 %v3083_v55 }
 0x4ce   : > { %3049 = vset.pattern.permute.xlu0 %v3083_v55  ;;  %2334 = vperm.xlu1 %3048, %v3633_v38  }
 0x4cf   : > { %2338 = vperm.xlu0 %3049, %v3639_v26  }
 0x4d1   : > { %2996 = vmatmul.mubr.msk.bf16.vlgmr.msra.gmra.mrb[88].mxu0 %vm650_vm2, %v3061_v9 }
 0x4d2   : > { %2998 = vmatmul.mubr.msk.bf16.vlgmr.msra.gmra.mrb[88].mxu1 %vm650_vm2, %v3061_v9  ;;  %2184 = vmatprep.mubr.bf16.mxu0 %v4164_v13  ;;  %v3924_v9 = vpop.permute.xlu0 %2005 }
 0x4d3   : > { %2237 = vmatprep.mubr.bf16.mxu1 %v4164_v13  ;;  %2342 = vperm.xlu1 %3048, %v3645_v45  }
 0x4d7   : > { %2346 = vperm.xlu1 %3048, %v3651_v8  }
 0x4d9   : > { %2997 = vmatmul.mubr.msk.bf16.gmra.mrb[92].mxu0 %vm650_vm2, %v3062_v15 }
 0x4da   : > { %2999 = vmatmul.mubr.msk.bf16.gmra.mrb[92].mxu1 %vm650_vm2, %v3062_v15  ;;  %2397 = vmatprep.mubr.bf16.mxu0 %v4164_v13 }
 0x4db   : > { %2450 = vmatprep.mubr.bf16.mxu1 %v4164_v13 }
 0x594   : > { %v2070_v14 = vpop.f32.mrb[80].mxu0 }
 0x595   : > { %v2123_v40 = vpop.f32.mrb[80].mxu1  ;;  %v2071_v48 = vadd.f32 %v2070_v14, %v3924_v9  ;;  %v2072_v62 = vpop.f32.mrb[81].mxu0 }
 0x596   : > { %v2124_v28 = vadd.f32 %v2123_v40, %v3924_v9  ;;  %v2125_v0 = vpop.f32.mrb[81].mxu1  ;;  %v2073_v38 = vadd.f32 %v2072_v62, %v3924_v9  ;;  %v2074_v30 = vpop.f32.mrb[82].mxu0 }
 0x597   : > { %v2126_v26 = vadd.f32 %v2125_v0, %v3924_v9  ;;  %v2127_v45 = vpop.f32.mrb[82].mxu1  ;;  %v2248_v56 = vmul.f32 0.2, %v2071_v48  ;;  %v2075_v6 = vadd.f32 %v2074_v30, %v3926_v33  ;;  %v2076_v27 = vpop.f32.mrb[83].mxu0 }
 0x598   : > { %v2250_v8 = vmul.f32 0.2, %v2124_v28  ;;  %v2128_v1 = vadd.f32 %v2127_v45, %v3926_v33  ;;  %v2129_v58 = vpop.f32.mrb[83].mxu1  ;;  %v2249_v44 = vmul.f32 0.2, %v2073_v38  ;;  %v2077_v49 = vadd.f32 %v2076_v27, %v3926_v33  ;;  %v3938_v14 = vpop.permute.xlu0 %2017 }
 0x599   : > { %v2251_v15 = vmul.f32 0.2, %v2126_v26  ;;  %v2130_v63 = vadd.f32 %v2129_v58, %v3926_v33  ;;  %v2256_v23 = vmul.f32 0.2, %v2075_v6  ;;  %v2280_v12 = vmax.f32 %v2071_v48, %v2248_v56 }
 0x59a   : > { %v2258_v18 = vmul.f32 0.2, %v2128_v1  ;;  %v2257_v36 = vmul.f32 0.2, %v2077_v49  ;;  %v2282_v11 = vmax.f32 %v2124_v28, %v2250_v8  ;;  %v2281_v40 = vmax.f32 %v2073_v38, %v2249_v44 }
 0x59b   : > { %v2259_v53 = vmul.f32 0.2, %v2130_v63  ;;  %v2288_v24 = vmax.f32 %v2075_v6, %v2256_v23  ;;  %v2283_v62 = vmax.f32 %v2126_v26, %v2251_v15 }
 0x59c   : > { %v2290_v55 = vmax.f32 %v2128_v1, %v2258_v18  ;;  %v2289_v0 = vmax.f32 %v2077_v49, %v2257_v36  ;;  %v2080_v45 = vpop.f32.mrb[84].mxu0 }
 0x59d   : > { %v2291_v30 = vmax.f32 %v2130_v63, %v2259_v53  ;;  %v2133_v27 = vpop.f32.mrb[84].mxu1  ;;  %v2317_v42 = vpack.c.bf16 %v2288_v24, %v2280_v12  ;;  %v2081_v31 = vadd.f32 %v2080_v45, %v3936_v25  ;;  %v2082_v41 = vpop.f32.mrb[85].mxu0 }
 0x59e   : > { %v2319_v58 = vpack.c.bf16 %v2290_v55, %v2282_v11  ;;  %v2134_v7 = vadd.f32 %v2133_v27, %v3936_v25  ;;  %v2135_v22 = vpop.f32.mrb[85].mxu1  ;;  %v2083_v48 = vadd.f32 %v2082_v41, %v3936_v25  ;;  %v2084_v56 = vpop.f32.mrb[86].mxu0  ;;  %v2318_v38 = vpack.c.bf16 %v2289_v0, %v2281_v40 }
 0x59f   : > { %v2136_v28 = vadd.f32 %v2135_v22, %v3936_v25  ;;  %v2137_v8 = vpop.f32.mrb[86].mxu1  ;;  %v2320_v26 = vpack.c.bf16 %v2291_v30, %v2283_v62  ;;  %v2264_v6 = vmul.f32 0.2, %v2081_v31  ;;  %v2085_v44 = vadd.f32 %v2084_v56, %v3938_v14  ;;  %v2086_v49 = vpop.f32.mrb[87].mxu0 }
 0x5a0   : > { %v2266_v1 = vmul.f32 0.2, %v2134_v7  ;;  %v2138_v15 = vadd.f32 %v2137_v8, %v3938_v14  ;;  %v2139_v63 = vpop.f32.mrb[87].mxu1  ;;  %v2265_v23 = vmul.f32 0.2, %v2083_v48  ;;  %v2087_v36 = vadd.f32 %v2086_v49, %v3938_v14  ;;  %2365 = vmatprep.subr.bf16.mxu0 %v2318_v38 }
 0x5a1   : > { %v2267_v18 = vmul.f32 0.2, %v2136_v28  ;;  %v2140_v41 = vadd.f32 %v2139_v63, %v3938_v14  ;;  %2418 = vmatprep.subr.bf16.mxu1 %v2320_v26  ;;  %v2272_v22 = vmul.f32 0.2, %v2085_v44  ;;  %2366 = vmatpush1.bf16.msra.mxu0 %v2317_v42  ;;  %v2296_v24 = vmax.f32 %v2081_v31, %v2264_v6 }
 0x5a2   : > { %v2274_v53 = vmul.f32 0.2, %v2138_v15  ;;  %2419 = vmatpush1.bf16.msra.mxu1 %v2319_v58  ;;  %v2273_v12 = vmul.f32 0.2, %v2087_v36  ;;  %v2298_v55 = vmax.f32 %v2134_v7, %v2266_v1  ;;  %v2297_v0 = vmax.f32 %v2083_v48, %v2265_v23 }
 0x5a3   : > { %v2275_v11 = vmul.f32 0.2, %v2140_v41  ;;  %v2304_v40 = vmax.f32 %v2085_v44, %v2272_v22  ;;  %v2299_v30 = vmax.f32 %v2136_v28, %v2267_v18 }
 0x5a4   : > { %v2306_v62 = vmax.f32 %v2138_v15, %v2274_v53  ;;  %v2305_v45 = vmax.f32 %v2087_v36, %v2273_v12  ;;  %v2176_v56 = vpop.f32.mrb[88].mxu0 }
 0x5a5   : > { %v2307_v27 = vmax.f32 %v2140_v41, %v2275_v11  ;;  %v2229_v8 = vpop.f32.mrb[88].mxu1  ;;  %v2325_v49 = vpack.c.bf16 %v2304_v40, %v2296_v24  ;;  %v2177_v38 = vadd.f32 %v2176_v56, %v3924_v9  ;;  %v2178_v42 = vpop.f32.mrb[89].mxu0 }
 0x5a6   : > { %v2327_v63 = vpack.c.bf16 %v2306_v62, %v2298_v55  ;;  %v2230_v26 = vadd.f32 %v2229_v8, %v3924_v9  ;;  %v2231_v58 = vpop.f32.mrb[89].mxu1  ;;  %v2179_v51 = vadd.f32 %v2178_v42, %v3924_v9  ;;  %v2180_v31 = vpop.f32.mrb[90].mxu0  ;;  %v2326_v48 = vpack.c.bf16 %v2305_v45, %v2297_v0 }
 0x5a7   : > { %v2232_v7 = vadd.f32 %v2231_v58, %v3924_v9  ;;  %v2233_v6 = vpop.f32.mrb[90].mxu1  ;;  %v2328_v28 = vpack.c.bf16 %v2307_v27, %v2299_v30  ;;  %v2252_v1 = vmul.f32 0.2, %v2177_v38  ;;  %v2181_v15 = vadd.f32 %v2180_v31, %v3926_v33  ;;  %v2182_v18 = vpop.f32.mrb[91].mxu0  ;;  %v3959_v9 = vld [vmem:[%s4124_s3 + $0x20] sm:$0xff]  }
 0x5a8   : > { %v2254_v44 = vmul.f32 0.2, %v2230_v26  ;;  %v2234_v23 = vadd.f32 %v2233_v6, %v3926_v33  ;;  %v2235_v36 = vpop.f32.mrb[91].mxu1  ;;  %v2253_v41 = vmul.f32 0.2, %v2179_v51  ;;  %v2183_v53 = vadd.f32 %v2182_v18, %v3926_v33  ;;  %2367 = vmatprep.subr.bf16.mxu0 %v2326_v48 }
 0x5a9   : > { %v2255_v22 = vmul.f32 0.2, %v2232_v7  ;;  %v2236_v12 = vadd.f32 %v2235_v36, %v3926_v33  ;;  %2420 = vmatprep.subr.bf16.mxu1 %v2328_v28  ;;  %v2260_v11 = vmul.f32 0.2, %v2181_v15  ;;  %2368 = vmatpush1.bf16.msra.mxu0 %v2325_v49  ;;  %v2284_v55 = vmax.f32 %v2177_v38, %v2252_v1 }
 0x5aa   : > { %v2262_v24 = vmul.f32 0.2, %v2234_v23  ;;  %2421 = vmatpush1.bf16.msra.mxu1 %v2327_v63  ;;  %v2261_v40 = vmul.f32 0.2, %v2183_v53  ;;  %v2286_v0 = vmax.f32 %v2230_v26, %v2254_v44  ;;  %v2285_v30 = vmax.f32 %v2179_v51, %v2253_v41 }
 0x5ab   : > { %v2263_v62 = vmul.f32 0.2, %v2236_v12  ;;  %v2292_v45 = vmax.f32 %v2181_v15, %v2260_v11  ;;  %v2287_v56 = vmax.f32 %v2232_v7, %v2255_v22 }
 0x5ac   : > { %v2294_v27 = vmax.f32 %v2234_v23, %v2262_v24  ;;  %v2293_v33 = vmax.f32 %v2183_v53, %v2261_v40  ;;  %v2186_v42 = vpop.f32.mrb[92].mxu0  ;;  %3006 = vmatmul.mubr.msk.bf16.vlgmr.msra.gmra.mrb[96].mxu0 %vm650_vm2, %v3959_v9  ;;  %v3064_v24 = vld [vmem:[%s4124_s3 + $0x28] sm:$0xff]  }
 0x5ad   : > { %v2295_v8 = vmax.f32 %v2236_v12, %v2263_v62  ;;  %v2239_v58 = vpop.f32.mrb[92].mxu1  ;;  %3008 = vmatmul.mubr.msk.bf16.vlgmr.msra.gmra.mrb[96].mxu1 %vm650_vm2, %v3959_v9  ;;  %v2321_v49 = vpack.c.bf16 %v2292_v45, %v2284_v55  ;;  %v2187_v38 = vadd.f32 %v2186_v42, %v3936_v25  ;;  %v2188_v51 = vpop.f32.mrb[93].mxu0  ;;  %2407 = vmatprep.mubr.bf16.mxu0 %v4164_v13 }
 0x5ae   : > { %v2323_v63 = vpack.c.bf16 %v2294_v27, %v2286_v0  ;;  %v2240_v26 = vadd.f32 %v2239_v58, %v3936_v25  ;;  %v2241_v31 = vpop.f32.mrb[93].mxu1  ;;  %v2189_v7 = vadd.f32 %v2188_v51, %v3936_v25  ;;  %v2190_v48 = vpop.f32.mrb[94].mxu0  ;;  %v2322_v1 = vpack.c.bf16 %v2293_v33, %v2285_v30  ;;  %2460 = vmatprep.mubr.bf16.mxu1 %v4164_v13 }
 0x5af   : > { %v2242_v6 = vadd.f32 %v2241_v31, %v3936_v25  ;;  %v2243_v28 = vpop.f32.mrb[94].mxu1  ;;  %v2324_v44 = vpack.c.bf16 %v2295_v8, %v2287_v56  ;;  %v2268_v15 = vmul.f32 0.2, %v2187_v38  ;;  %v2191_v18 = vadd.f32 %v2190_v48, %v3938_v14  ;;  %v2192_v41 = vpop.f32.mrb[95].mxu0 }
 0x5b0   : > { %v2270_v23 = vmul.f32 0.2, %v2240_v26  ;;  %v2244_v36 = vadd.f32 %v2243_v28, %v3938_v14  ;;  %v2245_v22 = vpop.f32.mrb[95].mxu1  ;;  %v2269_v53 = vmul.f32 0.2, %v2189_v7  ;;  %v2193_v11 = vadd.f32 %v2192_v41, %v3938_v14  ;;  %2471 = vmatprep.subr.bf16.mxu0 %v2322_v1  ;;  %v3997_v31 = vpop.permute.xlu0 %2338 }
 0x5b1   : > { %v2271_v12 = vmul.f32 0.2, %v2242_v6  ;;  %v2246_v25 = vadd.f32 %v2245_v22, %v3938_v14  ;;  %2524 = vmatprep.subr.bf16.mxu1 %v2324_v44  ;;  %v2276_v55 = vmul.f32 0.2, %v2191_v18  ;;  %2472 = vmatpush1.bf16.msra.mxu0 %v2321_v49  ;;  %v2300_v62 = vmax.f32 %v2187_v38, %v2268_v15  ;;  %v2690_v38 = vld [vmem:[%s4126_s5] sm:$0xff] }
 0x5b2   : > { %v2278_v40 = vmul.f32 0.2, %v2244_v36  ;;  %2525 = vmatpush1.bf16.msra.mxu1 %v2323_v63  ;;  %v2277_v0 = vmul.f32 0.2, %v2193_v11  ;;  %v2302_v45 = vmax.f32 %v2240_v26, %v2270_v23  ;;  %v2301_v27 = vmax.f32 %v2189_v7, %v2269_v53 }
 0x5b3   : > { %v2279_v30 = vmul.f32 0.2, %v2246_v25  ;;  %v2308_v56 = vmax.f32 %v2191_v18, %v2276_v55  ;;  %v2303_v8 = vmax.f32 %v2242_v6, %v2271_v12  ;;  %v3084_v26 = vmov 7  }
 0x5b4   : > { %v2310_v33 = vmax.f32 %v2244_v36, %v2278_v40  ;;  %v2309_v42 = vmax.f32 %v2193_v11, %v2277_v0  ;;  %3007 = vmatmul.mubr.msk.bf16.gmra.mrb[100].mxu0 %vm650_vm2, %v3064_v24  ;;  %3050 = vset.pattern.permute.xlu0 %v3084_v26 }
 0x5b5   : > { %v2311_v14 = vmax.f32 %v2246_v25, %v2279_v30  ;;  %3009 = vmatmul.mubr.msk.bf16.gmra.mrb[100].mxu1 %vm650_vm2, %v3064_v24  ;;  %v2329_v58 = vpack.c.bf16 %v2308_v56, %v2300_v62  ;;  %2503 = vmatprep.mubr.bf16.mxu0 %v4164_v13 }
 0x5b6   : > { %v2331_v51 = vpack.c.bf16 %v2310_v33, %v2302_v45  ;;  %2556 = vmatprep.mubr.bf16.mxu1 %v4164_v13  ;;  %v2330_v49 = vpack.c.bf16 %v2309_v42, %v2301_v27  ;;  %2693 = vperm.xlu0 %3050, %v2690_v38  }
 0x5b7   : > { %v2332_v63 = vpack.c.bf16 %v2311_v14, %v2303_v8 }
 0x5b8   : > { %2473 = vmatprep.subr.bf16.mxu0 %v2330_v49 }
 0x5b9   : > { %2526 = vmatprep.subr.bf16.mxu1 %v2332_v63  ;;  %2474 = vmatpush1.bf16.msra.mxu0 %v2329_v58 }
 0x5ba   : > { %2527 = vmatpush1.bf16.msra.mxu1 %v2331_v51 }
 0x5bc   : > { %3010 = vmatmul.mubr.msk.bf16.vlgmr.msra.gmra.mrb[104].mxu0 %vm650_vm2, %v3959_v9 }
 0x5bd   : > { %3012 = vmatmul.mubr.msk.bf16.vlgmr.msra.gmra.mrb[104].mxu1 %vm650_vm2, %v3959_v9  ;;  %2513 = vmatprep.mubr.bf16.mxu0 %v4164_v13  ;;  %v3995_v9 = vpop.permute.xlu1 %2334 }
 0x5be   : > { %2566 = vmatprep.mubr.bf16.mxu1 %v4164_v13 }
 0x5c1   : > { %v3999_v7 = vpop.permute.xlu1 %2342 }
 0x5c4   : > { %3011 = vmatmul.mubr.msk.bf16.gmra.mrb[108].mxu0 %vm650_vm2, %v3064_v24 }
 0x5c5   : > { %3013 = vmatmul.mubr.msk.bf16.gmra.mrb[108].mxu1 %vm650_vm2, %v3064_v24  ;;  %2731 = vmatprep.mubr.bf16.mxu0 %v4164_v13  ;;  %v4009_v49 = vpop.permute.xlu1 %2346 }
 0x5c6   : > { %2772 = vmatprep.mubr.bf16.mxu1 %v4164_v13 }
 0x67f   : > { %v2399_v6 = vpop.f32.mrb[96].mxu0 }
 0x680   : > { %v2452_v48 = vpop.f32.mrb[96].mxu1  ;;  %v2400_v28 = vadd.f32 %v2399_v6, %v3995_v9  ;;  %v2401_v44 = vpop.f32.mrb[97].mxu0 }
 0x681   : > { %v2453_v1 = vadd.f32 %v2452_v48, %v3995_v9  ;;  %v2454_v15 = vpop.f32.mrb[97].mxu1  ;;  %v2402_v23 = vadd.f32 %v2401_v44, %v3995_v9  ;;  %v2403_v36 = vpop.f32.mrb[98].mxu0 }
 0x682   : > { %v2455_v18 = vadd.f32 %v2454_v15, %v3995_v9  ;;  %v2456_v41 = vpop.f32.mrb[98].mxu1  ;;  %v2577_v22 = vmul.f32 0.2, %v2400_v28  ;;  %v2404_v12 = vadd.f32 %v2403_v36, %v3997_v31  ;;  %v2405_v25 = vpop.f32.mrb[99].mxu0 }
 0x683   : > { %v2579_v53 = vmul.f32 0.2, %v2453_v1  ;;  %v2457_v11 = vadd.f32 %v2456_v41, %v3997_v31  ;;  %v2458_v24 = vpop.f32.mrb[99].mxu1  ;;  %v2578_v55 = vmul.f32 0.2, %v2402_v23  ;;  %v2406_v62 = vadd.f32 %v2405_v25, %v3997_v31 }
 0x684   : > { %v2580_v40 = vmul.f32 0.2, %v2455_v18  ;;  %v2459_v0 = vadd.f32 %v2458_v24, %v3997_v31  ;;  %v2609_v30 = vmax.f32 %v2400_v28, %v2577_v22  ;;  %v2585_v27 = vmul.f32 0.2, %v2404_v12 }
 0x685   : > { %v2611_v45 = vmax.f32 %v2453_v1, %v2579_v53  ;;  %v2587_v56 = vmul.f32 0.2, %v2457_v11  ;;  %v2586_v33 = vmul.f32 0.2, %v2406_v62  ;;  %v2610_v42 = vmax.f32 %v2402_v23, %v2578_v55 }
 0x686   : > { %v2588_v8 = vmul.f32 0.2, %v2459_v0  ;;  %v2612_v14 = vmax.f32 %v2455_v18, %v2580_v40  ;;  %v2617_v58 = vmax.f32 %v2404_v12, %v2585_v27  ;;  %v4012_v63 = vadd.f32 %v2609_v30, %v3743_v52 }
 0x687   : > { %v2619_v51 = vmax.f32 %v2457_v11, %v2587_v56  ;;  %v4015_v38 = vadd.f32 %v2611_v45, %v3746_v59  ;;  %v2618_v26 = vmax.f32 %v2406_v62, %v2586_v33  ;;  %v2409_v48 = vpop.f32.mrb[100].mxu0  ;;  %v2642_v56 = vadd.f32 %v2610_v42, %v3749_v57 }
 0x688   : > { %v2620_v6 = vmax.f32 %v2459_v0, %v2588_v8  ;;  %v2462_v28 = vpop.f32.mrb[100].mxu1  ;;  %v2649_v1 = vadd.f32 %v2617_v58, %v3757_v10  ;;  %v2410_v15 = vadd.f32 %v2409_v48, %v3999_v7  ;;  %v2411_v18 = vpop.f32.mrb[101].mxu0  ;;  %v2644_v33 = vadd.f32 %v2612_v14, %v3754_v60 }
 0x689   : > { %v2651_v44 = vadd.f32 %v2619_v51, %v3764_v29  ;;  %v2463_v23 = vadd.f32 %v2462_v28, %v3999_v7  ;;  %v2464_v36 = vpop.f32.mrb[101].mxu1  ;;  %v2650_v52 = vadd.f32 %v2618_v26, %v3767_v50  ;;  %v4024_v59 = vadd.f32 %v2411_v18, %v3999_v7  ;;  %v2413_v53 = vpop.f32.mrb[102].mxu0 }
 0x68a   : > { %v2652_v41 = vadd.f32 %v2620_v6, %v3773_v16  ;;  %v4027_v22 = vadd.f32 %v2464_v36, %v3999_v7  ;;  %v2466_v10 = vpop.f32.mrb[102].mxu1  ;;  %v2674_v29 = vpack.c.bf16 %v2649_v1, %v4012_v63  ;;  %v2593_v11 = vmul.f32 0.2, %v2410_v15  ;;  %v2415_v24 = vpop.f32.mrb[103].mxu0 }
 0x68b   : > { %v2676_v12 = vpack.c.bf16 %v2651_v44, %v4015_v38  ;;  %v2595_v25 = vmul.f32 0.2, %v2463_v23  ;;  %v2468_v55 = vpop.f32.mrb[103].mxu1  ;;  %v2594_v50 = vmul.f32 0.2, %v4024_v59  ;;  %v2414_v40 = vadd.f32 %v2413_v53, %v4009_v49 }
 0x68c   : > { %v2596_v16 = vmul.f32 0.2, %v4027_v22  ;;  %v2467_v62 = vadd.f32 %v2466_v10, %v4009_v49  ;;  %v2625_v0 = vmax.f32 %v2410_v15, %v2593_v11  ;;  %v2416_v45 = vadd.f32 %v2415_v24, %v4009_v49 }
 0x68d   : > { %v2627_v30 = vmax.f32 %v2463_v23, %v2595_v25  ;;  %v2469_v27 = vadd.f32 %v2468_v55, %v4009_v49  ;;  %v2601_v8 = vmul.f32 0.2, %v2414_v40  ;;  %v2626_v51 = vmax.f32 %v4024_v59, %v2594_v50 }
 0x68e   : > { %v2603_v58 = vmul.f32 0.2, %v2467_v62  ;;  %v2628_v63 = vmax.f32 %v4027_v22, %v2596_v16  ;;  %v2602_v38 = vmul.f32 0.2, %v2416_v45  ;;  %v4042_v6 = vadd.f32 %v2625_v0, %v3782_v35 }
 0x68f   : > { %v2604_v26 = vmul.f32 0.2, %v2469_v27  ;;  %v4045_v48 = vadd.f32 %v2627_v30, %v3790_v34  ;;  %v2633_v28 = vmax.f32 %v2414_v40, %v2601_v8  ;;  %v2505_v44 = vpop.f32.mrb[104].mxu0  ;;  %v2675_v14 = vpack.c.bf16 %v2650_v52, %v2642_v56 }
 0x690   : > { %v2635_v1 = vmax.f32 %v2467_v62, %v2603_v58  ;;  %v2558_v57 = vpop.f32.mrb[104].mxu1  ;;  %v2634_v42 = vmax.f32 %v2416_v45, %v2602_v38  ;;  %v2677_v15 = vpack.c.bf16 %v2652_v41, %v2644_v33  ;;  %v2507_v23 = vpop.f32.mrb[105].mxu0  ;;  %v2506_v35 = vadd.f32 %v2505_v44, %v3995_v9 }
 0x691   : > { %v2636_v60 = vmax.f32 %v2469_v27, %v2604_v26  ;;  %v2560_v18 = vpop.f32.mrb[105].mxu1  ;;  %v2665_v36 = vadd.f32 %v2633_v28, %v3798_v32  ;;  %v2559_v22 = vadd.f32 %v2558_v57, %v3995_v9  ;;  %v2509_v34 = vpop.f32.mrb[106].mxu0  ;;  %2699 = vmatprep.subr.bf16.mxu0 %v2675_v14  ;;  %v4054_v52 = vadd.f32 %v2507_v23, %v3995_v9 }
 0x692   : > { %v2667_v59 = vadd.f32 %v2635_v1, %v3801_v37  ;;  %v2562_v53 = vpop.f32.mrb[106].mxu1  ;;  %v2666_v10 = vadd.f32 %v2634_v42, %v3805_v39  ;;  %2740 = vmatprep.subr.bf16.mxu1 %v2677_v15  ;;  %v2511_v41 = vpop.f32.mrb[107].mxu0  ;;  %2700 = vmatpush1.bf16.msra.mxu0 %v2674_v29  ;;  %v2581_v24 = vmul.f32 0.2, %v2506_v35  ;;  %v4062_v39 = vadd.f32 %v2560_v18, %v3995_v9 }
 0x693   : > { %v2668_v11 = vadd.f32 %v2636_v60, %v3808_v19  ;;  %v2564_v25 = vpop.f32.mrb[107].mxu1  ;;  %v2682_v32 = vpack.c.bf16 %v2665_v36, %v4042_v6  ;;  %2741 = vmatpush1.bf16.msra.mxu1 %v2676_v12  ;;  %v2583_v55 = vmul.f32 0.2, %v2559_v22  ;;  %v4059_v50 = vmul.f32 0.2, %v4054_v52 }
 0x694   : > { %v2684_v37 = vpack.c.bf16 %v2667_v59, %v4045_v48  ;;  %v2510_v19 = vadd.f32 %v2509_v34, %v3997_v31  ;;  %v2563_v16 = vadd.f32 %v2562_v53, %v3997_v31  ;;  %v2613_v40 = vmax.f32 %v2506_v35, %v2581_v24 }
 0x695   : > { %v2615_v62 = vmax.f32 %v2559_v22, %v2583_v55  ;;  %v2512_v0 = vadd.f32 %v2511_v41, %v3997_v31  ;;  %v2565_v30 = vadd.f32 %v2564_v25, %v3997_v31  ;;  %v2658_v29 = vadd.f32 %v2626_v51, %v3793_v2  ;;  %v2673_v22 = vld [vmem:[%s4125_s4] sm:$0xf] }
 0x696   : > { %v2584_v12 = vmul.f32 0.2, %v4062_v39  ;;  %v2589_v45 = vmul.f32 0.2, %v2510_v19  ;;  %v2591_v27 = vmul.f32 0.2, %v2563_v16  ;;  %v2660_v56 = vadd.f32 %v2628_v63, %v3816_v43 }
 0x697   : > { %v2614_v9 = vmax.f32 %v4054_v52, %v4059_v50  ;;  %v2590_v33 = vmul.f32 0.2, %v2512_v0  ;;  %v2592_v8 = vmul.f32 0.2, %v2565_v30  ;;  %v2515_v58 = vpop.f32.mrb[108].mxu0  ;;  %v4074_v26 = vadd.f32 %v2613_v40, %v3823_v3 }
 0x698   : > { %v2568_v38 = vpop.f32.mrb[108].mxu1  ;;  %v4077_v31 = vadd.f32 %v2615_v62, %v3830_v5  ;;  %v2621_v2 = vmax.f32 %v2510_v19, %v2589_v45  ;;  %v2623_v51 = vmax.f32 %v2563_v16, %v2591_v27  ;;  %v2517_v6 = vpop.f32.mrb[109].mxu0  ;;  %v2683_v43 = vpack.c.bf16 %v2666_v10, %v2658_v29  ;;  %v4201_v27 = vld [vmem:[#allocation4_spill] sm:$0xff] }
 0x699   : > { %v2570_v48 = vpop.f32.mrb[109].mxu1  ;;  %v2622_v28 = vmax.f32 %v2512_v0, %v2590_v33  ;;  %v2624_v1 = vmax.f32 %v2565_v30, %v2592_v8  ;;  %v2685_v63 = vpack.c.bf16 %v2668_v11, %v2660_v56  ;;  %v2519_v44 = vpop.f32.mrb[110].mxu0  ;;  %v2616_v42 = vmax.f32 %v4062_v39, %v2584_v12  ;;  %v4202_v33 = vld [vmem:[#allocation11_spill] sm:$0xff] }
 0x69a   : > { %v2572_v57 = vpop.f32.mrb[110].mxu1  ;;  %v2653_v60 = vadd.f32 %v2621_v2, %v3840_v20  ;;  %v2655_v3 = vadd.f32 %v2623_v51, %v3847_v4  ;;  %v2516_v14 = vadd.f32 %v2515_v58, %v3999_v7  ;;  %v2521_v5 = vpop.f32.mrb[111].mxu0  ;;  %2701 = vmatprep.subr.bf16.mxu0 %v2683_v43  ;;  %v2569_v36 = vadd.f32 %v2568_v38, %v3999_v7 }
 0x69b   : > { %v2574_v15 = vpop.f32.mrb[111].mxu1  ;;  %v2654_v23 = vadd.f32 %v2622_v28, %v3850_v46  ;;  %v2656_v18 = vadd.f32 %v2624_v1, %v3859_v54  ;;  %2742 = vmatprep.subr.bf16.mxu1 %v2685_v63  ;;  %2702 = vmatpush1.bf16.msra.mxu0 %v2682_v32  ;;  %v2518_v4 = vadd.f32 %v2517_v6, %v3999_v7  ;;  %v2694_v6 = vpop.permute.xlu0 %2693 }
 0x69c   : > { %v2678_v59 = vpack.c.bf16 %v2653_v60, %v4074_v26  ;;  %v2680_v35 = vpack.c.bf16 %v2655_v3, %v4077_v31  ;;  %2743 = vmatpush1.bf16.msra.mxu1 %v2684_v37  ;;  %v2597_v20 = vmul.f32 0.2, %v2516_v14  ;;  %v2599_v46 = vmul.f32 0.2, %v2569_v36  ;;  %v4205_v26 = vld [vmem:[#allocation5_spill] sm:$0xff] }
 0x69d   : > { %v2571_v54 = vadd.f32 %v2570_v48, %v3999_v7  ;;  %v2520_v34 = vadd.f32 %v2519_v44, %v4009_v49  ;;  %v2573_v53 = vadd.f32 %v2572_v57, %v4009_v49  ;;  %v2598_v11 = vmul.f32 0.2, %v2518_v4 }
 0x69e   : > { %v2629_v10 = vmax.f32 %v2516_v14, %v2597_v20  ;;  %v2522_v52 = vadd.f32 %v2521_v5, %v4009_v49  ;;  %v2575_v41 = vadd.f32 %v2574_v15, %v4009_v49  ;;  %v2631_v25 = vmax.f32 %v2569_v36, %v2599_v46  ;;  %3014 = vmatmul.mubr.msk.bf16.vlgmr.msra.gmra.mrb[112].mxu0 %vm650_vm2, %v2673_v22 }
 0x69f   : > { %v2600_v32 = vmul.f32 0.2, %v2571_v54  ;;  %v2605_v37 = vmul.f32 0.2, %v2520_v34  ;;  %v2607_v24 = vmul.f32 0.2, %v2573_v53  ;;  %3015 = vmatmul.mubr.msk.bf16.vlgmr.msra.gmra.mrb[112].mxu1 %vm650_vm2, %v2673_v22  ;;  %v2646_v7 = vadd.f32 %v2614_v9, %v3833_v17  ;;  %2813 = vmatprep.mubr.bf16.mxu0 %v4164_v13 }
 0x6a0   : > { %v2630_v55 = vmax.f32 %v2518_v4, %v2598_v11  ;;  %v2606_v50 = vmul.f32 0.2, %v2522_v52  ;;  %v2608_v39 = vmul.f32 0.2, %v2575_v41  ;;  %2854 = vmatprep.mubr.bf16.mxu1 %v4164_v13  ;;  %v2648_v19 = vadd.f32 %v2616_v42, %v3837_v47  ;;  %v4200_v17 = vld [vmem:[#allocation2_spill] sm:$0xff]  ;;  %v4203_v13 = vld [vmem:[#allocation3_spill] sm:$0xff] }
 0x6a1   : > { %v2632_v49 = vmax.f32 %v2571_v54, %v2600_v32  ;;  %v2637_v16 = vmax.f32 %v2520_v34, %v2605_v37  ;;  %v2639_v40 = vmax.f32 %v2573_v53, %v2607_v24  ;;  %v2661_v62 = vadd.f32 %v2629_v10, %v3895_v21  ;;  %v4204_v47 = vld [vmem:[#allocation6_spill] sm:$0xff] }
 0x6a2   : > { %v2638_v0 = vmax.f32 %v2522_v52, %v2606_v50  ;;  %v2640_v30 = vmax.f32 %v2575_v41, %v2608_v39  ;;  %v2679_v29 = vpack.c.bf16 %v2654_v23, %v2646_v7  ;;  %v2663_v12 = vadd.f32 %v2631_v25, %v3898_v61 }
 0x6a3   : > { %v2669_v45 = vadd.f32 %v2637_v16, %v4200_v17  ;;  %v2671_v56 = vadd.f32 %v2639_v40, %v4201_v27  ;;  %v2681_v9 = vpack.c.bf16 %v2656_v18, %v2648_v19  ;;  %v2662_v8 = vadd.f32 %v2630_v55, %v4202_v33 }
 0x6a4   : > { %v2664_v58 = vadd.f32 %v2632_v49, %v4203_v13  ;;  %v2670_v38 = vadd.f32 %v2638_v0, %v4204_v47  ;;  %v2672_v31 = vadd.f32 %v2640_v30, %v4205_v26  ;;  %2781 = vmatprep.subr.bf16.mxu0 %v2679_v29 }
 0x6a5   : > { %v2686_v21 = vpack.c.bf16 %v2669_v45, %v2661_v62  ;;  %v2688_v2 = vpack.c.bf16 %v2671_v56, %v2663_v12  ;;  %2822 = vmatprep.subr.bf16.mxu1 %v2681_v9  ;;  %2782 = vmatpush1.bf16.msra.mxu0 %v2678_v59 }
 0x6a6   : > { %2823 = vmatpush1.bf16.msra.mxu1 %v2680_v35  ;;  %v2687_v61 = vpack.c.bf16 %v2670_v38, %v2662_v8  ;;  %v2689_v51 = vpack.c.bf16 %v2672_v31, %v2664_v58 }
 0x6a8   : > { %2783 = vmatprep.subr.bf16.mxu0 %v2687_v61  ;;  %2824 = vmatprep.subr.bf16.mxu1 %v2689_v51 }
 0x6a9   : > { %2784 = vmatpush1.bf16.msra.mxu0 %v2686_v21 }
 0x6aa   : > { %2825 = vmatpush1.bf16.msra.mxu1 %v2688_v2 }
 0x6ac   : > { %3016 = vmatmul.mubr.msk.bf16.vlgmr.msra.gmra.mrb[116].mxu0 %vm650_vm2, %v2673_v22 }
 0x6ad   : > { %3017 = vmatmul.mubr.msk.bf16.vlgmr.msra.gmra.mrb[116].mxu1 %vm650_vm2, %v2673_v22 }
 0x771   : > { %v2733_v48 = vpop.f32.mrb[112].mxu0 }
 0x772   : > { %v2774_v28 = vpop.f32.mrb[112].mxu1  ;;  %v2735_v1 = vpop.f32.mrb[113].mxu0  ;;  %v2734_v63 = vadd.f32 %v2733_v48, %v2694_v6 }
 0x773   : > { %v2776_v43 = vpop.f32.mrb[113].mxu1  ;;  %v2775_v44 = vadd.f32 %v2774_v28, %v2694_v6  ;;  %v2737_v57 = vpop.f32.mrb[114].mxu0  ;;  %v2736_v60 = vadd.f32 %v2735_v1, %v2694_v6 }
 0x774   : > { %v2778_v42 = vpop.f32.mrb[114].mxu1  ;;  %v2777_v3 = vadd.f32 %v2776_v43, %v2694_v6  ;;  %2863 = vst [vmem:[%s231_s10] sm:$0xff] %v2734_v63  ;;  %v2738_v14 = vpop.f32.mrb[115].mxu0 }
 0x775   : > { %2865 = vst [vmem:[%s231_s10 + $0x10] sm:$0xff] %v2775_v44  ;;  %v2779_v5 = vpop.f32.mrb[115].mxu1  ;;  %2864 = vst [vmem:[%s231_s10 + $0x8] sm:$0xff] %v2736_v60 }
 0x776   : > { %2866 = vst [vmem:[%s231_s10 + $0x18] sm:$0xff] %v2777_v3 }
 0x77f   : > { %v2815_v15 = vpop.f32.mrb[116].mxu0 }
 0x780   : > { %v2816_v23 = vadd.f32 %v2815_v15, %v2694_v6  ;;  %v2856_v18 = vpop.f32.mrb[116].mxu1  ;;  %v2817_v36 = vpop.f32.mrb[117].mxu0 }
 0x781   : > { %v2857_v59 = vadd.f32 %v2856_v18, %v2694_v6  ;;  %v2818_v35 = vadd.f32 %v2817_v36, %v2694_v6  ;;  %v2858_v20 = vpop.f32.mrb[117].mxu1  ;;  %v2819_v4 = vpop.f32.mrb[118].mxu0 }
 0x782   : > { %2867 = vst [vmem:[%s231_s10 + $0x20] sm:$0xff] %v2816_v23  ;;  %v2859_v22 = vadd.f32 %v2858_v20, %v2694_v6  ;;  %v2860_v46 = vpop.f32.mrb[118].mxu1  ;;  %v2820_v54 = vpop.f32.mrb[119].mxu0 }
 0x783   : > { %2869 = vst [vmem:[%s231_s10 + $0x30] sm:$0xff] %v2857_v59  ;;  %2868 = vst [vmem:[%s231_s10 + $0x28] sm:$0xff] %v2818_v35  ;;  %v2861_v34 = vpop.f32.mrb[119].mxu1 }
 0x784   : > { %2870 = vst [vmem:[%s231_s10 + $0x38] sm:$0xff] %v2859_v22 }
 0x785 PF: > { %s16_s21 = sadd.s32 1, %s3075_s21  }
 0x786   : > { %p13_p4 = scmp.ge.s32.totalorder %s16_s21, 4  }
 0x788   :  { %15 = sbr.rel (!%p13_p4) target bundleno = 1 (0x1), region = 76 }

// kernel: smoothnet_forward.1
= control target key start
LH: loop header
LB: loop body
LE: loop exit
PB: predicated region body
PF: predicated region fallthrough
CT: control target
= control target key end

     0   :  { %s3120_s21 = smov 0   ;;  %s4121_s0 = inlined_call_operand.vmem [shape: f32[23,128], index: 0, kind: input, shape index: {}]   ;;  %s4122_s1 = inlined_call_operand.vmem [shape: bf16[32,8], index: 1, kind: input, shape index: {}]   ;;  %s4123_s2 = inlined_call_operand.vmem [shape: bf16[3,32,32], index: 2, kind: input, shape index: {}]   ;;  %s4124_s3 = inlined_call_operand.vmem [shape: bf16[3,32,32], index: 3, kind: input, shape index: {}]   ;;  %s4125_s4 = inlined_call_operand.vmem [shape: bf16[8,32], index: 4, kind: input, shape index: {}]   ;;  %s4126_s5 = inlined_call_operand.vmem [shape: f32[32,8], index: 5, kind: input, shape index: {}]   ;;  %s4127_s6 = inlined_call_operand.vmem [shape: f32[8,2048], index: 6, kind: output, shape index: {}]  }
   0x1 LB: > { %s2917_s22 = sadd.s32 4294967295, %s3075_s21   ;;  %p2920_p0 = scmp.ge.s32.totalorder %s3075_s21, 1  ;;  %s3075_s21 = sphi %s3120_s21, %s16_s21  }
   0x2   : > { %p202_p1 = scmp.lt.s32.totalorder %s3075_s21, 3 }
   0x4   : > { %p203_p2 = pnand %p2920_p0, %p202_p1 }
   0x6   : > { %206 = sbr.rel (%p203_p2) target bundleno = 1925 (0x785), region = 44 }
   0xd   : > { %s3128_s23 = sshll.u32 %s2917_s22, 3  ;;  %v4128_v0 = vmov 0   ;;  %vm304_vm0 = vcmask 1043456   ;;  %v3141_v4 = vld [vmem:[%s4126_s5] sm:$0xff]  ;;  %v3146_v5 = vld [vmem:[%s4126_s5 + $0x8] sm:$0xff]  ;;  %v3151_v6 = vld [vmem:[%s4126_s5 + $0x10] sm:$0xff] }
   0xe   : > { %s235_s26 = scalar_lea.vmem %s4121_s0, %s3128_s23  ;;  %360 = vmatprep.mubr.bf16.mxu0 %v4128_v0  ;;  %413 = vmatprep.mubr.bf16.mxu1 %v4128_v0  ;;  %vm297_vm1 = vcmask 64512   ;;  %v3158_v7 = vld [vmem:[%s4126_s5 + $0x18] sm:$0xff]  ;;  %v3051_v24 = vld [vmem:[%s4122_s1] sm:$0xff]   ;;  %v3052_v29 = vld [vmem:[%s4122_s1 + $0x8] sm:$0xff]   ;;  %v3078_v30 = vmov 1   ;;  %vm650_vm2 = vcmask 261120  }
   0xf   : > { %v236_v1 = vld [vmem:[%s235_s26] sm:$0xff]  ;;  %v237_v2 = vld [vmem:[%s235_s26 + $0x8] sm:$0x7f]  ;;  %3036 = vset.pattern.permute.xlu0 %v4128_v0  ;;  %3037 = vset.pattern.permute.xlu1 %v4128_v0  ;;  %p228_p3 = scmp.lt.s32.totalorder %s3128_s23, 15 }
  0x10   : > { %v238_v3 = vpack.c.bf16 %v237_v2, %v236_v1  ;;  %269 = vperm.xlu0 %3036, %v3141_v4   ;;  %279 = vperm.xlu1 %3037, %v3151_v6  }
  0x11   : > { %s4207_s23 = smov (!%p228_p3, %s3128_s23), 15 }
  0x12   : > { %v240_v8 = vshrl.u32 %v238_v3, 16  ;;  %v242_v9 = vshll.u32 %v238_v3, 16  ;;  %v305_v10 = vsel %vm304_vm0, %v238_v3, 0  ;;  %v247_v11 = vrot.slane %v238_v3, 1  ;;  %s2922_s7 = sshll.u32 %s4207_s23, 3 }
  0x13   : > { %v251_v12 = vrot.slane %v238_v3, 2  ;;  %v255_v13 = vrot.slane %v238_v3, 3  ;;  %s231_s10 = scalar_lea.vmem %s4127_s6, %s2922_s7 }
  0x14   : > { %v244_v14 = vrot.slane %v242_v9, 1  ;;  %v248_v15 = vrot.slane %v240_v8, 1  ;;  %v249_v16 = vrot.slane %v242_v9, 2  ;;  %v311_v17 = vsel %vm304_vm0, %v247_v11, 0  ;;  %274 = vperm.xlu0 %3036, %v3146_v5   ;;  %284 = vperm.xlu1 %3037, %v3158_v7  }
  0x15   : > { %v252_v18 = vrot.slane %v240_v8, 2  ;;  %v253_v19 = vrot.slane %v242_v9, 3  ;;  %v256_v20 = vrot.slane %v240_v8, 3  ;;  %v257_v21 = vrot.slane %v242_v9, 4 }
  0x16   : > { %v245_v22 = vor.u32 %v244_v14, %v240_v8  ;;  %v250_v23 = vor.u32 %v249_v16, %v248_v15  ;;  %v317_v25 = vsel %vm304_vm0, %v251_v12, 0  ;;  %v323_v26 = vsel %vm304_vm0, %v255_v13, 0 }
  0x17   : > { %v254_v27 = vor.u32 %v253_v19, %v252_v18  ;;  %v258_v28 = vor.u32 %v257_v21, %v256_v20 }
  0x18   : > { %2926 = vmatprep.subr.msk.bf16.mxu0 %vm304_vm0, %v245_v22  ;;  %2929 = vmatprep.subr.msk.bf16.mxu1 %vm304_vm0, %v250_v23 }
  0x19   : > { %329 = vmatpush1.bf16.msra.mxu0 %v305_v10  ;;  %382 = vmatpush1.bf16.msra.mxu1 %v311_v17 }
  0x1a   : > { %2932 = vmatprep.subr.msk.bf16.mxu0 %vm304_vm0, %v254_v27  ;;  %2935 = vmatprep.subr.msk.bf16.mxu1 %vm304_vm0, %v258_v28 }
  0x1b   : > { %3039 = vset.pattern.permute.xlu1 %v3078_v30  ;;  %3038 = vset.pattern.permute.xlu0 %v3078_v30 }
  0x1c   : > { %2927 = vmatmul.mubr.msk.bf16.vlgmr.msra.gmra.mrb[0].mxu0 %vm297_vm1, %v3051_v24  ;;  %2930 = vmatmul.mubr.msk.bf16.vlgmr.msra.gmra.mrb[0].mxu1 %vm297_vm1, %v3051_v24 }
  0x1d   : > { %435 = vmatpush1.bf16.msra.mxu0 %v317_v25  ;;  %488 = vmatpush1.bf16.msra.mxu1 %v323_v26 }
  0x1e   : > { %370 = vmatprep.mubr.bf16.mxu0 %v4128_v0  ;;  %423 = vmatprep.mubr.bf16.mxu1 %v4128_v0 }
  0x1f   : > { %629 = vperm.xlu1 %3039, %v3146_v5   ;;  %625 = vperm.xlu0 %3038, %v3141_v4  }
  0x23   : > { %633 = vperm.xlu1 %3039, %v3151_v6   ;;  %637 = vperm.xlu0 %3038, %v3158_v7  }
  0x24   : > { %2928 = vmatmul.mubr.msk.bf16.gmra.mrb[4].mxu0 %vm297_vm1, %v3052_v29  ;;  %2931 = vmatmul.mubr.msk.bf16.gmra.mrb[4].mxu1 %vm297_vm1, %v3052_v29 }
  0x25   : > { %466 = vmatprep.mubr.bf16.mxu0 %v4128_v0  ;;  %519 = vmatprep.mubr.bf16.mxu1 %v4128_v0 }
  0x2c   : > { %2933 = vmatmul.mubr.msk.bf16.vlgmr.msra.gmra.mrb[8].mxu0 %vm297_vm1, %v3051_v24  ;;  %2936 = vmatmul.mubr.msk.bf16.vlgmr.msra.gmra.mrb[8].mxu1 %vm297_vm1, %v3051_v24 }
  0x2d   : > { %476 = vmatprep.mubr.bf16.mxu0 %v4128_v0  ;;  %529 = vmatprep.mubr.bf16.mxu1 %v4128_v0 }
  0x34   : > { %2934 = vmatmul.mubr.msk.bf16.gmra.mrb[12].mxu0 %vm297_vm1, %v3052_v29  ;;  %2937 = vmatmul.mubr.msk.bf16.gmra.mrb[12].mxu1 %vm297_vm1, %v3052_v29 }
  0x35   : > { %689 = vmatprep.mubr.bf16.mxu0 %v4128_v0  ;;  %742 = vmatprep.mubr.bf16.mxu1 %v4128_v0 }
  0x8f   : > { %v3196_v31 = vpop.permute.xlu0 %269  ;;  %v3200_v33 = vpop.permute.xlu1 %279 }
  0x93   : > { %v3198_v32 = vpop.permute.xlu0 %274  ;;  %v3216_v61 = vpop.permute.xlu1 %284 }
  0xef   : > { %v362_v34 = vpop.f32.mrb[0].mxu0  ;;  %v415_v35 = vpop.f32.mrb[0].mxu1 }
  0xf0   : > { %v363_v36 = vadd.f32 %v362_v34, %v3196_v31  ;;  %v416_v37 = vadd.f32 %v415_v35, %v3196_v31  ;;  %v364_v38 = vpop.f32.mrb[1].mxu0  ;;  %v417_v39 = vpop.f32.mrb[1].mxu1 }
  0xf1   : > { %v365_v40 = vadd.f32 %v364_v38, %v3196_v31  ;;  %v418_v41 = vadd.f32 %v417_v39, %v3196_v31  ;;  %v366_v42 = vpop.f32.mrb[2].mxu0  ;;  %v419_v43 = vpop.f32.mrb[2].mxu1 }
  0xf2   : > { %v540_v44 = vmul.f32 0.1, %v363_v36  ;;  %v367_v45 = vadd.f32 %v366_v42, %v3198_v32  ;;  %v420_v46 = vadd.f32 %v419_v43, %v3198_v32  ;;  %v368_v47 = vpop.f32.mrb[3].mxu0  ;;  %v421_v48 = vpop.f32.mrb[3].mxu1  ;;  %v542_v53 = vmul.f32 0.1, %v416_v37 }
  0xf3   : > { %v541_v49 = vmul.f32 0.1, %v365_v40  ;;  %v543_v50 = vmul.f32 0.1, %v418_v41  ;;  %v369_v51 = vadd.f32 %v368_v47, %v3198_v32  ;;  %v422_v52 = vadd.f32 %v421_v48, %v3198_v32 }
  0xf4   : > { %v548_v54 = vmul.f32 0.1, %v367_v45  ;;  %v550_v55 = vmul.f32 0.1, %v420_v46  ;;  %v3210_v58 = vmax.f32 %v363_v36, %v540_v44  ;;  %v3226_v9 = vmax.f32 %v416_v37, %v542_v53 }
  0xf5   : > { %v549_v56 = vmul.f32 0.1, %v369_v51  ;;  %v551_v57 = vmul.f32 0.1, %v422_v52  ;;  %v3218_v62 = vmax.f32 %v365_v40, %v541_v49  ;;  %v3220_v63 = vmax.f32 %v418_v41, %v543_v50 }
  0xf6   : > { %v3212_v59 = vmax.f32 %v367_v45, %v548_v54  ;;  %v3214_v60 = vmax.f32 %v420_v46, %v550_v55 }
  0xf7   : > { %v3222_v1 = vmax.f32 %v369_v51, %v549_v56  ;;  %v3224_v2 = vmax.f32 %v422_v52, %v551_v57  ;;  %v372_v3 = vpop.f32.mrb[4].mxu0  ;;  %v425_v8 = vpop.f32.mrb[4].mxu1 }
  0xf8   : > { %v608_v10 = vpack.c.bf16 %v3212_v59, %v3210_v58  ;;  %v373_v11 = vadd.f32 %v372_v3, %v3200_v33  ;;  %v426_v12 = vadd.f32 %v425_v8, %v3200_v33  ;;  %v374_v13 = vpop.f32.mrb[5].mxu0  ;;  %v427_v14 = vpop.f32.mrb[5].mxu1  ;;  %v610_v21 = vpack.c.bf16 %v3214_v60, %v3226_v9 }
  0xf9   : > { %v375_v15 = vadd.f32 %v374_v13, %v3200_v33  ;;  %v428_v16 = vadd.f32 %v427_v14, %v3200_v33  ;;  %v376_v17 = vpop.f32.mrb[6].mxu0  ;;  %v429_v18 = vpop.f32.mrb[6].mxu1  ;;  %v609_v19 = vpack.c.bf16 %v3222_v1, %v3218_v62  ;;  %v611_v20 = vpack.c.bf16 %v3224_v2, %v3220_v63 }
  0xfa   : > { %v556_v22 = vmul.f32 0.1, %v373_v11  ;;  %v377_v23 = vadd.f32 %v376_v17, %v3216_v61  ;;  %v430_v24 = vadd.f32 %v429_v18, %v3216_v61  ;;  %v378_v25 = vpop.f32.mrb[7].mxu0  ;;  %v431_v26 = vpop.f32.mrb[7].mxu1  ;;  %v558_v34 = vmul.f32 0.1, %v426_v12 }
  0xfb   : > { %v557_v27 = vmul.f32 0.1, %v375_v15  ;;  %v559_v28 = vmul.f32 0.1, %v428_v16  ;;  %v379_v29 = vadd.f32 %v378_v25, %v3216_v61  ;;  %v432_v30 = vadd.f32 %v431_v26, %v3216_v61  ;;  %657 = vmatprep.subr.bf16.mxu0 %v609_v19  ;;  %710 = vmatprep.subr.bf16.mxu1 %v611_v20  ;;  %v3279_v19 = vld [vmem:[%s4123_s2] sm:$0xff]  }
  0xfc   : > { %v564_v35 = vmul.f32 0.1, %v377_v23  ;;  %v566_v36 = vmul.f32 0.1, %v430_v24  ;;  %658 = vmatpush1.bf16.msra.mxu0 %v608_v10  ;;  %711 = vmatpush1.bf16.msra.mxu1 %v610_v21  ;;  %v3244_v39 = vmax.f32 %v373_v11, %v556_v22  ;;  %v3258_v48 = vmax.f32 %v426_v12, %v558_v34 }
  0xfd   : > { %v565_v37 = vmul.f32 0.1, %v379_v29  ;;  %v567_v38 = vmul.f32 0.1, %v432_v30  ;;  %v3250_v42 = vmax.f32 %v375_v15, %v557_v27  ;;  %v3252_v43 = vmax.f32 %v428_v16, %v559_v28 }
  0xfe   : > { %v3246_v40 = vmax.f32 %v377_v23, %v564_v35  ;;  %v3248_v41 = vmax.f32 %v430_v24, %v566_v36 }
  0xff   : > { %v3254_v44 = vmax.f32 %v379_v29, %v565_v37  ;;  %v3256_v45 = vmax.f32 %v432_v30, %v567_v38  ;;  %v468_v46 = vpop.f32.mrb[8].mxu0  ;;  %v521_v47 = vpop.f32.mrb[8].mxu1 }
 0x100   : > { %v616_v49 = vpack.c.bf16 %v3246_v40, %v3244_v39  ;;  %v469_v50 = vadd.f32 %v468_v46, %v3196_v31  ;;  %v522_v51 = vadd.f32 %v521_v47, %v3196_v31  ;;  %v470_v52 = vpop.f32.mrb[9].mxu0  ;;  %v523_v53 = vpop.f32.mrb[9].mxu1  ;;  %v618_v10 = vpack.c.bf16 %v3248_v41, %v3258_v48 }
 0x101   : > { %v471_v54 = vadd.f32 %v470_v52, %v3196_v31  ;;  %v524_v55 = vadd.f32 %v523_v53, %v3196_v31  ;;  %v472_v56 = vpop.f32.mrb[10].mxu0  ;;  %v525_v57 = vpop.f32.mrb[10].mxu1  ;;  %v617_v3 = vpack.c.bf16 %v3254_v44, %v3250_v42  ;;  %v619_v8 = vpack.c.bf16 %v3256_v45, %v3252_v43 }
 0x102   : > { %v544_v11 = vmul.f32 0.1, %v469_v50  ;;  %v473_v12 = vadd.f32 %v472_v56, %v3198_v32  ;;  %v526_v13 = vadd.f32 %v525_v57, %v3198_v32  ;;  %v474_v14 = vpop.f32.mrb[11].mxu0  ;;  %v527_v15 = vpop.f32.mrb[11].mxu1  ;;  %v546_v20 = vmul.f32 0.1, %v522_v51 }
 0x103   : > { %v545_v16 = vmul.f32 0.1, %v471_v54  ;;  %v547_v31 = vmul.f32 0.1, %v524_v55  ;;  %v475_v17 = vadd.f32 %v474_v14, %v3198_v32  ;;  %v528_v18 = vadd.f32 %v527_v15, %v3198_v32  ;;  %659 = vmatprep.subr.bf16.mxu0 %v617_v3  ;;  %712 = vmatprep.subr.bf16.mxu1 %v619_v8  ;;  %v3054_v15 = vld [vmem:[%s4123_s2 + $0x8] sm:$0xff]  }
 0x104   : > { %v552_v21 = vmul.f32 0.1, %v473_v12  ;;  %v554_v22 = vmul.f32 0.1, %v526_v13  ;;  %660 = vmatpush1.bf16.msra.mxu0 %v616_v49  ;;  %713 = vmatpush1.bf16.msra.mxu1 %v618_v10  ;;  %v3281_v25 = vmax.f32 %v469_v50, %v544_v11  ;;  %v3299_v36 = vmax.f32 %v522_v51, %v546_v20 }
 0x105   : > { %v553_v23 = vmul.f32 0.1, %v475_v17  ;;  %v555_v24 = vmul.f32 0.1, %v528_v18  ;;  %v3283_v26 = vmax.f32 %v471_v54, %v545_v16  ;;  %v3289_v28 = vmax.f32 %v524_v55, %v547_v31 }
 0x106   : > { %v3285_v27 = vmax.f32 %v473_v12, %v552_v21  ;;  %v3287_v32 = vmax.f32 %v526_v13, %v554_v22 }
 0x107   : > { %v3291_v29 = vmax.f32 %v475_v17, %v553_v23  ;;  %v3293_v30 = vmax.f32 %v528_v18, %v555_v24  ;;  %v478_v34 = vpop.f32.mrb[12].mxu0  ;;  %v531_v35 = vpop.f32.mrb[12].mxu1  ;;  %2940 = vmatmul.mubr.msk.bf16.vlgmr.msra.gmra.mrb[16].mxu0 %vm650_vm2, %v3279_v19  ;;  %2942 = vmatmul.mubr.msk.bf16.vlgmr.msra.gmra.mrb[16].mxu1 %vm650_vm2, %v3279_v19 }
 0x108   : > { %v612_v37 = vpack.c.bf16 %v3285_v27, %v3281_v25  ;;  %v479_v38 = vadd.f32 %v478_v34, %v3200_v33  ;;  %v532_v46 = vadd.f32 %v531_v35, %v3200_v33  ;;  %v480_v47 = vpop.f32.mrb[13].mxu0  ;;  %v533_v49 = vpop.f32.mrb[13].mxu1  ;;  %699 = vmatprep.mubr.bf16.mxu0 %v4128_v0  ;;  %752 = vmatprep.mubr.bf16.mxu1 %v4128_v0 }
 0x109   : > { %4155 = vst [vmem:[#allocation2_spill] sm:$0xff] %v3293_v30  ;;  %v481_v50 = vadd.f32 %v480_v47, %v3200_v33  ;;  %v534_v52 = vadd.f32 %v533_v49, %v3200_v33  ;;  %v482_v53 = vpop.f32.mrb[14].mxu0  ;;  %v535_v54 = vpop.f32.mrb[14].mxu1  ;;  %v613_v51 = vpack.c.bf16 %v3291_v29, %v3283_v26  ;;  %v615_v55 = vpack.c.bf16 %v3293_v30, %v3289_v28 }
 0x10a   : > { %v614_v56 = vpack.c.bf16 %v3287_v32, %v3299_v36  ;;  %v560_v57 = vmul.f32 0.1, %v479_v38  ;;  %v483_v3 = vadd.f32 %v482_v53, %v3216_v61  ;;  %v536_v8 = vadd.f32 %v535_v54, %v3216_v61  ;;  %v484_v10 = vpop.f32.mrb[15].mxu0  ;;  %v537_v33 = vpop.f32.mrb[15].mxu1 }
 0x10b   : > { %v561_v11 = vmul.f32 0.1, %v481_v50  ;;  %v563_v12 = vmul.f32 0.1, %v534_v52  ;;  %v485_v13 = vadd.f32 %v484_v10, %v3216_v61  ;;  %v538_v14 = vadd.f32 %v537_v33, %v3216_v61  ;;  %763 = vmatprep.subr.bf16.mxu0 %v613_v51  ;;  %816 = vmatprep.subr.bf16.mxu1 %v615_v55 }
 0x10c   : > { %v562_v16 = vmul.f32 0.1, %v532_v46  ;;  %v568_v31 = vmul.f32 0.1, %v483_v3  ;;  %v570_v17 = vmul.f32 0.1, %v536_v8  ;;  %764 = vmatpush1.bf16.msra.mxu0 %v612_v37  ;;  %817 = vmatpush1.bf16.msra.mxu1 %v614_v56  ;;  %v3336_v35 = vmax.f32 %v479_v38, %v560_v57 }
 0x10d   : > { %v569_v18 = vmul.f32 0.1, %v485_v13  ;;  %v571_v20 = vmul.f32 0.1, %v538_v14  ;;  %v3322_v21 = vmax.f32 %v481_v50, %v561_v11  ;;  %v3328_v61 = vmax.f32 %v534_v52, %v563_v12 }
 0x10e   : > { %v3324_v22 = vmax.f32 %v483_v3, %v568_v31  ;;  %v3326_v23 = vmax.f32 %v536_v8, %v570_v17  ;;  %4162 = vst [vmem:[#allocation9_spill] sm:$0xff] %v3336_v35  ;;  %v3338_v37 = vmax.f32 %v532_v46, %v562_v16  ;;  %v3079_v38 = vmov 2   ;;  %v3366_v46 = vpop.permute.xlu1 %629 }
 0x10f   : > { %4156 = vst [vmem:[#allocation3_spill] sm:$0xff] %v3322_v21  ;;  %4159 = vst [vmem:[#allocation6_spill] sm:$0xff] %v3328_v61  ;;  %v3330_v24 = vmax.f32 %v485_v13, %v569_v18  ;;  %v3332_v34 = vmax.f32 %v538_v14, %v571_v20  ;;  %2941 = vmatmul.mubr.msk.bf16.gmra.mrb[20].mxu0 %vm650_vm2, %v3054_v15  ;;  %2943 = vmatmul.mubr.msk.bf16.gmra.mrb[20].mxu1 %vm650_vm2, %v3054_v15 }
 0x110   : > { %4157 = vst [vmem:[#allocation4_spill] sm:$0xff] %v3324_v22  ;;  %4158 = vst [vmem:[#allocation5_spill] sm:$0xff] %v3326_v23  ;;  %795 = vmatprep.mubr.bf16.mxu0 %v4128_v0  ;;  %848 = vmatprep.mubr.bf16.mxu1 %v4128_v0  ;;  %v620_v50 = vpack.c.bf16 %v3324_v22, %v3336_v35  ;;  %v622_v52 = vpack.c.bf16 %v3326_v23, %v3338_v37 }
 0x111   : > { %4160 = vst [vmem:[#allocation7_spill] sm:$0xff] %v3330_v24  ;;  %4161 = vst [vmem:[#allocation8_spill] sm:$0xff] %v3332_v34  ;;  %v621_v47 = vpack.c.bf16 %v3330_v24, %v3322_v21  ;;  %v623_v49 = vpack.c.bf16 %v3332_v34, %v3328_v61  ;;  %3040 = vset.pattern.permute.xlu1 %v3079_v38  ;;  %3041 = vset.pattern.permute.xlu0 %v3079_v38 }
 0x112   : > { %4163 = vst [vmem:[#allocation10_spill] sm:$0xff] %v3338_v37  ;;  %954 = vperm.xlu1 %3040, %v3141_v4   ;;  %958 = vperm.xlu0 %3041, %v3146_v5  }
 0x113   : > { %765 = vmatprep.subr.bf16.mxu0 %v621_v47  ;;  %818 = vmatprep.subr.bf16.mxu1 %v623_v49 }
 0x114   : > { %766 = vmatpush1.bf16.msra.mxu0 %v620_v50  ;;  %819 = vmatpush1.bf16.msra.mxu1 %v622_v52  ;;  %v3376_v50 = vpop.permute.xlu1 %633 }
 0x116   : > { %962 = vperm.xlu1 %3040, %v3151_v6  }
 0x117   : > { %2944 = vmatmul.mubr.msk.bf16.vlgmr.msra.gmra.mrb[24].mxu0 %vm650_vm2, %v3279_v19  ;;  %2946 = vmatmul.mubr.msk.bf16.vlgmr.msra.gmra.mrb[24].mxu1 %vm650_vm2, %v3279_v19  ;;  %v3364_v19 = vpop.permute.xlu0 %625 }
 0x118   : > { %805 = vmatprep.mubr.bf16.mxu0 %v4128_v0  ;;  %858 = vmatprep.mubr.bf16.mxu1 %v4128_v0 }
 0x11a   : > { %966 = vperm.xlu1 %3040, %v3158_v7  }
 0x11f   : > { %2945 = vmatmul.mubr.msk.bf16.gmra.mrb[28].mxu0 %vm650_vm2, %v3054_v15  ;;  %2947 = vmatmul.mubr.msk.bf16.gmra.mrb[28].mxu1 %vm650_vm2, %v3054_v15 }
 0x120   : > { %1017 = vmatprep.mubr.bf16.mxu0 %v4128_v0  ;;  %1070 = vmatprep.mubr.bf16.mxu1 %v4128_v0 }
 0x1da   : > { %v691_v53 = vpop.f32.mrb[16].mxu0  ;;  %v744_v54 = vpop.f32.mrb[16].mxu1 }
 0x1db   : > { %v692_v51 = vadd.f32 %v691_v53, %v3364_v19  ;;  %v745_v55 = vadd.f32 %v744_v54, %v3364_v19  ;;  %v693_v56 = vpop.f32.mrb[17].mxu0  ;;  %v746_v57 = vpop.f32.mrb[17].mxu1 }
 0x1dc   : > { %v694_v3 = vadd.f32 %v693_v56, %v3364_v19  ;;  %v747_v8 = vadd.f32 %v746_v57, %v3364_v19  ;;  %v695_v10 = vpop.f32.mrb[18].mxu0  ;;  %v748_v33 = vpop.f32.mrb[18].mxu1 }
 0x1dd   : > { %v869_v11 = vmul.f32 0.2, %v692_v51  ;;  %v871_v12 = vmul.f32 0.2, %v745_v55  ;;  %v696_v13 = vadd.f32 %v695_v10, %v3366_v46  ;;  %v749_v14 = vadd.f32 %v748_v33, %v3366_v46  ;;  %v697_v15 = vpop.f32.mrb[19].mxu0  ;;  %v750_v16 = vpop.f32.mrb[19].mxu1 }
 0x1de   : > { %v870_v31 = vmul.f32 0.2, %v694_v3  ;;  %v872_v17 = vmul.f32 0.2, %v747_v8  ;;  %v698_v18 = vadd.f32 %v697_v15, %v3366_v46  ;;  %v751_v20 = vadd.f32 %v750_v16, %v3366_v46  ;;  %v3378_v10 = vpop.permute.xlu0 %637 }
 0x1df   : > { %v877_v47 = vmul.f32 0.2, %v696_v13  ;;  %v879_v49 = vmul.f32 0.2, %v749_v14  ;;  %v901_v53 = vmax.f32 %v692_v51, %v869_v11  ;;  %v903_v54 = vmax.f32 %v745_v55, %v871_v12 }
 0x1e0   : > { %v878_v52 = vmul.f32 0.2, %v698_v18  ;;  %v880_v38 = vmul.f32 0.2, %v751_v20  ;;  %v902_v33 = vmax.f32 %v694_v3, %v870_v31  ;;  %v904_v0 = vmax.f32 %v747_v8, %v872_v17 }
 0x1e1   : > { %v909_v56 = vmax.f32 %v696_v13, %v877_v47  ;;  %v911_v57 = vmax.f32 %v749_v14, %v879_v49 }
 0x1e2   : > { %v910_v37 = vmax.f32 %v698_v18, %v878_v52  ;;  %v912_v35 = vmax.f32 %v751_v20, %v880_v38  ;;  %v701_v34 = vpop.f32.mrb[20].mxu0  ;;  %v754_v15 = vpop.f32.mrb[20].mxu1 }
 0x1e3   : > { %v937_v24 = vpack.c.bf16 %v909_v56, %v901_v53  ;;  %v939_v16 = vpack.c.bf16 %v911_v57, %v903_v54  ;;  %v702_v23 = vadd.f32 %v701_v34, %v3376_v50  ;;  %v755_v61 = vadd.f32 %v754_v15, %v3376_v50  ;;  %v703_v22 = vpop.f32.mrb[21].mxu0  ;;  %v756_v21 = vpop.f32.mrb[21].mxu1 }
 0x1e4   : > { %v704_v51 = vadd.f32 %v703_v22, %v3376_v50  ;;  %v757_v55 = vadd.f32 %v756_v21, %v3376_v50  ;;  %v705_v11 = vpop.f32.mrb[22].mxu0  ;;  %v758_v12 = vpop.f32.mrb[22].mxu1  ;;  %v938_v3 = vpack.c.bf16 %v910_v37, %v902_v33  ;;  %v940_v8 = vpack.c.bf16 %v912_v35, %v904_v0 }
 0x1e5   : > { %v885_v13 = vmul.f32 0.2, %v702_v23  ;;  %v887_v14 = vmul.f32 0.2, %v755_v61  ;;  %v706_v31 = vadd.f32 %v705_v11, %v3378_v10  ;;  %v759_v17 = vadd.f32 %v758_v12, %v3378_v10  ;;  %v707_v18 = vpop.f32.mrb[23].mxu0  ;;  %v760_v34 = vpop.f32.mrb[23].mxu1 }
 0x1e6   : > { %v886_v20 = vmul.f32 0.2, %v704_v51  ;;  %v888_v47 = vmul.f32 0.2, %v757_v55  ;;  %v708_v49 = vadd.f32 %v707_v18, %v3378_v10  ;;  %v761_v22 = vadd.f32 %v760_v34, %v3378_v10  ;;  %985 = vmatprep.subr.bf16.mxu0 %v938_v3  ;;  %1038 = vmatprep.subr.bf16.mxu1 %v940_v8 }
 0x1e7   : > { %v893_v21 = vmul.f32 0.2, %v706_v31  ;;  %v895_v52 = vmul.f32 0.2, %v759_v17  ;;  %986 = vmatpush1.bf16.msra.mxu0 %v937_v24  ;;  %1039 = vmatpush1.bf16.msra.mxu1 %v939_v16  ;;  %v917_v37 = vmax.f32 %v702_v23, %v885_v13  ;;  %v919_v38 = vmax.f32 %v755_v61, %v887_v14 }
 0x1e8   : > { %v894_v0 = vmul.f32 0.2, %v708_v49  ;;  %v896_v35 = vmul.f32 0.2, %v761_v22  ;;  %v918_v56 = vmax.f32 %v704_v51, %v886_v20  ;;  %v920_v57 = vmax.f32 %v757_v55, %v888_v47 }
 0x1e9   : > { %v925_v53 = vmax.f32 %v706_v31, %v893_v21  ;;  %v927_v54 = vmax.f32 %v759_v17, %v895_v52 }
 0x1ea   : > { %v926_v33 = vmax.f32 %v708_v49, %v894_v0  ;;  %v928_v15 = vmax.f32 %v761_v22, %v896_v35  ;;  %v797_v11 = vpop.f32.mrb[24].mxu0  ;;  %v850_v12 = vpop.f32.mrb[24].mxu1 }
 0x1eb   : > { %v945_v18 = vpack.c.bf16 %v925_v53, %v917_v37  ;;  %v947_v34 = vpack.c.bf16 %v927_v54, %v919_v38  ;;  %v798_v3 = vadd.f32 %v797_v11, %v3364_v19  ;;  %v851_v8 = vadd.f32 %v850_v12, %v3364_v19  ;;  %v799_v24 = vpop.f32.mrb[25].mxu0  ;;  %v852_v16 = vpop.f32.mrb[25].mxu1 }
 0x1ec   : > { %v800_v30 = vadd.f32 %v799_v24, %v3364_v19  ;;  %v853_v23 = vadd.f32 %v852_v16, %v3364_v19  ;;  %v801_v61 = vpop.f32.mrb[26].mxu0  ;;  %v854_v13 = vpop.f32.mrb[26].mxu1  ;;  %v946_v51 = vpack.c.bf16 %v926_v33, %v918_v56  ;;  %v948_v55 = vpack.c.bf16 %v928_v15, %v920_v57  ;;  %v3399_v19 = vld [vmem:[%s4124_s3] sm:$0xff]  }
 0x1ed   : > { %v873_v14 = vmul.f32 0.2, %v798_v3  ;;  %v875_v31 = vmul.f32 0.2, %v851_v8  ;;  %v802_v17 = vadd.f32 %v801_v61, %v3366_v46  ;;  %v855_v20 = vadd.f32 %v854_v13, %v3366_v46  ;;  %v803_v47 = vpop.f32.mrb[27].mxu0  ;;  %v856_v49 = vpop.f32.mrb[27].mxu1 }
 0x1ee   : > { %v874_v22 = vmul.f32 0.2, %v800_v30  ;;  %v876_v21 = vmul.f32 0.2, %v853_v23  ;;  %v804_v52 = vadd.f32 %v803_v47, %v3366_v46  ;;  %v857_v0 = vadd.f32 %v856_v49, %v3366_v46  ;;  %987 = vmatprep.subr.bf16.mxu0 %v946_v51  ;;  %1040 = vmatprep.subr.bf16.mxu1 %v948_v55 }
 0x1ef   : > { %v881_v35 = vmul.f32 0.2, %v802_v17  ;;  %v883_v37 = vmul.f32 0.2, %v855_v20  ;;  %988 = vmatpush1.bf16.msra.mxu0 %v945_v18  ;;  %1041 = vmatpush1.bf16.msra.mxu1 %v947_v34  ;;  %v905_v38 = vmax.f32 %v798_v3, %v873_v14  ;;  %v907_v56 = vmax.f32 %v851_v8, %v875_v31 }
 0x1f0   : > { %v882_v53 = vmul.f32 0.2, %v804_v52  ;;  %v884_v54 = vmul.f32 0.2, %v857_v0  ;;  %v906_v57 = vmax.f32 %v800_v30, %v874_v22  ;;  %v908_v11 = vmax.f32 %v853_v23, %v876_v21 }
 0x1f1   : > { %v913_v33 = vmax.f32 %v802_v17, %v881_v35  ;;  %v915_v15 = vmax.f32 %v855_v20, %v883_v37  ;;  %v4164_v13 = vmov 0  }
 0x1f2   : > { %v914_v46 = vmax.f32 %v804_v52, %v882_v53  ;;  %v916_v12 = vmax.f32 %v857_v0, %v884_v54  ;;  %v807_v24 = vpop.f32.mrb[28].mxu0  ;;  %v860_v16 = vpop.f32.mrb[28].mxu1  ;;  %2950 = vmatmul.mubr.msk.bf16.vlgmr.msra.gmra.mrb[32].mxu0 %vm650_vm2, %v3399_v19  ;;  %2952 = vmatmul.mubr.msk.bf16.vlgmr.msra.gmra.mrb[32].mxu1 %vm650_vm2, %v3399_v19 }
 0x1f3   : > { %v941_v18 = vpack.c.bf16 %v913_v33, %v905_v38  ;;  %v943_v34 = vpack.c.bf16 %v915_v15, %v907_v56  ;;  %v808_v3 = vadd.f32 %v807_v24, %v3376_v50  ;;  %v861_v8 = vadd.f32 %v860_v16, %v3376_v50  ;;  %v809_v30 = vpop.f32.mrb[29].mxu0  ;;  %v862_v61 = vpop.f32.mrb[29].mxu1  ;;  %1027 = vmatprep.mubr.bf16.mxu0 %v4164_v13  ;;  %v3056_v38 = vld [vmem:[%s4124_s3 + $0x8] sm:$0xff]  }
 0x1f4   : > { %v810_v23 = vadd.f32 %v809_v30, %v3376_v50  ;;  %v863_v51 = vadd.f32 %v862_v61, %v3376_v50  ;;  %v811_v55 = vpop.f32.mrb[30].mxu0  ;;  %v864_v14 = vpop.f32.mrb[30].mxu1  ;;  %v942_v31 = vpack.c.bf16 %v914_v46, %v906_v57  ;;  %v944_v17 = vpack.c.bf16 %v916_v12, %v908_v11  ;;  %1080 = vmatprep.mubr.bf16.mxu1 %v4164_v13 }
 0x1f5   : > { %v889_v20 = vmul.f32 0.2, %v808_v3  ;;  %v891_v47 = vmul.f32 0.2, %v861_v8  ;;  %v812_v49 = vadd.f32 %v811_v55, %v3378_v10  ;;  %v865_v22 = vadd.f32 %v864_v14, %v3378_v10  ;;  %v813_v21 = vpop.f32.mrb[31].mxu0  ;;  %v866_v52 = vpop.f32.mrb[31].mxu1 }
 0x1f6   : > { %v890_v0 = vmul.f32 0.2, %v810_v23  ;;  %v892_v35 = vmul.f32 0.2, %v863_v51  ;;  %v814_v37 = vadd.f32 %v813_v21, %v3378_v10  ;;  %v867_v50 = vadd.f32 %v866_v52, %v3378_v10  ;;  %1091 = vmatprep.subr.bf16.mxu0 %v942_v31  ;;  %1144 = vmatprep.subr.bf16.mxu1 %v944_v17 }
 0x1f7   : > { %v897_v53 = vmul.f32 0.2, %v812_v49  ;;  %v899_v54 = vmul.f32 0.2, %v865_v22  ;;  %1092 = vmatpush1.bf16.msra.mxu0 %v941_v18  ;;  %1145 = vmatpush1.bf16.msra.mxu1 %v943_v34  ;;  %v921_v56 = vmax.f32 %v808_v3, %v889_v20  ;;  %v923_v15 = vmax.f32 %v861_v8, %v891_v47 }
 0x1f8   : > { %v898_v57 = vmul.f32 0.2, %v814_v37  ;;  %v900_v33 = vmul.f32 0.2, %v867_v50  ;;  %v922_v11 = vmax.f32 %v810_v23, %v890_v0  ;;  %v924_v24 = vmax.f32 %v863_v51, %v892_v35  ;;  %v3440_v23 = vpop.permute.xlu0 %958 }
 0x1f9   : > { %v929_v46 = vmax.f32 %v812_v49, %v897_v53  ;;  %v931_v12 = vmax.f32 %v865_v22, %v899_v54  ;;  %v3080_v3 = vmov 3  }
 0x1fa   : > { %v930_v16 = vmax.f32 %v814_v37, %v898_v57  ;;  %v932_v10 = vmax.f32 %v867_v50, %v900_v33  ;;  %2951 = vmatmul.mubr.msk.bf16.gmra.mrb[36].mxu0 %vm650_vm2, %v3056_v38  ;;  %2953 = vmatmul.mubr.msk.bf16.gmra.mrb[36].mxu1 %vm650_vm2, %v3056_v38 }
 0x1fb   : > { %v949_v30 = vpack.c.bf16 %v929_v46, %v921_v56  ;;  %v951_v61 = vpack.c.bf16 %v931_v12, %v923_v15  ;;  %1123 = vmatprep.mubr.bf16.mxu0 %v4164_v13  ;;  %1176 = vmatprep.mubr.bf16.mxu1 %v4164_v13 }
 0x1fc   : > { %v950_v18 = vpack.c.bf16 %v930_v16, %v922_v11  ;;  %v952_v34 = vpack.c.bf16 %v932_v10, %v924_v24  ;;  %3043 = vset.pattern.permute.xlu1 %v3080_v3  ;;  %3042 = vset.pattern.permute.xlu0 %v3080_v3 }
 0x1fd   : > { %1319 = vperm.xlu1 %3043, %v3146_v5   ;;  %1315 = vperm.xlu0 %3042, %v3141_v4  }
 0x1fe   : > { %1093 = vmatprep.subr.bf16.mxu0 %v950_v18  ;;  %1146 = vmatprep.subr.bf16.mxu1 %v952_v34 }
 0x1ff   : > { %1094 = vmatpush1.bf16.msra.mxu0 %v949_v30  ;;  %1147 = vmatpush1.bf16.msra.mxu1 %v951_v61 }
 0x201   : > { %1323 = vperm.xlu1 %3043, %v3151_v6   ;;  %1327 = vperm.xlu0 %3042, %v3158_v7  }
 0x202   : > { %2954 = vmatmul.mubr.msk.bf16.vlgmr.msra.gmra.mrb[40].mxu0 %vm650_vm2, %v3399_v19  ;;  %2956 = vmatmul.mubr.msk.bf16.vlgmr.msra.gmra.mrb[40].mxu1 %vm650_vm2, %v3399_v19  ;;  %v3436_v19 = vpop.permute.xlu1 %954 }
 0x203   : > { %1133 = vmatprep.mubr.bf16.mxu0 %v4164_v13  ;;  %1186 = vmatprep.mubr.bf16.mxu1 %v4164_v13 }
 0x206   : > { %v3438_v8 = vpop.permute.xlu1 %962 }
 0x20a   : > { %2955 = vmatmul.mubr.msk.bf16.gmra.mrb[44].mxu0 %vm650_vm2, %v3056_v38  ;;  %2957 = vmatmul.mubr.msk.bf16.gmra.mrb[44].mxu1 %vm650_vm2, %v3056_v38  ;;  %v3450_v16 = vpop.permute.xlu1 %966 }
 0x20b   : > { %1378 = vmatprep.mubr.bf16.mxu0 %v4164_v13  ;;  %1431 = vmatprep.mubr.bf16.mxu1 %v4164_v13 }
 0x2c5   : > { %v1019_v51 = vpop.f32.mrb[32].mxu0  ;;  %v1072_v55 = vpop.f32.mrb[32].mxu1 }
 0x2c6   : > { %v1020_v14 = vadd.f32 %v1019_v51, %v3436_v19  ;;  %v1073_v31 = vadd.f32 %v1072_v55, %v3436_v19  ;;  %v1021_v17 = vpop.f32.mrb[33].mxu0  ;;  %v1074_v5 = vpop.f32.mrb[33].mxu1 }
 0x2c7   : > { %v1022_v4 = vadd.f32 %v1021_v17, %v3436_v19  ;;  %v1075_v6 = vadd.f32 %v1074_v5, %v3436_v19  ;;  %v1023_v20 = vpop.f32.mrb[34].mxu0  ;;  %v1076_v7 = vpop.f32.mrb[34].mxu1 }
 0x2c8   : > { %v1197_v47 = vmul.f32 0.2, %v1020_v14  ;;  %v1199_v49 = vmul.f32 0.2, %v1073_v31  ;;  %v1024_v22 = vadd.f32 %v1023_v20, %v3440_v23  ;;  %v1077_v21 = vadd.f32 %v1076_v7, %v3440_v23  ;;  %v1025_v52 = vpop.f32.mrb[35].mxu0  ;;  %v1078_v0 = vpop.f32.mrb[35].mxu1 }
 0x2c9   : > { %v1198_v35 = vmul.f32 0.2, %v1022_v4  ;;  %v1200_v37 = vmul.f32 0.2, %v1075_v6  ;;  %v1026_v50 = vadd.f32 %v1025_v52, %v3440_v23  ;;  %v1079_v38 = vadd.f32 %v1078_v0, %v3440_v23 }
 0x2ca   : > { %v1229_v53 = vmax.f32 %v1020_v14, %v1197_v47  ;;  %v1231_v54 = vmax.f32 %v1073_v31, %v1199_v49  ;;  %v1205_v56 = vmul.f32 0.2, %v1024_v22  ;;  %v1207_v57 = vmul.f32 0.2, %v1077_v21 }
 0x2cb   : > { %v1230_v33 = vmax.f32 %v1022_v4, %v1198_v35  ;;  %v1232_v15 = vmax.f32 %v1075_v6, %v1200_v37  ;;  %v1206_v11 = vmul.f32 0.2, %v1026_v50  ;;  %v1208_v46 = vmul.f32 0.2, %v1079_v38 }
 0x2cc   : > { %v1237_v12 = vmax.f32 %v1024_v22, %v1205_v56  ;;  %v1239_v24 = vmax.f32 %v1077_v21, %v1207_v57  ;;  %v3453_v10 = vadd.f32 %v1229_v53, %v3210_v58  ;;  %v3456_v30 = vadd.f32 %v1231_v54, %v3226_v9 }
 0x2cd   : > { %v1238_v61 = vmax.f32 %v1026_v50, %v1206_v11  ;;  %v1029_v18 = vpop.f32.mrb[36].mxu0  ;;  %v1082_v34 = vpop.f32.mrb[36].mxu1  ;;  %v3459_v3 = vadd.f32 %v1230_v33, %v3218_v62  ;;  %v1240_v51 = vmax.f32 %v1079_v38, %v1208_v46  ;;  %v3464_v5 = vadd.f32 %v1232_v15, %v3220_v63 }
 0x2ce   : > { %v1030_v55 = vadd.f32 %v1029_v18, %v3438_v8  ;;  %v1083_v14 = vadd.f32 %v1082_v34, %v3438_v8  ;;  %v1031_v31 = vpop.f32.mrb[37].mxu0  ;;  %v1084_v17 = vpop.f32.mrb[37].mxu1  ;;  %v3467_v58 = vadd.f32 %v1237_v12, %v3212_v59  ;;  %v3474_v20 = vadd.f32 %v1239_v24, %v3214_v60 }
 0x2cf   : > { %v1032_v9 = vadd.f32 %v1031_v31, %v3438_v8  ;;  %v3471_v4 = vadd.f32 %v1084_v17, %v3438_v8  ;;  %v1033_v62 = vpop.f32.mrb[38].mxu0  ;;  %v1086_v6 = vpop.f32.mrb[38].mxu1  ;;  %v3477_v7 = vadd.f32 %v1238_v61, %v3222_v1  ;;  %v3483_v35 = vadd.f32 %v1240_v51, %v3224_v2 }
 0x2d0   : > { %v1213_v47 = vmul.f32 0.2, %v1030_v55  ;;  %v1215_v49 = vmul.f32 0.2, %v1083_v14  ;;  %v1035_v63 = vpop.f32.mrb[39].mxu0  ;;  %v1088_v22 = vpop.f32.mrb[39].mxu1  ;;  %v1034_v52 = vadd.f32 %v1033_v62, %v3450_v16  ;;  %v1087_v0 = vadd.f32 %v1086_v6, %v3450_v16 }
 0x2d1   : > { %v1214_v21 = vmul.f32 0.2, %v1032_v9  ;;  %v1216_v59 = vmul.f32 0.2, %v3471_v4  ;;  %v1036_v60 = vadd.f32 %v1035_v63, %v3450_v16  ;;  %v1089_v1 = vadd.f32 %v1088_v22, %v3450_v16 }
 0x2d2   : > { %v1245_v37 = vmax.f32 %v1030_v55, %v1213_v47  ;;  %v1247_v50 = vmax.f32 %v1083_v14, %v1215_v49  ;;  %v1221_v53 = vmul.f32 0.2, %v1034_v52  ;;  %v1223_v54 = vmul.f32 0.2, %v1087_v0 }
 0x2d3   : > { %v1246_v38 = vmax.f32 %v1032_v9, %v1214_v21  ;;  %v1298_v56 = vpack.c.bf16 %v3467_v58, %v3453_v10  ;;  %v1300_v57 = vpack.c.bf16 %v3474_v20, %v3456_v30  ;;  %v1222_v33 = vmul.f32 0.2, %v1036_v60 }
 0x2d4   : > { %v1224_v15 = vmul.f32 0.2, %v1089_v1  ;;  %v3492_v2 = vadd.f32 %v1245_v37, %v3244_v39  ;;  %v1248_v11 = vmax.f32 %v3471_v4, %v1216_v59  ;;  %v1253_v46 = vmax.f32 %v1034_v52, %v1221_v53 }
 0x2d5   : > { %v1255_v12 = vmax.f32 %v1087_v0, %v1223_v54  ;;  %v1125_v24 = vpop.f32.mrb[40].mxu0  ;;  %v1178_v61 = vpop.f32.mrb[40].mxu1  ;;  %v1254_v18 = vmax.f32 %v1036_v60, %v1222_v33  ;;  %v1299_v51 = vpack.c.bf16 %v3477_v7, %v3459_v3  ;;  %v1301_v55 = vpack.c.bf16 %v3483_v35, %v3464_v5 }
 0x2d6   : > { %v1256_v34 = vmax.f32 %v1089_v1, %v1224_v15  ;;  %v1127_v14 = vpop.f32.mrb[41].mxu0  ;;  %v1180_v31 = vpop.f32.mrb[41].mxu1  ;;  %v3500_v17 = vadd.f32 %v1247_v50, %v3258_v48  ;;  %v3503_v39 = vadd.f32 %v1246_v38, %v3250_v42  ;;  %v1126_v9 = vadd.f32 %v1125_v24, %v3436_v19 }
 0x2d7   : > { %v1179_v4 = vadd.f32 %v1178_v61, %v3436_v19  ;;  %v1129_v62 = vpop.f32.mrb[42].mxu0  ;;  %v1182_v6 = vpop.f32.mrb[42].mxu1  ;;  %v3508_v47 = vadd.f32 %v1253_v46, %v3246_v40  ;;  %v3511_v49 = vadd.f32 %v1255_v12, %v3248_v41  ;;  %1346 = vmatprep.subr.bf16.mxu0 %v1299_v51  ;;  %1399 = vmatprep.subr.bf16.mxu1 %v1301_v55 }
 0x2d8   : > { %v1128_v48 = vadd.f32 %v1127_v14, %v3436_v19  ;;  %v1131_v63 = vpop.f32.mrb[43].mxu0  ;;  %v1184_v22 = vpop.f32.mrb[43].mxu1  ;;  %v3515_v42 = vadd.f32 %v1254_v18, %v3254_v44  ;;  %v3518_v21 = vadd.f32 %v1256_v34, %v3256_v45  ;;  %1347 = vmatpush1.bf16.msra.mxu0 %v1298_v56  ;;  %1400 = vmatpush1.bf16.msra.mxu1 %v1300_v57  ;;  %v1201_v59 = vmul.f32 0.2, %v1126_v9 }
 0x2d9   : > { %v1203_v40 = vmul.f32 0.2, %v1179_v4  ;;  %v1181_v41 = vadd.f32 %v1180_v31, %v3436_v19  ;;  %v1130_v0 = vadd.f32 %v1129_v62, %v3440_v23  ;;  %v1183_v37 = vadd.f32 %v1182_v6, %v3440_v23 }
 0x2da   : > { %v1202_v52 = vmul.f32 0.2, %v1128_v48  ;;  %v1233_v60 = vmax.f32 %v1126_v9, %v1201_v59  ;;  %v1132_v50 = vadd.f32 %v1131_v63, %v3440_v23  ;;  %v1185_v44 = vadd.f32 %v1184_v22, %v3440_v23 }
 0x2db   : > { %v1235_v1 = vmax.f32 %v1179_v4, %v1203_v40  ;;  %v1204_v45 = vmul.f32 0.2, %v1181_v41  ;;  %v1209_v53 = vmul.f32 0.2, %v1130_v0  ;;  %v1211_v54 = vmul.f32 0.2, %v1183_v37 }
 0x2dc   : > { %v1234_v38 = vmax.f32 %v1128_v48, %v1202_v52  ;;  %v3526_v56 = vadd.f32 %v1248_v11, %v3252_v43  ;;  %v1306_v19 = vpack.c.bf16 %v3508_v47, %v3492_v2  ;;  %v1210_v57 = vmul.f32 0.2, %v1132_v50 }
 0x2dd   : > { %v1212_v33 = vmul.f32 0.2, %v1185_v44  ;;  %v1135_v15 = vpop.f32.mrb[44].mxu0  ;;  %v1188_v46 = vpop.f32.mrb[44].mxu1  ;;  %v1308_v12 = vpack.c.bf16 %v3511_v49, %v3500_v17  ;;  %v1236_v24 = vmax.f32 %v1181_v41, %v1204_v45  ;;  %v1241_v61 = vmax.f32 %v1130_v0, %v1209_v53 }
 0x2de   : > { %v1243_v23 = vmax.f32 %v1183_v37, %v1211_v54  ;;  %v1137_v18 = vpop.f32.mrb[45].mxu0  ;;  %v1190_v34 = vpop.f32.mrb[45].mxu1  ;;  %v3533_v51 = vadd.f32 %v1233_v60, %v3281_v25  ;;  %v1242_v43 = vmax.f32 %v1132_v50, %v1210_v57  ;;  %v1307_v11 = vpack.c.bf16 %v3515_v42, %v3503_v39  ;;  %v4166_v50 = vld [vmem:[#allocation2_spill] sm:$0xff] }
 0x2df   : > { %v1309_v55 = vpack.c.bf16 %v3518_v21, %v3526_v56  ;;  %v1139_v14 = vpop.f32.mrb[46].mxu0  ;;  %v1192_v31 = vpop.f32.mrb[46].mxu1  ;;  %v3540_v9 = vadd.f32 %v1235_v1, %v3299_v36  ;;  %v3543_v4 = vadd.f32 %v1234_v38, %v3283_v26  ;;  %v1244_v62 = vmax.f32 %v1185_v44, %v1212_v33  ;;  %v3057_v26 = vld [vmem:[%s4123_s2 + $0x10] sm:$0xff]  }
 0x2e0   : > { %v1136_v6 = vadd.f32 %v1135_v15, %v3438_v8  ;;  %v1141_v25 = vpop.f32.mrb[47].mxu0  ;;  %v1194_v48 = vpop.f32.mrb[47].mxu1  ;;  %v3547_v63 = vadd.f32 %v1236_v24, %v3289_v28  ;;  %v3550_v22 = vadd.f32 %v1241_v61, %v3285_v27  ;;  %1348 = vmatprep.subr.bf16.mxu0 %v1307_v11  ;;  %v1189_v59 = vadd.f32 %v1188_v46, %v3438_v8 }
 0x2e1   : > { %1401 = vmatprep.subr.bf16.mxu1 %v1309_v55  ;;  %v3557_v36 = vadd.f32 %v1243_v23, %v3287_v32  ;;  %v3560_v40 = vadd.f32 %v1242_v43, %v3291_v29  ;;  %1349 = vmatpush1.bf16.msra.mxu0 %v1306_v19  ;;  %v1138_v28 = vadd.f32 %v1137_v18, %v3438_v8  ;;  %v4168_v18 = vld [vmem:[#allocation3_spill] sm:$0xff]  ;;  %v4170_v43 = vld [vmem:[#allocation4_spill] sm:$0xff] }
 0x2e2   : > { %1402 = vmatpush1.bf16.msra.mxu1 %v1308_v12  ;;  %v1217_v27 = vmul.f32 0.2, %v1136_v6  ;;  %v1191_v52 = vadd.f32 %v1190_v34, %v3438_v8  ;;  %v1140_v41 = vadd.f32 %v1139_v14, %v3450_v16  ;;  %v1193_v0 = vadd.f32 %v1192_v31, %v3450_v16  ;;  %v3058_v14 = vld [vmem:[%s4123_s2 + $0x18] sm:$0xff]   ;;  %v4172_v31 = vld [vmem:[#allocation6_spill] sm:$0xff] }
 0x2e3   : > { %4165 = vst [vmem:[#allocation11_spill] sm:$0xff] %v3560_v40  ;;  %v1219_v37 = vmul.f32 0.2, %v1189_v59  ;;  %v1218_v60 = vmul.f32 0.2, %v1138_v28  ;;  %v1142_v1 = vadd.f32 %v1141_v25, %v3450_v16  ;;  %v1195_v32 = vadd.f32 %v1194_v48, %v3450_v16  ;;  %v4176_v48 = vld [vmem:[#allocation7_spill] sm:$0xff] }
 0x2e4   : > { %v3569_v29 = vadd.f32 %v1244_v62, %v4166_v50  ;;  %v1220_v44 = vmul.f32 0.2, %v1191_v52  ;;  %v1225_v38 = vmul.f32 0.2, %v1140_v41  ;;  %v1227_v45 = vmul.f32 0.2, %v1193_v0  ;;  %2964 = vmatmul.mubr.msk.bf16.vlgmr.msra.gmra.mrb[48].mxu0 %vm650_vm2, %v3057_v26 }
 0x2e5   : > { %2966 = vmatmul.mubr.msk.bf16.vlgmr.msra.gmra.mrb[48].mxu1 %vm650_vm2, %v3057_v26  ;;  %v1302_v8 = vpack.c.bf16 %v3550_v22, %v3533_v51  ;;  %v1250_v53 = vmax.f32 %v1138_v28, %v1218_v60  ;;  %v1226_v54 = vmul.f32 0.2, %v1142_v1  ;;  %v1228_v19 = vmul.f32 0.2, %v1195_v32  ;;  %1388 = vmatprep.mubr.bf16.mxu0 %v4164_v13  ;;  %v4178_v28 = vld [vmem:[#allocation8_spill] sm:$0xff] }
 0x2e6   : > { %4167 = vst [vmem:[#allocation2_spill] sm:$0xff] %v3569_v29  ;;  %1441 = vmatprep.mubr.bf16.mxu1 %v4164_v13  ;;  %v1249_v16 = vmax.f32 %v1136_v6, %v1217_v27  ;;  %v1252_v57 = vmax.f32 %v1191_v52, %v1220_v44  ;;  %v1257_v33 = vmax.f32 %v1140_v41, %v1225_v38  ;;  %v4174_v6 = vld [vmem:[#allocation5_spill] sm:$0xff]  ;;  %v3081_v44 = vmov 4   ;;  %v3633_v38 = vld [vmem:[%s4126_s5] sm:$0xff] }
 0x2e7   : > { %v1259_v15 = vmax.f32 %v1193_v0, %v1227_v45  ;;  %v1251_v46 = vmax.f32 %v1189_v59, %v1219_v37  ;;  %v1258_v12 = vmax.f32 %v1142_v1, %v1226_v54  ;;  %v1260_v24 = vmax.f32 %v1195_v32, %v1228_v19  ;;  %v4180_v52 = vld [vmem:[#allocation9_spill] sm:$0xff]  ;;  %v4182_v0 = vld [vmem:[#allocation10_spill] sm:$0xff]  ;;  %3044 = vset.pattern.permute.xlu1 %v3081_v44  ;;  %v3645_v45 = vld [vmem:[%s4126_s5 + $0x10] sm:$0xff]  ;;  %v3656_v54 = vpop.permute.xlu1 %1319 }
 0x2e8   : > { %v1303_v61 = vpack.c.bf16 %v3560_v40, %v3543_v4  ;;  %v1304_v23 = vpack.c.bf16 %v3557_v36, %v3540_v9  ;;  %v3582_v34 = vadd.f32 %v1250_v53, %v4168_v18  ;;  %v3585_v11 = vadd.f32 %v1257_v33, %v4170_v43  ;;  %3045 = vset.pattern.permute.xlu0 %v3081_v44  ;;  %v3654_v53 = vpop.permute.xlu0 %1315 }
 0x2e9   : > { %v1305_v55 = vpack.c.bf16 %v3569_v29, %v3547_v63  ;;  %v3593_v62 = vadd.f32 %v1252_v57, %v4172_v31  ;;  %v3596_v25 = vadd.f32 %v1259_v15, %v4174_v6  ;;  %v3599_v59 = vadd.f32 %v1258_v12, %v4176_v48  ;;  %1644 = vperm.xlu1 %3044, %v3633_v38  }
 0x2ea   : > { %4169 = vst [vmem:[#allocation3_spill] sm:$0xff] %v3582_v34  ;;  %4171 = vst [vmem:[#allocation4_spill] sm:$0xff] %v3585_v11  ;;  %v3602_v27 = vadd.f32 %v1260_v24, %v4178_v28  ;;  %1452 = vmatprep.subr.bf16.mxu0 %v1303_v61  ;;  %v3605_v41 = vadd.f32 %v1249_v16, %v4180_v52  ;;  %v3608_v37 = vadd.f32 %v1251_v46, %v4182_v0 }
 0x2eb   : > { %4173 = vst [vmem:[#allocation6_spill] sm:$0xff] %v3593_v62  ;;  %4175 = vst [vmem:[#allocation5_spill] sm:$0xff] %v3596_v25  ;;  %1505 = vmatprep.subr.bf16.mxu1 %v1305_v55  ;;  %1453 = vmatpush1.bf16.msra.mxu0 %v1302_v8  ;;  %v1311_v60 = vpack.c.bf16 %v3599_v59, %v3582_v34  ;;  %v3651_v8 = vld [vmem:[%s4126_s5 + $0x18] sm:$0xff] }
 0x2ec   : > { %4177 = vst [vmem:[#allocation7_spill] sm:$0xff] %v3599_v59  ;;  %4179 = vst [vmem:[#allocation8_spill] sm:$0xff] %v3602_v27  ;;  %1506 = vmatpush1.bf16.msra.mxu1 %v1304_v23  ;;  %v1313_v1 = vpack.c.bf16 %v3602_v27, %v3593_v62  ;;  %v1310_v32 = vpack.c.bf16 %v3585_v11, %v3605_v41  ;;  %2965 = vmatmul.mubr.msk.bf16.gmra.mrb[52].mxu0 %vm650_vm2, %v3058_v14 }
 0x2ed   : > { %4181 = vst [vmem:[#allocation9_spill] sm:$0xff] %v3605_v41  ;;  %4183 = vst [vmem:[#allocation10_spill] sm:$0xff] %v3608_v37  ;;  %2967 = vmatmul.mubr.msk.bf16.gmra.mrb[52].mxu1 %vm650_vm2, %v3058_v14  ;;  %v1312_v50 = vpack.c.bf16 %v3596_v25, %v3608_v37  ;;  %1454 = vmatprep.subr.bf16.mxu0 %v1311_v60 }
 0x2ee   : > { %1507 = vmatprep.subr.bf16.mxu1 %v1313_v1  ;;  %1484 = vmatprep.mubr.bf16.mxu0 %v4164_v13 }
 0x2ef   : > { %1455 = vmatpush1.bf16.msra.mxu0 %v1310_v32  ;;  %1537 = vmatprep.mubr.bf16.mxu1 %v4164_v13  ;;  %v3666_v32 = vpop.permute.xlu1 %1323 }
 0x2f0   : > { %1508 = vmatpush1.bf16.msra.mxu1 %v1312_v50  ;;  %1652 = vperm.xlu1 %3044, %v3645_v45  }
 0x2f4   : > { %2968 = vmatmul.mubr.msk.bf16.vlgmr.msra.gmra.mrb[56].mxu0 %vm650_vm2, %v3057_v26  ;;  %1656 = vperm.xlu1 %3044, %v3651_v8  }
 0x2f5   : > { %2970 = vmatmul.mubr.msk.bf16.vlgmr.msra.gmra.mrb[56].mxu1 %vm650_vm2, %v3057_v26  ;;  %1494 = vmatprep.mubr.bf16.mxu0 %v4164_v13  ;;  %v3639_v26 = vld [vmem:[%s4126_s5 + $0x8] sm:$0xff] }
 0x2f6   : > { %1547 = vmatprep.mubr.bf16.mxu1 %v4164_v13  ;;  %1648 = vperm.xlu0 %3045, %v3639_v26  }
 0x2fc   : > { %2969 = vmatmul.mubr.msk.bf16.gmra.mrb[60].mxu0 %vm650_vm2, %v3058_v14 }
 0x2fd   : > { %2971 = vmatmul.mubr.msk.bf16.gmra.mrb[60].mxu1 %vm650_vm2, %v3058_v14  ;;  %1707 = vmatprep.mubr.bf16.mxu0 %v4164_v13 }
 0x2fe   : > { %1760 = vmatprep.mubr.bf16.mxu1 %v4164_v13 }
 0x3b7   : > { %v1380_v19 = vpop.f32.mrb[48].mxu0 }
 0x3b8   : > { %v1433_v16 = vpop.f32.mrb[48].mxu1  ;;  %v1381_v57 = vadd.f32 %v1380_v19, %v3654_v53  ;;  %v1382_v15 = vpop.f32.mrb[49].mxu0 }
 0x3b9   : > { %v1434_v33 = vadd.f32 %v1433_v16, %v3654_v53  ;;  %v1435_v46 = vpop.f32.mrb[49].mxu1  ;;  %v1383_v12 = vadd.f32 %v1382_v15, %v3654_v53  ;;  %v1384_v61 = vpop.f32.mrb[50].mxu0 }
 0x3ba   : > { %v1436_v24 = vadd.f32 %v1435_v46, %v3654_v53  ;;  %v1437_v23 = vpop.f32.mrb[50].mxu1  ;;  %v1558_v18 = vmul.f32 0.2, %v1381_v57  ;;  %v1385_v55 = vadd.f32 %v1384_v61, %v3656_v54  ;;  %v1386_v31 = vpop.f32.mrb[51].mxu0 }
 0x3bb   : > { %v1560_v43 = vmul.f32 0.2, %v1434_v33  ;;  %v1438_v14 = vadd.f32 %v1437_v23, %v3656_v54  ;;  %v1439_v6 = vpop.f32.mrb[51].mxu1  ;;  %v1559_v48 = vmul.f32 0.2, %v1383_v12  ;;  %v1387_v52 = vadd.f32 %v1386_v31, %v3656_v54  ;;  %v3668_v61 = vpop.permute.xlu0 %1327 }
 0x3bc   : > { %v1561_v28 = vmul.f32 0.2, %v1436_v24  ;;  %v1440_v0 = vadd.f32 %v1439_v6, %v3656_v54  ;;  %v1566_v60 = vmul.f32 0.2, %v1385_v55  ;;  %v1590_v19 = vmax.f32 %v1381_v57, %v1558_v18 }
 0x3bd   : > { %v1568_v1 = vmul.f32 0.2, %v1438_v14  ;;  %v1567_v50 = vmul.f32 0.2, %v1387_v52  ;;  %v1592_v16 = vmax.f32 %v1434_v33, %v1560_v43  ;;  %v1591_v23 = vmax.f32 %v1383_v12, %v1559_v48 }
 0x3be   : > { %v1569_v44 = vmul.f32 0.2, %v1440_v0  ;;  %v1598_v15 = vmax.f32 %v1385_v55, %v1566_v60  ;;  %v1593_v37 = vmax.f32 %v1436_v24, %v1561_v28 }
 0x3bf   : > { %v1600_v46 = vmax.f32 %v1438_v14, %v1568_v1  ;;  %v1599_v41 = vmax.f32 %v1387_v52, %v1567_v50  ;;  %v1390_v59 = vpop.f32.mrb[52].mxu0 }
 0x3c0   : > { %v1601_v27 = vmax.f32 %v1440_v0, %v1569_v44  ;;  %v1443_v31 = vpop.f32.mrb[52].mxu1  ;;  %v1627_v25 = vpack.c.bf16 %v1598_v15, %v1590_v19  ;;  %v1391_v62 = vadd.f32 %v1390_v59, %v3666_v32  ;;  %v1392_v34 = vpop.f32.mrb[53].mxu0 }
 0x3c1   : > { %v1629_v6 = vpack.c.bf16 %v1600_v46, %v1592_v16  ;;  %v1444_v11 = vadd.f32 %v1443_v31, %v3666_v32  ;;  %v1445_v29 = vpop.f32.mrb[53].mxu1  ;;  %v1393_v57 = vadd.f32 %v1392_v34, %v3666_v32  ;;  %v1394_v18 = vpop.f32.mrb[54].mxu0  ;;  %v1628_v12 = vpack.c.bf16 %v1599_v41, %v1591_v23 }
 0x3c2   : > { %v1446_v33 = vadd.f32 %v1445_v29, %v3666_v32  ;;  %v1447_v43 = vpop.f32.mrb[54].mxu1  ;;  %v1630_v24 = vpack.c.bf16 %v1601_v27, %v1593_v37  ;;  %v1574_v55 = vmul.f32 0.2, %v1391_v62  ;;  %v1395_v48 = vadd.f32 %v1394_v18, %v3668_v61  ;;  %v1396_v52 = vpop.f32.mrb[55].mxu0 }
 0x3c3   : > { %v1576_v14 = vmul.f32 0.2, %v1444_v11  ;;  %v1448_v28 = vadd.f32 %v1447_v43, %v3668_v61  ;;  %v1449_v59 = vpop.f32.mrb[55].mxu1  ;;  %v1575_v0 = vmul.f32 0.2, %v1393_v57  ;;  %v1397_v1 = vadd.f32 %v1396_v52, %v3668_v61  ;;  %1675 = vmatprep.subr.bf16.mxu0 %v1628_v12 }
 0x3c4   : > { %v1577_v60 = vmul.f32 0.2, %v1446_v33  ;;  %v1450_v34 = vadd.f32 %v1449_v59, %v3668_v61  ;;  %1728 = vmatprep.subr.bf16.mxu1 %v1630_v24  ;;  %v1582_v29 = vmul.f32 0.2, %v1395_v48  ;;  %1676 = vmatpush1.bf16.msra.mxu0 %v1627_v25  ;;  %v1606_v37 = vmax.f32 %v1391_v62, %v1574_v55 }
 0x3c5   : > { %v1584_v50 = vmul.f32 0.2, %v1448_v28  ;;  %1729 = vmatpush1.bf16.msra.mxu1 %v1629_v6  ;;  %v1583_v27 = vmul.f32 0.2, %v1397_v1  ;;  %v1608_v44 = vmax.f32 %v1444_v11, %v1576_v14  ;;  %v1607_v15 = vmax.f32 %v1393_v57, %v1575_v0 }
 0x3c6   : > { %v1585_v41 = vmul.f32 0.2, %v1450_v34  ;;  %v1614_v19 = vmax.f32 %v1395_v48, %v1582_v29  ;;  %v1609_v46 = vmax.f32 %v1446_v33, %v1577_v60 }
 0x3c7   : > { %v1616_v16 = vmax.f32 %v1448_v28, %v1584_v50  ;;  %v1615_v23 = vmax.f32 %v1397_v1, %v1583_v27  ;;  %v1486_v18 = vpop.f32.mrb[56].mxu0 }
 0x3c8   : > { %v1617_v31 = vmax.f32 %v1450_v34, %v1585_v41  ;;  %v1539_v43 = vpop.f32.mrb[56].mxu1  ;;  %v1635_v52 = vpack.c.bf16 %v1614_v19, %v1606_v37  ;;  %v1487_v12 = vadd.f32 %v1486_v18, %v3654_v53  ;;  %v1488_v25 = vpop.f32.mrb[57].mxu0 }
 0x3c9   : > { %v1637_v59 = vpack.c.bf16 %v1616_v16, %v1608_v44  ;;  %v1540_v24 = vadd.f32 %v1539_v43, %v3654_v53  ;;  %v1541_v6 = vpop.f32.mrb[57].mxu1  ;;  %v1489_v40 = vadd.f32 %v1488_v25, %v3654_v53  ;;  %v1490_v62 = vpop.f32.mrb[58].mxu0  ;;  %v1636_v57 = vpack.c.bf16 %v1615_v23, %v1607_v15 }
 0x3ca   : > { %v1542_v11 = vadd.f32 %v1541_v6, %v3654_v53  ;;  %v1543_v55 = vpop.f32.mrb[58].mxu1  ;;  %v1638_v33 = vpack.c.bf16 %v1617_v31, %v1609_v46  ;;  %v1562_v14 = vmul.f32 0.2, %v1487_v12  ;;  %v1491_v28 = vadd.f32 %v1490_v62, %v3656_v54  ;;  %v1492_v60 = vpop.f32.mrb[59].mxu0  ;;  %v3689_v53 = vld [vmem:[%s4124_s3 + $0x10] sm:$0xff]  }
 0x3cb   : > { %v1564_v48 = vmul.f32 0.2, %v1540_v24  ;;  %v1544_v0 = vadd.f32 %v1543_v55, %v3656_v54  ;;  %v1545_v1 = vpop.f32.mrb[59].mxu1  ;;  %v1563_v34 = vmul.f32 0.2, %v1489_v40  ;;  %v1493_v50 = vadd.f32 %v1492_v60, %v3656_v54  ;;  %1677 = vmatprep.subr.bf16.mxu0 %v1636_v57 }
 0x3cc   : > { %v1565_v29 = vmul.f32 0.2, %v1542_v11  ;;  %v1546_v27 = vadd.f32 %v1545_v1, %v3656_v54  ;;  %1730 = vmatprep.subr.bf16.mxu1 %v1638_v33  ;;  %v1570_v41 = vmul.f32 0.2, %v1491_v28  ;;  %1678 = vmatpush1.bf16.msra.mxu0 %v1635_v52  ;;  %v1594_v44 = vmax.f32 %v1487_v12, %v1562_v14 }
 0x3cd   : > { %v1572_v37 = vmul.f32 0.2, %v1544_v0  ;;  %1731 = vmatpush1.bf16.msra.mxu1 %v1637_v59  ;;  %v1571_v19 = vmul.f32 0.2, %v1493_v50  ;;  %v1596_v15 = vmax.f32 %v1540_v24, %v1564_v48  ;;  %v1595_v46 = vmax.f32 %v1489_v40, %v1563_v34 }
 0x3ce   : > { %v1573_v16 = vmul.f32 0.2, %v1546_v27  ;;  %v1602_v23 = vmax.f32 %v1491_v28, %v1570_v41  ;;  %v1597_v18 = vmax.f32 %v1542_v11, %v1565_v29 }
 0x3cf   : > { %v1604_v31 = vmax.f32 %v1544_v0, %v1572_v37  ;;  %v1603_v54 = vmax.f32 %v1493_v50, %v1571_v19  ;;  %v1496_v25 = vpop.f32.mrb[60].mxu0  ;;  %2978 = vmatmul.mubr.msk.bf16.vlgmr.msra.gmra.mrb[64].mxu0 %vm650_vm2, %v3689_v53  ;;  %v3060_v37 = vld [vmem:[%s4124_s3 + $0x18] sm:$0xff]  }
 0x3d0   : > { %v1605_v43 = vmax.f32 %v1546_v27, %v1573_v16  ;;  %v1549_v6 = vpop.f32.mrb[60].mxu1  ;;  %2980 = vmatmul.mubr.msk.bf16.vlgmr.msra.gmra.mrb[64].mxu1 %vm650_vm2, %v3689_v53  ;;  %v1631_v52 = vpack.c.bf16 %v1602_v23, %v1594_v44  ;;  %v1497_v12 = vadd.f32 %v1496_v25, %v3666_v32  ;;  %v1498_v40 = vpop.f32.mrb[61].mxu0  ;;  %1717 = vmatprep.mubr.bf16.mxu0 %v4164_v13 }
 0x3d1   : > { %v1633_v59 = vpack.c.bf16 %v1604_v31, %v1596_v15  ;;  %v1550_v24 = vadd.f32 %v1549_v6, %v3666_v32  ;;  %v1551_v62 = vpop.f32.mrb[61].mxu1  ;;  %v1499_v11 = vadd.f32 %v1498_v40, %v3666_v32  ;;  %v1500_v57 = vpop.f32.mrb[62].mxu0  ;;  %v1632_v14 = vpack.c.bf16 %v1603_v54, %v1595_v46  ;;  %1770 = vmatprep.mubr.bf16.mxu1 %v4164_v13 }
 0x3d2   : > { %v1552_v55 = vadd.f32 %v1551_v62, %v3666_v32  ;;  %v1553_v33 = vpop.f32.mrb[62].mxu1  ;;  %v1634_v48 = vpack.c.bf16 %v1605_v43, %v1597_v18  ;;  %v1578_v28 = vmul.f32 0.2, %v1497_v12  ;;  %v1501_v60 = vadd.f32 %v1500_v57, %v3668_v61  ;;  %v1502_v34 = vpop.f32.mrb[63].mxu0 }
 0x3d3   : > { %v1580_v0 = vmul.f32 0.2, %v1550_v24  ;;  %v1554_v1 = vadd.f32 %v1553_v33, %v3668_v61  ;;  %v1555_v29 = vpop.f32.mrb[63].mxu1  ;;  %v1579_v50 = vmul.f32 0.2, %v1499_v11  ;;  %v1503_v41 = vadd.f32 %v1502_v34, %v3668_v61  ;;  %1781 = vmatprep.subr.bf16.mxu0 %v1632_v14  ;;  %v3730_v62 = vpop.permute.xlu0 %1648 }
 0x3d4   : > { %v1581_v27 = vmul.f32 0.2, %v1552_v55  ;;  %v1556_v32 = vadd.f32 %v1555_v29, %v3668_v61  ;;  %1834 = vmatprep.subr.bf16.mxu1 %v1634_v48  ;;  %v1586_v44 = vmul.f32 0.2, %v1501_v60  ;;  %1782 = vmatpush1.bf16.msra.mxu0 %v1631_v52  ;;  %v1610_v16 = vmax.f32 %v1497_v12, %v1578_v28 }
 0x3d5   : > { %v1588_v19 = vmul.f32 0.2, %v1554_v1  ;;  %1835 = vmatpush1.bf16.msra.mxu1 %v1633_v59  ;;  %v1587_v15 = vmul.f32 0.2, %v1503_v41  ;;  %v1612_v23 = vmax.f32 %v1550_v24, %v1580_v0  ;;  %v1611_v31 = vmax.f32 %v1499_v11, %v1579_v50 }
 0x3d6   : > { %v1589_v46 = vmul.f32 0.2, %v1556_v32  ;;  %v1618_v18 = vmax.f32 %v1501_v60, %v1586_v44  ;;  %v1613_v43 = vmax.f32 %v1552_v55, %v1581_v27  ;;  %v3082_v12 = vmov 5  }
 0x3d7   : > { %v1620_v54 = vmax.f32 %v1554_v1, %v1588_v19  ;;  %v1619_v25 = vmax.f32 %v1503_v41, %v1587_v15  ;;  %2979 = vmatmul.mubr.msk.bf16.gmra.mrb[68].mxu0 %vm650_vm2, %v3060_v37  ;;  %3047 = vset.pattern.permute.xlu1 %v3082_v12 }
 0x3d8   : > { %v1621_v61 = vmax.f32 %v1556_v32, %v1589_v46  ;;  %2981 = vmatmul.mubr.msk.bf16.gmra.mrb[68].mxu1 %vm650_vm2, %v3060_v37  ;;  %v1639_v6 = vpack.c.bf16 %v1618_v18, %v1610_v16  ;;  %1813 = vmatprep.mubr.bf16.mxu0 %v4164_v13 }
 0x3d9   : > { %v1641_v40 = vpack.c.bf16 %v1620_v54, %v1612_v23  ;;  %1866 = vmatprep.mubr.bf16.mxu1 %v4164_v13  ;;  %v1640_v52 = vpack.c.bf16 %v1619_v25, %v1611_v31  ;;  %3046 = vset.pattern.permute.xlu0 %v3082_v12 }
 0x3da   : > { %v1642_v59 = vpack.c.bf16 %v1621_v61, %v1613_v43  ;;  %2009 = vperm.xlu1 %3047, %v3639_v26   ;;  %2005 = vperm.xlu0 %3046, %v3633_v38  }
 0x3db   : > { %1783 = vmatprep.subr.bf16.mxu0 %v1640_v52 }
 0x3dc   : > { %1836 = vmatprep.subr.bf16.mxu1 %v1642_v59  ;;  %1784 = vmatpush1.bf16.msra.mxu0 %v1639_v6 }
 0x3dd   : > { %1837 = vmatpush1.bf16.msra.mxu1 %v1641_v40 }
 0x3de   : > { %2013 = vperm.xlu1 %3047, %v3645_v45   ;;  %2017 = vperm.xlu0 %3046, %v3651_v8  }
 0x3df   : > { %2982 = vmatmul.mubr.msk.bf16.vlgmr.msra.gmra.mrb[72].mxu0 %vm650_vm2, %v3689_v53 }
 0x3e0   : > { %2984 = vmatmul.mubr.msk.bf16.vlgmr.msra.gmra.mrb[72].mxu1 %vm650_vm2, %v3689_v53  ;;  %1823 = vmatprep.mubr.bf16.mxu0 %v4164_v13  ;;  %v3726_v53 = vpop.permute.xlu1 %1644 }
 0x3e1   : > { %1876 = vmatprep.mubr.bf16.mxu1 %v4164_v13 }
 0x3e4   : > { %v3728_v24 = vpop.permute.xlu1 %1652 }
 0x3e7   : > { %2983 = vmatmul.mubr.msk.bf16.gmra.mrb[76].mxu0 %vm650_vm2, %v3060_v37 }
 0x3e8   : > { %2985 = vmatmul.mubr.msk.bf16.gmra.mrb[76].mxu1 %vm650_vm2, %v3060_v37  ;;  %2068 = vmatprep.mubr.bf16.mxu0 %v4164_v13  ;;  %v3740_v40 = vpop.permute.xlu1 %1656 }
 0x3e9   : > { %2121 = vmatprep.mubr.bf16.mxu1 %v4164_v13 }
 0x4a2   : > { %v1709_v11 = vpop.f32.mrb[64].mxu0 }
 0x4a3   : > { %v1762_v55 = vpop.f32.mrb[64].mxu1  ;;  %v1710_v57 = vadd.f32 %v1709_v11, %v3726_v53  ;;  %v1711_v14 = vpop.f32.mrb[65].mxu0 }
 0x4a4   : > { %v1763_v33 = vadd.f32 %v1762_v55, %v3726_v53  ;;  %v1764_v48 = vpop.f32.mrb[65].mxu1  ;;  %v1712_v28 = vadd.f32 %v1711_v14, %v3726_v53  ;;  %v1713_v60 = vpop.f32.mrb[66].mxu0 }
 0x4a5   : > { %v1765_v0 = vadd.f32 %v1764_v48, %v3726_v53  ;;  %v1766_v1 = vpop.f32.mrb[66].mxu1  ;;  %v1887_v34 = vmul.f32 0.2, %v1710_v57  ;;  %v1714_v50 = vadd.f32 %v1713_v60, %v3730_v62  ;;  %v1715_v41 = vpop.f32.mrb[67].mxu0 }
 0x4a6   : > { %v1889_v29 = vmul.f32 0.2, %v1763_v33  ;;  %v1767_v27 = vadd.f32 %v1766_v1, %v3730_v62  ;;  %v1768_v32 = vpop.f32.mrb[67].mxu1  ;;  %v1888_v37 = vmul.f32 0.2, %v1712_v28  ;;  %v1716_v19 = vadd.f32 %v1715_v41, %v3730_v62 }
 0x4a7   : > { %v1890_v44 = vmul.f32 0.2, %v1765_v0  ;;  %v1769_v16 = vadd.f32 %v1768_v32, %v3730_v62  ;;  %v1919_v15 = vmax.f32 %v1710_v57, %v1887_v34  ;;  %v1895_v23 = vmul.f32 0.2, %v1714_v50 }
 0x4a8   : > { %v1921_v46 = vmax.f32 %v1763_v33, %v1889_v29  ;;  %v1897_v31 = vmul.f32 0.2, %v1767_v27  ;;  %v1920_v18 = vmax.f32 %v1712_v28, %v1888_v37  ;;  %v1896_v43 = vmul.f32 0.2, %v1716_v19 }
 0x4a9   : > { %v1922_v54 = vmax.f32 %v1765_v0, %v1890_v44  ;;  %v1898_v25 = vmul.f32 0.2, %v1769_v16  ;;  %v1927_v61 = vmax.f32 %v1714_v50, %v1895_v23  ;;  %v3743_v52 = vadd.f32 %v1919_v15, %v3453_v10 }
 0x4aa   : > { %v1929_v6 = vmax.f32 %v1767_v27, %v1897_v31  ;;  %v3746_v59 = vadd.f32 %v1921_v46, %v3456_v30  ;;  %v1928_v12 = vmax.f32 %v1716_v19, %v1896_v43  ;;  %v1719_v11 = vpop.f32.mrb[68].mxu0  ;;  %v3749_v57 = vadd.f32 %v1920_v18, %v3459_v3 }
 0x4ab   : > { %v1772_v55 = vpop.f32.mrb[68].mxu1  ;;  %v1930_v33 = vmax.f32 %v1769_v16, %v1898_v25  ;;  %v1720_v14 = vadd.f32 %v1719_v11, %v3728_v24  ;;  %v1721_v28 = vpop.f32.mrb[69].mxu0  ;;  %v3754_v60 = vadd.f32 %v1922_v54, %v3464_v5  ;;  %v3757_v10 = vadd.f32 %v1927_v61, %v3467_v58 }
 0x4ac   : > { %v1773_v48 = vadd.f32 %v1772_v55, %v3728_v24  ;;  %v1774_v0 = vpop.f32.mrb[69].mxu1  ;;  %v1722_v30 = vadd.f32 %v1721_v28, %v3728_v24  ;;  %v1723_v3 = vpop.f32.mrb[70].mxu0  ;;  %v3764_v29 = vadd.f32 %v1929_v6, %v3474_v20  ;;  %v3767_v50 = vadd.f32 %v1928_v12, %v3477_v7 }
 0x4ad   : > { %v3761_v1 = vadd.f32 %v1774_v0, %v3728_v24  ;;  %v1776_v34 = vpop.f32.mrb[70].mxu1  ;;  %v1903_v27 = vmul.f32 0.2, %v1720_v14  ;;  %v1725_v5 = vpop.f32.mrb[71].mxu0  ;;  %v1724_v44 = vadd.f32 %v1723_v3, %v3740_v40  ;;  %v3773_v16 = vadd.f32 %v1930_v33, %v3483_v35 }
 0x4ae   : > { %v1905_v41 = vmul.f32 0.2, %v1773_v48  ;;  %v1778_v32 = vpop.f32.mrb[71].mxu1  ;;  %v1904_v37 = vmul.f32 0.2, %v1722_v30  ;;  %v1777_v19 = vadd.f32 %v1776_v34, %v3740_v40  ;;  %v1726_v20 = vadd.f32 %v1725_v5, %v3740_v40 }
 0x4af   : > { %v1906_v58 = vmul.f32 0.2, %v3761_v1  ;;  %v1935_v15 = vmax.f32 %v1720_v14, %v1903_v27  ;;  %v1779_v7 = vadd.f32 %v1778_v32, %v3740_v40  ;;  %v1911_v31 = vmul.f32 0.2, %v1724_v44 }
 0x4b0   : > { %v1937_v46 = vmax.f32 %v1773_v48, %v1905_v41  ;;  %v1936_v23 = vmax.f32 %v1722_v30, %v1904_v37  ;;  %v1913_v18 = vmul.f32 0.2, %v1777_v19  ;;  %v1988_v54 = vpack.c.bf16 %v3757_v10, %v3743_v52 }
 0x4b1   : > { %v1990_v43 = vpack.c.bf16 %v3764_v29, %v3746_v59  ;;  %v1912_v25 = vmul.f32 0.2, %v1726_v20  ;;  %v1914_v61 = vmul.f32 0.2, %v1779_v7  ;;  %v3782_v35 = vadd.f32 %v1935_v15, %v3492_v2 }
 0x4b2   : > { %v1938_v6 = vmax.f32 %v3761_v1, %v1906_v58  ;;  %v1943_v12 = vmax.f32 %v1724_v44, %v1911_v31  ;;  %v1945_v11 = vmax.f32 %v1777_v19, %v1913_v18  ;;  %v1815_v55 = vpop.f32.mrb[72].mxu0  ;;  %v1989_v28 = vpack.c.bf16 %v3767_v50, %v3749_v57 }
 0x4b3   : > { %v1868_v33 = vpop.f32.mrb[72].mxu1  ;;  %v1944_v14 = vmax.f32 %v1726_v20, %v1912_v25  ;;  %v1946_v48 = vmax.f32 %v1779_v7, %v1914_v61  ;;  %v1991_v0 = vpack.c.bf16 %v3773_v16, %v3754_v60  ;;  %v1817_v30 = vpop.f32.mrb[73].mxu0  ;;  %v3790_v34 = vadd.f32 %v1937_v46, %v3500_v17 }
 0x4b4   : > { %v1870_v3 = vpop.f32.mrb[73].mxu1  ;;  %v3793_v2 = vadd.f32 %v1936_v23, %v3503_v39  ;;  %v1816_v1 = vadd.f32 %v1815_v55, %v3726_v53  ;;  %v1869_v27 = vadd.f32 %v1868_v33, %v3726_v53  ;;  %v1819_v41 = vpop.f32.mrb[74].mxu0  ;;  %v3798_v32 = vadd.f32 %v1943_v12, %v3508_v47  ;;  %2036 = vmatprep.subr.bf16.mxu0 %v1989_v28 }
 0x4b5   : > { %v1872_v5 = vpop.f32.mrb[74].mxu1  ;;  %v3801_v37 = vadd.f32 %v1945_v11, %v3511_v49  ;;  %2089 = vmatprep.subr.bf16.mxu1 %v1991_v0  ;;  %v1818_v17 = vadd.f32 %v1817_v30, %v3726_v53  ;;  %v1821_v58 = vpop.f32.mrb[75].mxu0  ;;  %v3805_v39 = vadd.f32 %v1944_v14, %v3515_v42  ;;  %v3808_v19 = vadd.f32 %v1946_v48, %v3518_v21 }
 0x4b6   : > { %v1874_v44 = vpop.f32.mrb[75].mxu1  ;;  %2037 = vmatpush1.bf16.msra.mxu0 %v1988_v54  ;;  %2090 = vmatpush1.bf16.msra.mxu1 %v1990_v43  ;;  %v1891_v15 = vmul.f32 0.2, %v1816_v1  ;;  %v1893_v47 = vmul.f32 0.2, %v1869_v27  ;;  %v1871_v49 = vadd.f32 %v1870_v3, %v3726_v53  ;;  %v1820_v7 = vadd.f32 %v1819_v41, %v3730_v62 }
 0x4b7   : > { %v1892_v20 = vmul.f32 0.2, %v1818_v17  ;;  %v1873_v46 = vadd.f32 %v1872_v5, %v3730_v62  ;;  %v1822_v18 = vadd.f32 %v1821_v58, %v3730_v62  ;;  %v1875_v42 = vadd.f32 %v1874_v44, %v3730_v62 }
 0x4b8   : > { %v1923_v23 = vmax.f32 %v1816_v1, %v1891_v15  ;;  %v1925_v31 = vmax.f32 %v1869_v27, %v1893_v47  ;;  %v1894_v21 = vmul.f32 0.2, %v1871_v49  ;;  %v1899_v61 = vmul.f32 0.2, %v1820_v7 }
 0x4b9   : > { %v1924_v25 = vmax.f32 %v1818_v17, %v1892_v20  ;;  %v1901_v54 = vmul.f32 0.2, %v1873_v46  ;;  %v3816_v43 = vadd.f32 %v1938_v6, %v3526_v56  ;;  %v1996_v53 = vpack.c.bf16 %v3798_v32, %v3782_v35 }
 0x4ba   : > { %v1900_v12 = vmul.f32 0.2, %v1822_v18  ;;  %v1902_v11 = vmul.f32 0.2, %v1875_v42  ;;  %v1825_v55 = vpop.f32.mrb[76].mxu0  ;;  %v1998_v14 = vpack.c.bf16 %v3801_v37, %v3790_v34  ;;  %v1926_v48 = vmax.f32 %v1871_v49, %v1894_v21 }
 0x4bb   : > { %v1878_v33 = vpop.f32.mrb[76].mxu1  ;;  %v1931_v28 = vmax.f32 %v1820_v7, %v1899_v61  ;;  %v1933_v62 = vmax.f32 %v1873_v46, %v1901_v54  ;;  %v1827_v0 = vpop.f32.mrb[77].mxu0  ;;  %v3823_v3 = vadd.f32 %v1923_v23, %v3533_v51  ;;  %v1997_v6 = vpack.c.bf16 %v3805_v39, %v3793_v2  ;;  %v4184_v7 = vld [vmem:[#allocation11_spill] sm:$0xff]  ;;  %v4185_v61 = vld [vmem:[#allocation2_spill] sm:$0xff] }
 0x4bc   : > { %v1880_v30 = vpop.f32.mrb[77].mxu1  ;;  %v1932_v56 = vmax.f32 %v1822_v18, %v1900_v12  ;;  %v1999_v1 = vpack.c.bf16 %v3808_v19, %v3816_v43  ;;  %v1829_v27 = vpop.f32.mrb[78].mxu0  ;;  %v3830_v5 = vadd.f32 %v1925_v31, %v3540_v9  ;;  %v3833_v17 = vadd.f32 %v1924_v25, %v3543_v4  ;;  %v3061_v9 = vld [vmem:[%s4123_s2 + $0x20] sm:$0xff]  }
 0x4bd   : > { %v1882_v41 = vpop.f32.mrb[78].mxu1  ;;  %v1934_v58 = vmax.f32 %v1875_v42, %v1902_v11  ;;  %v1826_v44 = vadd.f32 %v1825_v55, %v3728_v24  ;;  %v1831_v51 = vpop.f32.mrb[79].mxu0  ;;  %v3837_v47 = vadd.f32 %v1926_v48, %v3547_v63  ;;  %v3840_v20 = vadd.f32 %v1931_v28, %v3550_v22  ;;  %2038 = vmatprep.subr.bf16.mxu0 %v1997_v6 }
 0x4be   : > { %v1884_v15 = vpop.f32.mrb[79].mxu1  ;;  %2091 = vmatprep.subr.bf16.mxu1 %v1999_v1  ;;  %v1879_v49 = vadd.f32 %v1878_v33, %v3728_v24  ;;  %v3847_v4 = vadd.f32 %v1933_v62, %v3557_v36  ;;  %v3850_v46 = vadd.f32 %v1932_v56, %v4184_v7  ;;  %2039 = vmatpush1.bf16.msra.mxu0 %v1996_v53 }
 0x4bf   : > { %2092 = vmatpush1.bf16.msra.mxu1 %v1998_v14  ;;  %v1828_v63 = vadd.f32 %v1827_v0, %v3728_v24  ;;  %v1907_v22 = vmul.f32 0.2, %v1826_v44  ;;  %v1881_v23 = vadd.f32 %v1880_v30, %v3728_v24  ;;  %v1830_v31 = vadd.f32 %v1829_v27, %v3740_v40  ;;  %v4186_v27 = vld [vmem:[#allocation3_spill] sm:$0xff] }
 0x4c0   : > { %v1883_v18 = vadd.f32 %v1882_v41, %v3740_v40  ;;  %v1909_v42 = vmul.f32 0.2, %v1879_v49  ;;  %v1832_v21 = vadd.f32 %v1831_v51, %v3740_v40  ;;  %v1885_v36 = vadd.f32 %v1884_v15, %v3740_v40  ;;  %v3062_v15 = vld [vmem:[%s4123_s2 + $0x28] sm:$0xff]  }
 0x4c1   : > { %v1908_v25 = vmul.f32 0.2, %v1828_v63  ;;  %v3859_v54 = vadd.f32 %v1934_v58, %v4185_v61  ;;  %v1910_v53 = vmul.f32 0.2, %v1881_v23  ;;  %v1915_v12 = vmul.f32 0.2, %v1830_v31  ;;  %2992 = vmatmul.mubr.msk.bf16.vlgmr.msra.gmra.mrb[80].mxu0 %vm650_vm2, %v3061_v9 }
 0x4c2   : > { %v1917_v11 = vmul.f32 0.2, %v1883_v18  ;;  %2994 = vmatmul.mubr.msk.bf16.vlgmr.msra.gmra.mrb[80].mxu1 %vm650_vm2, %v3061_v9  ;;  %v1992_v24 = vpack.c.bf16 %v3840_v20, %v3823_v3  ;;  %v1916_v33 = vmul.f32 0.2, %v1832_v21  ;;  %v1918_v14 = vmul.f32 0.2, %v1885_v36  ;;  %2078 = vmatprep.mubr.bf16.mxu0 %v4164_v13 }
 0x4c3   : > { %v1940_v55 = vmax.f32 %v1828_v63, %v1908_v25  ;;  %2131 = vmatprep.mubr.bf16.mxu1 %v4164_v13  ;;  %v1939_v40 = vmax.f32 %v1826_v44, %v1907_v22  ;;  %v1942_v48 = vmax.f32 %v1881_v23, %v1910_v53  ;;  %v1947_v28 = vmax.f32 %v1830_v31, %v1915_v12  ;;  %v4188_v58 = vld [vmem:[#allocation4_spill] sm:$0xff]  ;;  %v4192_v63 = vld [vmem:[#allocation5_spill] sm:$0xff]  ;;  %v4194_v23 = vld [vmem:[#allocation7_spill] sm:$0xff] }
 0x4c4   : > { %v1949_v62 = vmax.f32 %v1883_v18, %v1917_v11  ;;  %v1941_v0 = vmax.f32 %v1879_v49, %v1909_v42  ;;  %v1948_v30 = vmax.f32 %v1832_v21, %v1916_v33  ;;  %v1950_v56 = vmax.f32 %v1885_v36, %v1918_v14  ;;  %v4190_v49 = vld [vmem:[#allocation6_spill] sm:$0xff]  ;;  %v4196_v18 = vld [vmem:[#allocation8_spill] sm:$0xff]  ;;  %v4198_v25 = vld [vmem:[#allocation9_spill] sm:$0xff]  ;;  %v3926_v33 = vpop.permute.xlu1 %2009 }
 0x4c5   : > { %v1993_v6 = vpack.c.bf16 %v3850_v46, %v3833_v17  ;;  %v1994_v1 = vpack.c.bf16 %v3847_v4, %v3830_v5  ;;  %v3872_v41 = vadd.f32 %v1940_v55, %v4186_v27  ;;  %v3875_v51 = vadd.f32 %v1947_v28, %v4188_v58  ;;  %v4199_v36 = vld [vmem:[#allocation10_spill] sm:$0xff] }
 0x4c6   : > { %v1995_v44 = vpack.c.bf16 %v3859_v54, %v3837_v47  ;;  %v3883_v7 = vadd.f32 %v1942_v48, %v4190_v49  ;;  %v3886_v22 = vadd.f32 %v1949_v62, %v4192_v63  ;;  %v3889_v31 = vadd.f32 %v1948_v30, %v4194_v23 }
 0x4c7   : > { %4187 = vst [vmem:[#allocation11_spill] sm:$0xff] %v3872_v41  ;;  %4189 = vst [vmem:[#allocation2_spill] sm:$0xff] %v3875_v51  ;;  %v3892_v42 = vadd.f32 %v1950_v56, %v4196_v18  ;;  %2142 = vmatprep.subr.bf16.mxu0 %v1993_v6  ;;  %v3895_v21 = vadd.f32 %v1939_v40, %v4198_v25  ;;  %v3898_v61 = vadd.f32 %v1941_v0, %v4199_v36  ;;  %v3083_v55 = vmov 6  }
 0x4c8   : > { %4191 = vst [vmem:[#allocation3_spill] sm:$0xff] %v3883_v7  ;;  %4193 = vst [vmem:[#allocation4_spill] sm:$0xff] %v3886_v22  ;;  %2195 = vmatprep.subr.bf16.mxu1 %v1995_v44  ;;  %2143 = vmatpush1.bf16.msra.mxu0 %v1992_v24  ;;  %v2001_v53 = vpack.c.bf16 %v3889_v31, %v3872_v41  ;;  %v3936_v25 = vpop.permute.xlu1 %2013 }
 0x4c9   : > { %4195 = vst [vmem:[#allocation6_spill] sm:$0xff] %v3889_v31  ;;  %4197 = vst [vmem:[#allocation5_spill] sm:$0xff] %v3892_v42  ;;  %2196 = vmatpush1.bf16.msra.mxu1 %v1994_v1  ;;  %v2003_v12 = vpack.c.bf16 %v3892_v42, %v3883_v7  ;;  %v2000_v11 = vpack.c.bf16 %v3875_v51, %v3895_v21  ;;  %2993 = vmatmul.mubr.msk.bf16.gmra.mrb[84].mxu0 %vm650_vm2, %v3062_v15 }
 0x4ca   : > { %2995 = vmatmul.mubr.msk.bf16.gmra.mrb[84].mxu1 %vm650_vm2, %v3062_v15  ;;  %v2002_v24 = vpack.c.bf16 %v3886_v22, %v3898_v61  ;;  %2144 = vmatprep.subr.bf16.mxu0 %v2001_v53 }
 0x4cb   : > { %2197 = vmatprep.subr.bf16.mxu1 %v2003_v12  ;;  %2174 = vmatprep.mubr.bf16.mxu0 %v4164_v13 }
 0x4cc   : > { %2145 = vmatpush1.bf16.msra.mxu0 %v2000_v11  ;;  %2227 = vmatprep.mubr.bf16.mxu1 %v4164_v13 }
 0x4cd   : > { %2198 = vmatpush1.bf16.msra.mxu1 %v2002_v24  ;;  %3048 = vset.pattern.permute.xlu1 %v3083_v55 }
 0x4ce   : > { %3049 = vset.pattern.permute.xlu0 %v3083_v55  ;;  %2334 = vperm.xlu1 %3048, %v3633_v38  }
 0x4cf   : > { %2338 = vperm.xlu0 %3049, %v3639_v26  }
 0x4d1   : > { %2996 = vmatmul.mubr.msk.bf16.vlgmr.msra.gmra.mrb[88].mxu0 %vm650_vm2, %v3061_v9 }
 0x4d2   : > { %2998 = vmatmul.mubr.msk.bf16.vlgmr.msra.gmra.mrb[88].mxu1 %vm650_vm2, %v3061_v9  ;;  %2184 = vmatprep.mubr.bf16.mxu0 %v4164_v13  ;;  %v3924_v9 = vpop.permute.xlu0 %2005 }
 0x4d3   : > { %2237 = vmatprep.mubr.bf16.mxu1 %v4164_v13  ;;  %2342 = vperm.xlu1 %3048, %v3645_v45  }
 0x4d7   : > { %2346 = vperm.xlu1 %3048, %v3651_v8  }
 0x4d9   : > { %2997 = vmatmul.mubr.msk.bf16.gmra.mrb[92].mxu0 %vm650_vm2, %v3062_v15 }
 0x4da   : > { %2999 = vmatmul.mubr.msk.bf16.gmra.mrb[92].mxu1 %vm650_vm2, %v3062_v15  ;;  %2397 = vmatprep.mubr.bf16.mxu0 %v4164_v13 }
 0x4db   : > { %2450 = vmatprep.mubr.bf16.mxu1 %v4164_v13 }
 0x594   : > { %v2070_v14 = vpop.f32.mrb[80].mxu0 }
 0x595   : > { %v2123_v40 = vpop.f32.mrb[80].mxu1  ;;  %v2071_v48 = vadd.f32 %v2070_v14, %v3924_v9  ;;  %v2072_v62 = vpop.f32.mrb[81].mxu0 }
 0x596   : > { %v2124_v28 = vadd.f32 %v2123_v40, %v3924_v9  ;;  %v2125_v0 = vpop.f32.mrb[81].mxu1  ;;  %v2073_v38 = vadd.f32 %v2072_v62, %v3924_v9  ;;  %v2074_v30 = vpop.f32.mrb[82].mxu0 }
 0x597   : > { %v2126_v26 = vadd.f32 %v2125_v0, %v3924_v9  ;;  %v2127_v45 = vpop.f32.mrb[82].mxu1  ;;  %v2248_v56 = vmul.f32 0.2, %v2071_v48  ;;  %v2075_v6 = vadd.f32 %v2074_v30, %v3926_v33  ;;  %v2076_v27 = vpop.f32.mrb[83].mxu0 }
 0x598   : > { %v2250_v8 = vmul.f32 0.2, %v2124_v28  ;;  %v2128_v1 = vadd.f32 %v2127_v45, %v3926_v33  ;;  %v2129_v58 = vpop.f32.mrb[83].mxu1  ;;  %v2249_v44 = vmul.f32 0.2, %v2073_v38  ;;  %v2077_v49 = vadd.f32 %v2076_v27, %v3926_v33  ;;  %v3938_v14 = vpop.permute.xlu0 %2017 }
 0x599   : > { %v2251_v15 = vmul.f32 0.2, %v2126_v26  ;;  %v2130_v63 = vadd.f32 %v2129_v58, %v3926_v33  ;;  %v2256_v23 = vmul.f32 0.2, %v2075_v6  ;;  %v2280_v12 = vmax.f32 %v2071_v48, %v2248_v56 }
 0x59a   : > { %v2258_v18 = vmul.f32 0.2, %v2128_v1  ;;  %v2257_v36 = vmul.f32 0.2, %v2077_v49  ;;  %v2282_v11 = vmax.f32 %v2124_v28, %v2250_v8  ;;  %v2281_v40 = vmax.f32 %v2073_v38, %v2249_v44 }
 0x59b   : > { %v2259_v53 = vmul.f32 0.2, %v2130_v63  ;;  %v2288_v24 = vmax.f32 %v2075_v6, %v2256_v23  ;;  %v2283_v62 = vmax.f32 %v2126_v26, %v2251_v15 }
 0x59c   : > { %v2290_v55 = vmax.f32 %v2128_v1, %v2258_v18  ;;  %v2289_v0 = vmax.f32 %v2077_v49, %v2257_v36  ;;  %v2080_v45 = vpop.f32.mrb[84].mxu0 }
 0x59d   : > { %v2291_v30 = vmax.f32 %v2130_v63, %v2259_v53  ;;  %v2133_v27 = vpop.f32.mrb[84].mxu1  ;;  %v2317_v42 = vpack.c.bf16 %v2288_v24, %v2280_v12  ;;  %v2081_v31 = vadd.f32 %v2080_v45, %v3936_v25  ;;  %v2082_v41 = vpop.f32.mrb[85].mxu0 }
 0x59e   : > { %v2319_v58 = vpack.c.bf16 %v2290_v55, %v2282_v11  ;;  %v2134_v7 = vadd.f32 %v2133_v27, %v3936_v25  ;;  %v2135_v22 = vpop.f32.mrb[85].mxu1  ;;  %v2083_v48 = vadd.f32 %v2082_v41, %v3936_v25  ;;  %v2084_v56 = vpop.f32.mrb[86].mxu0  ;;  %v2318_v38 = vpack.c.bf16 %v2289_v0, %v2281_v40 }
 0x59f   : > { %v2136_v28 = vadd.f32 %v2135_v22, %v3936_v25  ;;  %v2137_v8 = vpop.f32.mrb[86].mxu1  ;;  %v2320_v26 = vpack.c.bf16 %v2291_v30, %v2283_v62  ;;  %v2264_v6 = vmul.f32 0.2, %v2081_v31  ;;  %v2085_v44 = vadd.f32 %v2084_v56, %v3938_v14  ;;  %v2086_v49 = vpop.f32.mrb[87].mxu0 }
 0x5a0   : > { %v2266_v1 = vmul.f32 0.2, %v2134_v7  ;;  %v2138_v15 = vadd.f32 %v2137_v8, %v3938_v14  ;;  %v2139_v63 = vpop.f32.mrb[87].mxu1  ;;  %v2265_v23 = vmul.f32 0.2, %v2083_v48  ;;  %v2087_v36 = vadd.f32 %v2086_v49, %v3938_v14  ;;  %2365 = vmatprep.subr.bf16.mxu0 %v2318_v38 }
 0x5a1   : > { %v2267_v18 = vmul.f32 0.2, %v2136_v28  ;;  %v2140_v41 = vadd.f32 %v2139_v63, %v3938_v14  ;;  %2418 = vmatprep.subr.bf16.mxu1 %v2320_v26  ;;  %v2272_v22 = vmul.f32 0.2, %v2085_v44  ;;  %2366 = vmatpush1.bf16.msra.mxu0 %v2317_v42  ;;  %v2296_v24 = vmax.f32 %v2081_v31, %v2264_v6 }
 0x5a2   : > { %v2274_v53 = vmul.f32 0.2, %v2138_v15  ;;  %2419 = vmatpush1.bf16.msra.mxu1 %v2319_v58  ;;  %v2273_v12 = vmul.f32 0.2, %v2087_v36  ;;  %v2298_v55 = vmax.f32 %v2134_v7, %v2266_v1  ;;  %v2297_v0 = vmax.f32 %v2083_v48, %v2265_v23 }
 0x5a3   : > { %v2275_v11 = vmul.f32 0.2, %v2140_v41  ;;  %v2304_v40 = vmax.f32 %v2085_v44, %v2272_v22  ;;  %v2299_v30 = vmax.f32 %v2136_v28, %v2267_v18 }
 0x5a4   : > { %v2306_v62 = vmax.f32 %v2138_v15, %v2274_v53  ;;  %v2305_v45 = vmax.f32 %v2087_v36, %v2273_v12  ;;  %v2176_v56 = vpop.f32.mrb[88].mxu0 }
 0x5a5   : > { %v2307_v27 = vmax.f32 %v2140_v41, %v2275_v11  ;;  %v2229_v8 = vpop.f32.mrb[88].mxu1  ;;  %v2325_v49 = vpack.c.bf16 %v2304_v40, %v2296_v24  ;;  %v2177_v38 = vadd.f32 %v2176_v56, %v3924_v9  ;;  %v2178_v42 = vpop.f32.mrb[89].mxu0 }
 0x5a6   : > { %v2327_v63 = vpack.c.bf16 %v2306_v62, %v2298_v55  ;;  %v2230_v26 = vadd.f32 %v2229_v8, %v3924_v9  ;;  %v2231_v58 = vpop.f32.mrb[89].mxu1  ;;  %v2179_v51 = vadd.f32 %v2178_v42, %v3924_v9  ;;  %v2180_v31 = vpop.f32.mrb[90].mxu0  ;;  %v2326_v48 = vpack.c.bf16 %v2305_v45, %v2297_v0 }
 0x5a7   : > { %v2232_v7 = vadd.f32 %v2231_v58, %v3924_v9  ;;  %v2233_v6 = vpop.f32.mrb[90].mxu1  ;;  %v2328_v28 = vpack.c.bf16 %v2307_v27, %v2299_v30  ;;  %v2252_v1 = vmul.f32 0.2, %v2177_v38  ;;  %v2181_v15 = vadd.f32 %v2180_v31, %v3926_v33  ;;  %v2182_v18 = vpop.f32.mrb[91].mxu0  ;;  %v3959_v9 = vld [vmem:[%s4124_s3 + $0x20] sm:$0xff]  }
 0x5a8   : > { %v2254_v44 = vmul.f32 0.2, %v2230_v26  ;;  %v2234_v23 = vadd.f32 %v2233_v6, %v3926_v33  ;;  %v2235_v36 = vpop.f32.mrb[91].mxu1  ;;  %v2253_v41 = vmul.f32 0.2, %v2179_v51  ;;  %v2183_v53 = vadd.f32 %v2182_v18, %v3926_v33  ;;  %2367 = vmatprep.subr.bf16.mxu0 %v2326_v48 }
 0x5a9   : > { %v2255_v22 = vmul.f32 0.2, %v2232_v7  ;;  %v2236_v12 = vadd.f32 %v2235_v36, %v3926_v33  ;;  %2420 = vmatprep.subr.bf16.mxu1 %v2328_v28  ;;  %v2260_v11 = vmul.f32 0.2, %v2181_v15  ;;  %2368 = vmatpush1.bf16.msra.mxu0 %v2325_v49  ;;  %v2284_v55 = vmax.f32 %v2177_v38, %v2252_v1 }
 0x5aa   : > { %v2262_v24 = vmul.f32 0.2, %v2234_v23  ;;  %2421 = vmatpush1.bf16.msra.mxu1 %v2327_v63  ;;  %v2261_v40 = vmul.f32 0.2, %v2183_v53  ;;  %v2286_v0 = vmax.f32 %v2230_v26, %v2254_v44  ;;  %v2285_v30 = vmax.f32 %v2179_v51, %v2253_v41 }
 0x5ab   : > { %v2263_v62 = vmul.f32 0.2, %v2236_v12  ;;  %v2292_v45 = vmax.f32 %v2181_v15, %v2260_v11  ;;  %v2287_v56 = vmax.f32 %v2232_v7, %v2255_v22 }
 0x5ac   : > { %v2294_v27 = vmax.f32 %v2234_v23, %v2262_v24  ;;  %v2293_v33 = vmax.f32 %v2183_v53, %v2261_v40  ;;  %v2186_v42 = vpop.f32.mrb[92].mxu0  ;;  %3006 = vmatmul.mubr.msk.bf16.vlgmr.msra.gmra.mrb[96].mxu0 %vm650_vm2, %v3959_v9  ;;  %v3064_v24 = vld [vmem:[%s4124_s3 + $0x28] sm:$0xff]  }
 0x5ad   : > { %v2295_v8 = vmax.f32 %v2236_v12, %v2263_v62  ;;  %v2239_v58 = vpop.f32.mrb[92].mxu1  ;;  %3008 = vmatmul.mubr.msk.bf16.vlgmr.msra.gmra.mrb[96].mxu1 %vm650_vm2, %v3959_v9  ;;  %v2321_v49 = vpack.c.bf16 %v2292_v45, %v2284_v55  ;;  %v2187_v38 = vadd.f32 %v2186_v42, %v3936_v25  ;;  %v2188_v51 = vpop.f32.mrb[93].mxu0  ;;  %2407 = vmatprep.mubr.bf16.mxu0 %v4164_v13 }
 0x5ae   : > { %v2323_v63 = vpack.c.bf16 %v2294_v27, %v2286_v0  ;;  %v2240_v26 = vadd.f32 %v2239_v58, %v3936_v25  ;;  %v2241_v31 = vpop.f32.mrb[93].mxu1  ;;  %v2189_v7 = vadd.f32 %v2188_v51, %v3936_v25  ;;  %v2190_v48 = vpop.f32.mrb[94].mxu0  ;;  %v2322_v1 = vpack.c.bf16 %v2293_v33, %v2285_v30  ;;  %2460 = vmatprep.mubr.bf16.mxu1 %v4164_v13 }
 0x5af   : > { %v2242_v6 = vadd.f32 %v2241_v31, %v3936_v25  ;;  %v2243_v28 = vpop.f32.mrb[94].mxu1  ;;  %v2324_v44 = vpack.c.bf16 %v2295_v8, %v2287_v56  ;;  %v2268_v15 = vmul.f32 0.2, %v2187_v38  ;;  %v2191_v18 = vadd.f32 %v2190_v48, %v3938_v14  ;;  %v2192_v41 = vpop.f32.mrb[95].mxu0 }
 0x5b0   : > { %v2270_v23 = vmul.f32 0.2, %v2240_v26  ;;  %v2244_v36 = vadd.f32 %v2243_v28, %v3938_v14  ;;  %v2245_v22 = vpop.f32.mrb[95].mxu1  ;;  %v2269_v53 = vmul.f32 0.2, %v2189_v7  ;;  %v2193_v11 = vadd.f32 %v2192_v41, %v3938_v14  ;;  %2471 = vmatprep.subr.bf16.mxu0 %v2322_v1  ;;  %v3997_v31 = vpop.permute.xlu0 %2338 }
 0x5b1   : > { %v2271_v12 = vmul.f32 0.2, %v2242_v6  ;;  %v2246_v25 = vadd.f32 %v2245_v22, %v3938_v14  ;;  %2524 = vmatprep.subr.bf16.mxu1 %v2324_v44  ;;  %v2276_v55 = vmul.f32 0.2, %v2191_v18  ;;  %2472 = vmatpush1.bf16.msra.mxu0 %v2321_v49  ;;  %v2300_v62 = vmax.f32 %v2187_v38, %v2268_v15  ;;  %v2690_v38 = vld [vmem:[%s4126_s5] sm:$0xff] }
 0x5b2   : > { %v2278_v40 = vmul.f32 0.2, %v2244_v36  ;;  %2525 = vmatpush1.bf16.msra.mxu1 %v2323_v63  ;;  %v2277_v0 = vmul.f32 0.2, %v2193_v11  ;;  %v2302_v45 = vmax.f32 %v2240_v26, %v2270_v23  ;;  %v2301_v27 = vmax.f32 %v2189_v7, %v2269_v53 }
 0x5b3   : > { %v2279_v30 = vmul.f32 0.2, %v2246_v25  ;;  %v2308_v56 = vmax.f32 %v2191_v18, %v2276_v55  ;;  %v2303_v8 = vmax.f32 %v2242_v6, %v2271_v12  ;;  %v3084_v26 = vmov 7  }
 0x5b4   : > { %v2310_v33 = vmax.f32 %v2244_v36, %v2278_v40  ;;  %v2309_v42 = vmax.f32 %v2193_v11, %v2277_v0  ;;  %3007 = vmatmul.mubr.msk.bf16.gmra.mrb[100].mxu0 %vm650_vm2, %v3064_v24  ;;  %3050 = vset.pattern.permute.xlu0 %v3084_v26 }
 0x5b5   : > { %v2311_v14 = vmax.f32 %v2246_v25, %v2279_v30  ;;  %3009 = vmatmul.mubr.msk.bf16.gmra.mrb[100].mxu1 %vm650_vm2, %v3064_v24  ;;  %v2329_v58 = vpack.c.bf16 %v2308_v56, %v2300_v62  ;;  %2503 = vmatprep.mubr.bf16.mxu0 %v4164_v13 }
 0x5b6   : > { %v2331_v51 = vpack.c.bf16 %v2310_v33, %v2302_v45  ;;  %2556 = vmatprep.mubr.bf16.mxu1 %v4164_v13  ;;  %v2330_v49 = vpack.c.bf16 %v2309_v42, %v2301_v27  ;;  %2693 = vperm.xlu0 %3050, %v2690_v38  }
 0x5b7   : > { %v2332_v63 = vpack.c.bf16 %v2311_v14, %v2303_v8 }
 0x5b8   : > { %2473 = vmatprep.subr.bf16.mxu0 %v2330_v49 }
 0x5b9   : > { %2526 = vmatprep.subr.bf16.mxu1 %v2332_v63  ;;  %2474 = vmatpush1.bf16.msra.mxu0 %v2329_v58 }
 0x5ba   : > { %2527 = vmatpush1.bf16.msra.mxu1 %v2331_v51 }
 0x5bc   : > { %3010 = vmatmul.mubr.msk.bf16.vlgmr.msra.gmra.mrb[104].mxu0 %vm650_vm2, %v3959_v9 }
 0x5bd   : > { %3012 = vmatmul.mubr.msk.bf16.vlgmr.msra.gmra.mrb[104].mxu1 %vm650_vm2, %v3959_v9  ;;  %2513 = vmatprep.mubr.bf16.mxu0 %v4164_v13  ;;  %v3995_v9 = vpop.permute.xlu1 %2334 }
 0x5be   : > { %2566 = vmatprep.mubr.bf16.mxu1 %v4164_v13 }
 0x5c1   : > { %v3999_v7 = vpop.permute.xlu1 %2342 }
 0x5c4   : > { %3011 = vmatmul.mubr.msk.bf16.gmra.mrb[108].mxu0 %vm650_vm2, %v3064_v24 }
 0x5c5   : > { %3013 = vmatmul.mubr.msk.bf16.gmra.mrb[108].mxu1 %vm650_vm2, %v3064_v24  ;;  %2731 = vmatprep.mubr.bf16.mxu0 %v4164_v13  ;;  %v4009_v49 = vpop.permute.xlu1 %2346 }
 0x5c6   : > { %2772 = vmatprep.mubr.bf16.mxu1 %v4164_v13 }
 0x67f   : > { %v2399_v6 = vpop.f32.mrb[96].mxu0 }
 0x680   : > { %v2452_v48 = vpop.f32.mrb[96].mxu1  ;;  %v2400_v28 = vadd.f32 %v2399_v6, %v3995_v9  ;;  %v2401_v44 = vpop.f32.mrb[97].mxu0 }
 0x681   : > { %v2453_v1 = vadd.f32 %v2452_v48, %v3995_v9  ;;  %v2454_v15 = vpop.f32.mrb[97].mxu1  ;;  %v2402_v23 = vadd.f32 %v2401_v44, %v3995_v9  ;;  %v2403_v36 = vpop.f32.mrb[98].mxu0 }
 0x682   : > { %v2455_v18 = vadd.f32 %v2454_v15, %v3995_v9  ;;  %v2456_v41 = vpop.f32.mrb[98].mxu1  ;;  %v2577_v22 = vmul.f32 0.2, %v2400_v28  ;;  %v2404_v12 = vadd.f32 %v2403_v36, %v3997_v31  ;;  %v2405_v25 = vpop.f32.mrb[99].mxu0 }
 0x683   : > { %v2579_v53 = vmul.f32 0.2, %v2453_v1  ;;  %v2457_v11 = vadd.f32 %v2456_v41, %v3997_v31  ;;  %v2458_v24 = vpop.f32.mrb[99].mxu1  ;;  %v2578_v55 = vmul.f32 0.2, %v2402_v23  ;;  %v2406_v62 = vadd.f32 %v2405_v25, %v3997_v31 }
 0x684   : > { %v2580_v40 = vmul.f32 0.2, %v2455_v18  ;;  %v2459_v0 = vadd.f32 %v2458_v24, %v3997_v31  ;;  %v2609_v30 = vmax.f32 %v2400_v28, %v2577_v22  ;;  %v2585_v27 = vmul.f32 0.2, %v2404_v12 }
 0x685   : > { %v2611_v45 = vmax.f32 %v2453_v1, %v2579_v53  ;;  %v2587_v56 = vmul.f32 0.2, %v2457_v11  ;;  %v2586_v33 = vmul.f32 0.2, %v2406_v62  ;;  %v2610_v42 = vmax.f32 %v2402_v23, %v2578_v55 }
 0x686   : > { %v2588_v8 = vmul.f32 0.2, %v2459_v0  ;;  %v2612_v14 = vmax.f32 %v2455_v18, %v2580_v40  ;;  %v2617_v58 = vmax.f32 %v2404_v12, %v2585_v27  ;;  %v4012_v63 = vadd.f32 %v2609_v30, %v3743_v52 }
 0x687   : > { %v2619_v51 = vmax.f32 %v2457_v11, %v2587_v56  ;;  %v4015_v38 = vadd.f32 %v2611_v45, %v3746_v59  ;;  %v2618_v26 = vmax.f32 %v2406_v62, %v2586_v33  ;;  %v2409_v48 = vpop.f32.mrb[100].mxu0  ;;  %v2642_v56 = vadd.f32 %v2610_v42, %v3749_v57 }
 0x688   : > { %v2620_v6 = vmax.f32 %v2459_v0, %v2588_v8  ;;  %v2462_v28 = vpop.f32.mrb[100].mxu1  ;;  %v2649_v1 = vadd.f32 %v2617_v58, %v3757_v10  ;;  %v2410_v15 = vadd.f32 %v2409_v48, %v3999_v7  ;;  %v2411_v18 = vpop.f32.mrb[101].mxu0  ;;  %v2644_v33 = vadd.f32 %v2612_v14, %v3754_v60 }
 0x689   : > { %v2651_v44 = vadd.f32 %v2619_v51, %v3764_v29  ;;  %v2463_v23 = vadd.f32 %v2462_v28, %v3999_v7  ;;  %v2464_v36 = vpop.f32.mrb[101].mxu1  ;;  %v2650_v52 = vadd.f32 %v2618_v26, %v3767_v50  ;;  %v4024_v59 = vadd.f32 %v2411_v18, %v3999_v7  ;;  %v2413_v53 = vpop.f32.mrb[102].mxu0 }
 0x68a   : > { %v2652_v41 = vadd.f32 %v2620_v6, %v3773_v16  ;;  %v4027_v22 = vadd.f32 %v2464_v36, %v3999_v7  ;;  %v2466_v10 = vpop.f32.mrb[102].mxu1  ;;  %v2674_v29 = vpack.c.bf16 %v2649_v1, %v4012_v63  ;;  %v2593_v11 = vmul.f32 0.2, %v2410_v15  ;;  %v2415_v24 = vpop.f32.mrb[103].mxu0 }
 0x68b   : > { %v2676_v12 = vpack.c.bf16 %v2651_v44, %v4015_v38  ;;  %v2595_v25 = vmul.f32 0.2, %v2463_v23  ;;  %v2468_v55 = vpop.f32.mrb[103].mxu1  ;;  %v2594_v50 = vmul.f32 0.2, %v4024_v59  ;;  %v2414_v40 = vadd.f32 %v2413_v53, %v4009_v49 }
 0x68c   : > { %v2596_v16 = vmul.f32 0.2, %v4027_v22  ;;  %v2467_v62 = vadd.f32 %v2466_v10, %v4009_v49  ;;  %v2625_v0 = vmax.f32 %v2410_v15, %v2593_v11  ;;  %v2416_v45 = vadd.f32 %v2415_v24, %v4009_v49 }
 0x68d   : > { %v2627_v30 = vmax.f32 %v2463_v23, %v2595_v25  ;;  %v2469_v27 = vadd.f32 %v2468_v55, %v4009_v49  ;;  %v2601_v8 = vmul.f32 0.2, %v2414_v40  ;;  %v2626_v51 = vmax.f32 %v4024_v59, %v2594_v50 }
 0x68e   : > { %v2603_v58 = vmul.f32 0.2, %v2467_v62  ;;  %v2628_v63 = vmax.f32 %v4027_v22, %v2596_v16  ;;  %v2602_v38 = vmul.f32 0.2, %v2416_v45  ;;  %v4042_v6 = vadd.f32 %v2625_v0, %v3782_v35 }
 0x68f   : > { %v2604_v26 = vmul.f32 0.2, %v2469_v27  ;;  %v4045_v48 = vadd.f32 %v2627_v30, %v3790_v34  ;;  %v2633_v28 = vmax.f32 %v2414_v40, %v2601_v8  ;;  %v2505_v44 = vpop.f32.mrb[104].mxu0  ;;  %v2675_v14 = vpack.c.bf16 %v2650_v52, %v2642_v56 }
 0x690   : > { %v2635_v1 = vmax.f32 %v2467_v62, %v2603_v58  ;;  %v2558_v57 = vpop.f32.mrb[104].mxu1  ;;  %v2634_v42 = vmax.f32 %v2416_v45, %v2602_v38  ;;  %v2677_v15 = vpack.c.bf16 %v2652_v41, %v2644_v33  ;;  %v2507_v23 = vpop.f32.mrb[105].mxu0  ;;  %v2506_v35 = vadd.f32 %v2505_v44, %v3995_v9 }
 0x691   : > { %v2636_v60 = vmax.f32 %v2469_v27, %v2604_v26  ;;  %v2560_v18 = vpop.f32.mrb[105].mxu1  ;;  %v2665_v36 = vadd.f32 %v2633_v28, %v3798_v32  ;;  %v2559_v22 = vadd.f32 %v2558_v57, %v3995_v9  ;;  %v2509_v34 = vpop.f32.mrb[106].mxu0  ;;  %2699 = vmatprep.subr.bf16.mxu0 %v2675_v14  ;;  %v4054_v52 = vadd.f32 %v2507_v23, %v3995_v9 }
 0x692   : > { %v2667_v59 = vadd.f32 %v2635_v1, %v3801_v37  ;;  %v2562_v53 = vpop.f32.mrb[106].mxu1  ;;  %v2666_v10 = vadd.f32 %v2634_v42, %v3805_v39  ;;  %2740 = vmatprep.subr.bf16.mxu1 %v2677_v15  ;;  %v2511_v41 = vpop.f32.mrb[107].mxu0  ;;  %2700 = vmatpush1.bf16.msra.mxu0 %v2674_v29  ;;  %v2581_v24 = vmul.f32 0.2, %v2506_v35  ;;  %v4062_v39 = vadd.f32 %v2560_v18, %v3995_v9 }
 0x693   : > { %v2668_v11 = vadd.f32 %v2636_v60, %v3808_v19  ;;  %v2564_v25 = vpop.f32.mrb[107].mxu1  ;;  %v2682_v32 = vpack.c.bf16 %v2665_v36, %v4042_v6  ;;  %2741 = vmatpush1.bf16.msra.mxu1 %v2676_v12  ;;  %v2583_v55 = vmul.f32 0.2, %v2559_v22  ;;  %v4059_v50 = vmul.f32 0.2, %v4054_v52 }
 0x694   : > { %v2684_v37 = vpack.c.bf16 %v2667_v59, %v4045_v48  ;;  %v2510_v19 = vadd.f32 %v2509_v34, %v3997_v31  ;;  %v2563_v16 = vadd.f32 %v2562_v53, %v3997_v31  ;;  %v2613_v40 = vmax.f32 %v2506_v35, %v2581_v24 }
 0x695   : > { %v2615_v62 = vmax.f32 %v2559_v22, %v2583_v55  ;;  %v2512_v0 = vadd.f32 %v2511_v41, %v3997_v31  ;;  %v2565_v30 = vadd.f32 %v2564_v25, %v3997_v31  ;;  %v2658_v29 = vadd.f32 %v2626_v51, %v3793_v2  ;;  %v2673_v22 = vld [vmem:[%s4125_s4] sm:$0xf] }
 0x696   : > { %v2584_v12 = vmul.f32 0.2, %v4062_v39  ;;  %v2589_v45 = vmul.f32 0.2, %v2510_v19  ;;  %v2591_v27 = vmul.f32 0.2, %v2563_v16  ;;  %v2660_v56 = vadd.f32 %v2628_v63, %v3816_v43 }
 0x697   : > { %v2614_v9 = vmax.f32 %v4054_v52, %v4059_v50  ;;  %v2590_v33 = vmul.f32 0.2, %v2512_v0  ;;  %v2592_v8 = vmul.f32 0.2, %v2565_v30  ;;  %v2515_v58 = vpop.f32.mrb[108].mxu0  ;;  %v4074_v26 = vadd.f32 %v2613_v40, %v3823_v3 }
 0x698   : > { %v2568_v38 = vpop.f32.mrb[108].mxu1  ;;  %v4077_v31 = vadd.f32 %v2615_v62, %v3830_v5  ;;  %v2621_v2 = vmax.f32 %v2510_v19, %v2589_v45  ;;  %v2623_v51 = vmax.f32 %v2563_v16, %v2591_v27  ;;  %v2517_v6 = vpop.f32.mrb[109].mxu0  ;;  %v2683_v43 = vpack.c.bf16 %v2666_v10, %v2658_v29  ;;  %v4201_v27 = vld [vmem:[#allocation4_spill] sm:$0xff] }
 0x699   : > { %v2570_v48 = vpop.f32.mrb[109].mxu1  ;;  %v2622_v28 = vmax.f32 %v2512_v0, %v2590_v33  ;;  %v2624_v1 = vmax.f32 %v2565_v30, %v2592_v8  ;;  %v2685_v63 = vpack.c.bf16 %v2668_v11, %v2660_v56  ;;  %v2519_v44 = vpop.f32.mrb[110].mxu0  ;;  %v2616_v42 = vmax.f32 %v4062_v39, %v2584_v12  ;;  %v4202_v33 = vld [vmem:[#allocation11_spill] sm:$0xff] }
 0x69a   : > { %v2572_v57 = vpop.f32.mrb[110].mxu1  ;;  %v2653_v60 = vadd.f32 %v2621_v2, %v3840_v20  ;;  %v2655_v3 = vadd.f32 %v2623_v51, %v3847_v4  ;;  %v2516_v14 = vadd.f32 %v2515_v58, %v3999_v7  ;;  %v2521_v5 = vpop.f32.mrb[111].mxu0  ;;  %2701 = vmatprep.subr.bf16.mxu0 %v2683_v43  ;;  %v2569_v36 = vadd.f32 %v2568_v38, %v3999_v7 }
 0x69b   : > { %v2574_v15 = vpop.f32.mrb[111].mxu1  ;;  %v2654_v23 = vadd.f32 %v2622_v28, %v3850_v46  ;;  %v2656_v18 = vadd.f32 %v2624_v1, %v3859_v54  ;;  %2742 = vmatprep.subr.bf16.mxu1 %v2685_v63  ;;  %2702 = vmatpush1.bf16.msra.mxu0 %v2682_v32  ;;  %v2518_v4 = vadd.f32 %v2517_v6, %v3999_v7  ;;  %v2694_v6 = vpop.permute.xlu0 %2693 }
 0x69c   : > { %v2678_v59 = vpack.c.bf16 %v2653_v60, %v4074_v26  ;;  %v2680_v35 = vpack.c.bf16 %v2655_v3, %v4077_v31  ;;  %2743 = vmatpush1.bf16.msra.mxu1 %v2684_v37  ;;  %v2597_v20 = vmul.f32 0.2, %v2516_v14  ;;  %v2599_v46 = vmul.f32 0.2, %v2569_v36  ;;  %v4205_v26 = vld [vmem:[#allocation5_spill] sm:$0xff] }
 0x69d   : > { %v2571_v54 = vadd.f32 %v2570_v48, %v3999_v7  ;;  %v2520_v34 = vadd.f32 %v2519_v44, %v4009_v49  ;;  %v2573_v53 = vadd.f32 %v2572_v57, %v4009_v49  ;;  %v2598_v11 = vmul.f32 0.2, %v2518_v4 }
 0x69e   : > { %v2629_v10 = vmax.f32 %v2516_v14, %v2597_v20  ;;  %v2522_v52 = vadd.f32 %v2521_v5, %v4009_v49  ;;  %v2575_v41 = vadd.f32 %v2574_v15, %v4009_v49  ;;  %v2631_v25 = vmax.f32 %v2569_v36, %v2599_v46  ;;  %3014 = vmatmul.mubr.msk.bf16.vlgmr.msra.gmra.mrb[112].mxu0 %vm650_vm2, %v2673_v22 }
 0x69f   : > { %v2600_v32 = vmul.f32 0.2, %v2571_v54  ;;  %v2605_v37 = vmul.f32 0.2, %v2520_v34  ;;  %v2607_v24 = vmul.f32 0.2, %v2573_v53  ;;  %3015 = vmatmul.mubr.msk.bf16.vlgmr.msra.gmra.mrb[112].mxu1 %vm650_vm2, %v2673_v22  ;;  %v2646_v7 = vadd.f32 %v2614_v9, %v3833_v17  ;;  %2813 = vmatprep.mubr.bf16.mxu0 %v4164_v13 }
 0x6a0   : > { %v2630_v55 = vmax.f32 %v2518_v4, %v2598_v11  ;;  %v2606_v50 = vmul.f32 0.2, %v2522_v52  ;;  %v2608_v39 = vmul.f32 0.2, %v2575_v41  ;;  %2854 = vmatprep.mubr.bf16.mxu1 %v4164_v13  ;;  %v2648_v19 = vadd.f32 %v2616_v42, %v3837_v47  ;;  %v4200_v17 = vld [vmem:[#allocation2_spill] sm:$0xff]  ;;  %v4203_v13 = vld [vmem:[#allocation3_spill] sm:$0xff] }
 0x6a1   : > { %v2632_v49 = vmax.f32 %v2571_v54, %v2600_v32  ;;  %v2637_v16 = vmax.f32 %v2520_v34, %v2605_v37  ;;  %v2639_v40 = vmax.f32 %v2573_v53, %v2607_v24  ;;  %v2661_v62 = vadd.f32 %v2629_v10, %v3895_v21  ;;  %v4204_v47 = vld [vmem:[#allocation6_spill] sm:$0xff] }
 0x6a2   : > { %v2638_v0 = vmax.f32 %v2522_v52, %v2606_v50  ;;  %v2640_v30 = vmax.f32 %v2575_v41, %v2608_v39  ;;  %v2679_v29 = vpack.c.bf16 %v2654_v23, %v2646_v7  ;;  %v2663_v12 = vadd.f32 %v2631_v25, %v3898_v61 }
 0x6a3   : > { %v2669_v45 = vadd.f32 %v2637_v16, %v4200_v17  ;;  %v2671_v56 = vadd.f32 %v2639_v40, %v4201_v27  ;;  %v2681_v9 = vpack.c.bf16 %v2656_v18, %v2648_v19  ;;  %v2662_v8 = vadd.f32 %v2630_v55, %v4202_v33 }
 0x6a4   : > { %v2664_v58 = vadd.f32 %v2632_v49, %v4203_v13  ;;  %v2670_v38 = vadd.f32 %v2638_v0, %v4204_v47  ;;  %v2672_v31 = vadd.f32 %v2640_v30, %v4205_v26  ;;  %2781 = vmatprep.subr.bf16.mxu0 %v2679_v29 }
 0x6a5   : > { %v2686_v21 = vpack.c.bf16 %v2669_v45, %v2661_v62  ;;  %v2688_v2 = vpack.c.bf16 %v2671_v56, %v2663_v12  ;;  %2822 = vmatprep.subr.bf16.mxu1 %v2681_v9  ;;  %2782 = vmatpush1.bf16.msra.mxu0 %v2678_v59 }
 0x6a6   : > { %2823 = vmatpush1.bf16.msra.mxu1 %v2680_v35  ;;  %v2687_v61 = vpack.c.bf16 %v2670_v38, %v2662_v8  ;;  %v2689_v51 = vpack.c.bf16 %v2672_v31, %v2664_v58 }
 0x6a8   : > { %2783 = vmatprep.subr.bf16.mxu0 %v2687_v61  ;;  %2824 = vmatprep.subr.bf16.mxu1 %v2689_v51 }
 0x6a9   : > { %2784 = vmatpush1.bf16.msra.mxu0 %v2686_v21 }
 0x6aa   : > { %2825 = vmatpush1.bf16.msra.mxu1 %v2688_v2 }
 0x6ac   : > { %3016 = vmatmul.mubr.msk.bf16.vlgmr.msra.gmra.mrb[116].mxu0 %vm650_vm2, %v2673_v22 }
 0x6ad   : > { %3017 = vmatmul.mubr.msk.bf16.vlgmr.msra.gmra.mrb[116].mxu1 %vm650_vm2, %v2673_v22 }
 0x771   : > { %v2733_v48 = vpop.f32.mrb[112].mxu0 }
 0x772   : > { %v2774_v28 = vpop.f32.mrb[112].mxu1  ;;  %v2735_v1 = vpop.f32.mrb[113].mxu0  ;;  %v2734_v63 = vadd.f32 %v2733_v48, %v2694_v6 }
 0x773   : > { %v2776_v43 = vpop.f32.mrb[113].mxu1  ;;  %v2775_v44 = vadd.f32 %v2774_v28, %v2694_v6  ;;  %v2737_v57 = vpop.f32.mrb[114].mxu0  ;;  %v2736_v60 = vadd.f32 %v2735_v1, %v2694_v6 }
 0x774   : > { %v2778_v42 = vpop.f32.mrb[114].mxu1  ;;  %v2777_v3 = vadd.f32 %v2776_v43, %v2694_v6  ;;  %2863 = vst [vmem:[%s231_s10] sm:$0xff] %v2734_v63  ;;  %v2738_v14 = vpop.f32.mrb[115].mxu0 }
 0x775   : > { %2865 = vst [vmem:[%s231_s10 + $0x10] sm:$0xff] %v2775_v44  ;;  %v2779_v5 = vpop.f32.mrb[115].mxu1  ;;  %2864 = vst [vmem:[%s231_s10 + $0x8] sm:$0xff] %v2736_v60 }
 0x776   : > { %2866 = vst [vmem:[%s231_s10 + $0x18] sm:$0xff] %v2777_v3 }
 0x77f   : > { %v2815_v15 = vpop.f32.mrb[116].mxu0 }
 0x780   : > { %v2816_v23 = vadd.f32 %v2815_v15, %v2694_v6  ;;  %v2856_v18 = vpop.f32.mrb[116].mxu1  ;;  %v2817_v36 = vpop.f32.mrb[117].mxu0 }
 0x781   : > { %v2857_v59 = vadd.f32 %v2856_v18, %v2694_v6  ;;  %v2818_v35 = vadd.f32 %v2817_v36, %v2694_v6  ;;  %v2858_v20 = vpop.f32.mrb[117].mxu1  ;;  %v2819_v4 = vpop.f32.mrb[118].mxu0 }
 0x782   : > { %2867 = vst [vmem:[%s231_s10 + $0x20] sm:$0xff] %v2816_v23  ;;  %v2859_v22 = vadd.f32 %v2858_v20, %v2694_v6  ;;  %v2860_v46 = vpop.f32.mrb[118].mxu1  ;;  %v2820_v54 = vpop.f32.mrb[119].mxu0 }
 0x783   : > { %2869 = vst [vmem:[%s231_s10 + $0x30] sm:$0xff] %v2857_v59  ;;  %2868 = vst [vmem:[%s231_s10 + $0x28] sm:$0xff] %v2818_v35  ;;  %v2861_v34 = vpop.f32.mrb[119].mxu1 }
 0x784   : > { %2870 = vst [vmem:[%s231_s10 + $0x38] sm:$0xff] %v2859_v22 }
 0x785 PF: > { %s16_s21 = sadd.s32 1, %s3075_s21  }
 0x786   : > { %p13_p4 = scmp.ge.s32.totalorder %s16_s21, 4  }
 0x788   :  { %15 = sbr.rel (!%p13_p4) target bundleno = 1 (0x1), region = 76 }

</bundles_post_ra>
